<compile_context>
chip_gen: v5e
topology: v5e:2x2
jax: 0.10.0
libtpu: 0.0.40
codegen_flags: <defaults>
</compile_context>

<pallas_src>
import jax
import jax.numpy as jnp
from jax import lax
from jax.experimental import pallas as pl
from jax.experimental.pallas import tpu as pltpu

_VMEM_LIMIT_BYTES = 32 * 1024 * 1024     # <= v7x scoped default; plenty on v5e/v6e
_BLOCK_BUDGET_BYTES = 8 * 1024 * 1024    # budget for x blocks + proj/act scratch


def _round_up(x, m):
    return (x + m - 1) // m * m


def _block_budget_bytes():
    try:
        cap = pltpu.get_tpu_info().vmem_capacity_bytes
    except Exception:
        cap = 64 * 1024 * 1024
    return min(cap // 8, _BLOCK_BUDGET_BYTES)


def _choose_t_blk(T, Bp, D, H):
    """Largest divisor of T whose per-block VMEM footprint fits the budget."""
    per_t = 2 * Bp * D * 2           # double-buffered bf16 x block
    per_t += Bp * 4 * H * 4          # f32 hoisted-projection scratch
    per_t += Bp * 4 * H * 4          # f32 matmul temp before the scratch store
    per_t += Bp * H * 2              # bf16 inter-layer activation scratch
    cap = max(1, _block_budget_bytes() // per_t)
    cap = min(cap, 512)              # keep the per-step body / unrolled loop bounded
    for cand in range(min(T, cap), 0, -1):
        if T % cand == 0:
            return cand
    return 1


# --------------------------------------------------------------------------
# Fused Pallas kernel: all LSTM layers + FC head in one pallas_call.
# --------------------------------------------------------------------------
def _make_fused_kernel(num_layers, hidden_size):
    H = hidden_size

    def kernel(*refs):
        x_ref = refs[0]
        layer_refs = refs[1:1 + 3 * num_layers]          # (w_ih, w_hh, bias) per layer
        wfc_ref = refs[1 + 3 * num_layers]
        bfc_ref = refs[2 + 3 * num_layers]
        out_ref = refs[3 + 3 * num_layers]
        proj_sc, act_sc, h_sc, c_sc = refs[4 + 3 * num_layers:]

        T_BLK, Bp = x_ref.shape[0], x_ref.shape[1]
        unroll = min(T_BLK, 8)

        @pl.when(pl.program_id(0) == 0)
        def _init():
            h_sc[...] = jnp.zeros_like(h_sc)
            c_sc[...] = jnp.zeros_like(c_sc)
            out_ref[...] = jnp.zeros_like(out_ref)       # safety: never write-back garbage

        def run_layer(l, x2d_bf16, emit):
            w_ih = layer_refs[3 * l]
            w_hh = layer_refs[3 * l + 1]
            b = layer_refs[3 * l + 2]

            # Hoisted input projection: one large MXU matmul per (layer, block),
            # bias folded in, result parked in VMEM scratch (off the serial path,
            # bounds vreg pressure regardless of T_BLK).
            proj = jnp.dot(x2d_bf16, w_ih[...],
                           preferred_element_type=jnp.float32) + b[...]
            proj_sc[...] = proj.reshape(T_BLK, Bp, 4 * H)
            whh = w_hh[...]                               # resident bf16 weights, loaded once

            def step(t, carry):
                # Serial path: only the small recurrent matmul + elementwise gates.
                gates = proj_sc[t] + jnp.dot(
                    h_sc[l].astype(jnp.bfloat16), whh,
                    preferred_element_type=jnp.float32)
                # PyTorch gate order: [i, f, g, o].
                i = jax.nn.sigmoid(gates[:, 0 * H:1 * H])
                f = jax.nn.sigmoid(gates[:, 1 * H:2 * H])
                g = jnp.tanh(gates[:, 2 * H:3 * H])
                o = jax.nn.sigmoid(gates[:, 3 * H:4 * H])
                c = f * c_sc[l] + i * g
                h = o * jnp.tanh(c)
                c_sc[l] = c
                h_sc[l] = h
                emit(t, h)
                return carry

            lax.fori_loop(0, T_BLK, step, 0, unroll=unroll)

        def emit_act(t, h):
            # Inter-layer activations stay in VMEM (bf16: next layer's matmul input).
            act_sc[t] = h.astype(jnp.bfloat16)

        def emit_none(t, h):
            del t, h

        # Layer 0 reads the HBM-fed x block; every other layer reads the previous
        # layer's hidden states straight out of VMEM (act_sc) -- no HBM traffic.
        for l in range(num_layers):
            if l == 0:
                x2d = x_ref[...].reshape(T_BLK * Bp, x_ref.shape[2])
            else:
                x2d = act_sc[...].reshape(T_BLK * Bp, H)
            run_layer(l, x2d, emit_act if l < num_layers - 1 else emit_none)

        # Fused FC(H,1) + Sigmoid head on the final hidden state.
        @pl.when(pl.program_id(0) == pl.num_programs(0) - 1)
        def _head():
            h_last = h_sc[num_layers - 1].astype(jnp.bfloat16)
            logits = jnp.dot(h_last, wfc_ref[...],
                             preferred_element_type=jnp.float32) + bfc_ref[...]
            out_ref[...] = jax.nn.sigmoid(logits)

    return kernel


def _fused_forward(x_tm, layer_params, w_fc_t, b_fc, hidden_size):
    T, Bp, D = x_tm.shape
    H = hidden_size
    num_layers = len(layer_params)
    T_BLK = _choose_t_blk(T, Bp, D, H)
    grid = (T // T_BLK,)

    in_specs = [pl.BlockSpec((T_BLK, Bp, D), lambda t: (t, 0, 0))]   # x block (pipelined)
    args = [x_tm]
    for (w_ih_t, w_hh_t, bias) in layer_params:
        d_in = w_ih_t.shape[0]
        in_specs += [
            pl.BlockSpec((d_in, 4 * H), lambda t: (0, 0)),           # W_ih (resident)
            pl.BlockSpec((H, 4 * H), lambda t: (0, 0)),              # W_hh (resident)
            pl.BlockSpec((1, 4 * H), lambda t: (0, 0)),              # b_ih + b_hh
        ]
        args += [w_ih_t, w_hh_t, bias]
    in_specs += [
        pl.BlockSpec((H, 1), lambda t: (0, 0)),                      # W_fc
        pl.BlockSpec((1, 1), lambda t: (0, 0)),                      # b_fc
    ]
    args += [w_fc_t, b_fc]

    return pl.pallas_call(
        _make_fused_kernel(num_layers, H),
        out_shape=jax.ShapeDtypeStruct((Bp, 1), jnp.float32),
        grid=grid,
        in_specs=in_specs,
        out_specs=pl.BlockSpec((Bp, 1), lambda t: (0, 0)),           # resident output
        scratch_shapes=[
            pltpu.VMEM((T_BLK, Bp, 4 * H), jnp.float32),             # hoisted projection
            pltpu.VMEM((T_BLK, Bp, H), jnp.bfloat16),                # inter-layer activations
            pltpu.VMEM((num_layers, Bp, H), jnp.float32),            # h state (per layer)
            pltpu.VMEM((num_layers, Bp, H), jnp.float32),            # c state (per layer)
        ],
        compiler_params=pltpu.CompilerParams(
            dimension_semantics=("arbitrary",),                      # T is a serial recurrence
            vmem_limit_bytes=_VMEM_LIMIT_BYTES),
    )(*args)


@jax.jit
def lstm_classifier_forward(x, params):
    """x: (B, T, input_size) batch-first, same as the PyTorch module."""
    B, T, D = x.shape
    Bp = _round_up(B, 8)                                   # sublane-align the batch
    H = params["layers"][0][1].shape[0]
    # One-time time-major view of x (bf16: matmul input only); amortised over
    # the single fused kernel.
    x_tm = jnp.transpose(x, (1, 0, 2)).astype(jnp.bfloat16)
    if Bp != B:
        x_tm = jnp.pad(x_tm, ((0, 0), (0, Bp - B), (0, 0)))
    out = _fused_forward(x_tm, params["layers"], params["w_fc_t"], params["b_fc"], H)
    return out[:B]                                         # drop batch padding


def prepare_params(params):
    """One-time cast of all matmul weights to bf16 (MXU-native on v5e/v6e/v7x)."""
    layers = [(w_ih_t.astype(jnp.bfloat16), w_hh_t.astype(jnp.bfloat16), bias)
              for (w_ih_t, w_hh_t, bias) in params["layers"]]
    return {"layers": layers,
            "w_fc_t": params["w_fc_t"].astype(jnp.bfloat16),
            "b_fc": params["b_fc"]}


# --------------------------------------------------------------------------
# Deterministic parameter init (PyTorch-style U(-1/sqrt(H), 1/sqrt(H))), f32.
# --------------------------------------------------------------------------
def init_params(key, input_size, hidden_size, num_layers):
    bound = 1.0 / jnp.sqrt(jnp.float32(hidden_size))
    layers = []
    for layer in range(num_layers):
        d_in = input_size if layer == 0 else hidden_size
        key, k1, k2, k3, k4 = jax.random.split(key, 5)
        w_ih = jax.random.uniform(k1, (4 * hidden_size, d_in), jnp.float32, -bound, bound)
        w_hh = jax.random.uniform(k2, (4 * hidden_size, hidden_size), jnp.float32, -bound, bound)
        b_ih = jax.random.uniform(k3, (4 * hidden_size,), jnp.float32, -bound, bound)
        b_hh = jax.random.uniform(k4, (4 * hidden_size,), jnp.float32, -bound, bound)
        layers.append((w_ih.T, w_hh.T, (b_ih + b_hh)[None, :]))
    key, k5, k6 = jax.random.split(key, 3)
    w_fc = jax.random.uniform(k5, (1, hidden_size), jnp.float32, -bound, bound)
    b_fc = jax.random.uniform(k6, (1,), jnp.float32, -bound, bound)
    return {"layers": layers, "w_fc_t": w_fc.T, "b_fc": b_fc[None, :]}


# --------------------------------------------------------------------------
# Pure-JAX f32 reference (correctness check vs the PyTorch semantics).
# --------------------------------------------------------------------------
def reference_forward(x, params):
    B = x.shape[0]
    h_seq = x
    for (w_ih_t, w_hh_t, bias) in params["layers"]:
        H = w_hh_t.shape[0]
        h = jnp.zeros((B, H), jnp.float32)
        c = jnp.zeros((B, H), jnp.float32)
        outs = []
        for t in range(h_seq.shape[1]):
            gates = h_seq[:, t, :] @ w_ih_t + h @ w_hh_t + bias
            i = jax.nn.sigmoid(gates[:, 0 * H:1 * H])
            f = jax.nn.sigmoid(gates[:, 1 * H:2 * H])
            g = jnp.tanh(gates[:, 2 * H:3 * H])
            o = jax.nn.sigmoid(gates[:, 3 * H:4 * H])
            c = f * c + i * g
            h = o * jnp.tanh(c)
            outs.append(h)
        h_seq = jnp.stack(outs, axis=1)
    return jax.nn.sigmoid(h_seq[:, -1, :] @ params["w_fc_t"] + params["b_fc"])


# --------------------------------------------------------------------------
if __name__ == "__main__":
    B, T = 2, 8
    input_size, hidden_size, num_layers = 16, 32, 2

    key = jax.random.PRNGKey(0)
    key, xk = jax.random.split(key)
    x = jax.random.normal(xk, (B, T, input_size), jnp.float32)

    params = init_params(key, input_size, hidden_size, num_layers)
    bf16_params = prepare_params(params)

    out = lstm_classifier_forward(x, bf16_params)
    out = jax.block_until_ready(out)

    ref = reference_forward(x, params)
    assert out.shape == (B, 1), out.shape
    # bf16 matmul operands (f32 accumulation / gate math) => relaxed tolerance
    # vs the pure-f32 reference.
    assert jnp.allclose(out, ref, atol=2e-2, rtol=2e-2), (out, ref)

    print("KERNEL_OK")
</pallas_src>

<mosaic_0001>
module attributes {stable_mosaic.version = 11 : i64} {
  func.func @kernel(%arg0: i32, %arg1: memref<8x8x16xbf16, #tpu.memory_space<vmem>>, %arg2: memref<16x128xbf16, #tpu.memory_space<vmem>>, %arg3: memref<32x128xbf16, #tpu.memory_space<vmem>>, %arg4: memref<1x128xf32, #tpu.memory_space<vmem>>, %arg5: memref<32x128xbf16, #tpu.memory_space<vmem>>, %arg6: memref<32x128xbf16, #tpu.memory_space<vmem>>, %arg7: memref<1x128xf32, #tpu.memory_space<vmem>>, %arg8: memref<32x1xbf16, #tpu.memory_space<vmem>>, %arg9: memref<1x1xf32, #tpu.memory_space<vmem>>, %arg10: memref<8x1xf32, #tpu.memory_space<vmem>>, %arg11: memref<8x8x128xf32, #tpu.memory_space<vmem>>, %arg12: memref<8x8x32xbf16, #tpu.memory_space<vmem>>, %arg13: memref<2x8x32xf32, #tpu.memory_space<vmem>>, %arg14: memref<2x8x32xf32, #tpu.memory_space<vmem>>) attributes {dimension_semantics = [#tpu.dimension_semantics<arbitrary>], iteration_bounds = array<i64: 1>, scalar_prefetch = 0 : i64, scratch_operands = 4 : i64, tpu.core_type = #tpu.core_type<tc>, window_params = [{transform_indices = @transform_0, window_bounds = array<i64: 8, 8, 16>}, {pipeline_mode = #tpu.pipeline_mode<synchronous>, transform_indices = @transform_1, window_bounds = array<i64: 16, 128>}, {pipeline_mode = #tpu.pipeline_mode<synchronous>, transform_indices = @transform_2, window_bounds = array<i64: 32, 128>}, {pipeline_mode = #tpu.pipeline_mode<synchronous>, transform_indices = @transform_3, window_bounds = array<i64: 1, 128>}, {pipeline_mode = #tpu.pipeline_mode<synchronous>, transform_indices = @transform_4, window_bounds = array<i64: 32, 128>}, {pipeline_mode = #tpu.pipeline_mode<synchronous>, transform_indices = @transform_5, window_bounds = array<i64: 32, 128>}, {pipeline_mode = #tpu.pipeline_mode<synchronous>, transform_indices = @transform_6, window_bounds = array<i64: 1, 128>}, {pipeline_mode = #tpu.pipeline_mode<synchronous>, transform_indices = @transform_7, window_bounds = array<i64: 32, 1>}, {pipeline_mode = #tpu.pipeline_mode<synchronous>, transform_indices = @transform_8, window_bounds = array<i64: 1, 1>}, {pipeline_mode = #tpu.pipeline_mode<synchronous>, transform_indices = @transform_9, window_bounds = array<i64: 8, 1>}]} {
    %c0_i32 = arith.constant 0 : i32
    %0 = arith.cmpi eq, %arg0, %c0_i32 : i32
    %1 = arith.extui %0 : i1 to i32
    %c0_i32_0 = arith.constant 0 : i32
    %2 = arith.cmpi ne, %1, %c0_i32_0 : i32
    scf.if %2 {
      %cst_340 = arith.constant 0.000000e+00 : f32
      %722 = vector.broadcast %cst_340 : f32 to vector<2x8x32xf32>
      %c0_341 = arith.constant 0 : index
      %c0_342 = arith.constant 0 : index
      %c0_343 = arith.constant 0 : index
      %723 = vector.load %arg13[%c0_341, %c0_342, %c0_343] : memref<2x8x32xf32, #tpu.memory_space<vmem>>, vector<2x8x32xf32>
      tpu.vector_store %arg13[%c0_341, %c0_342, %c0_343], %722 {strides = array<i32>} : memref<2x8x32xf32, #tpu.memory_space<vmem>>, vector<2x8x32xf32>,
      %cst_344 = arith.constant 0.000000e+00 : f32
      %724 = vector.broadcast %cst_344 : f32 to vector<2x8x32xf32>
      %c0_345 = arith.constant 0 : index
      %c0_346 = arith.constant 0 : index
      %c0_347 = arith.constant 0 : index
      %725 = vector.load %arg14[%c0_345, %c0_346, %c0_347] : memref<2x8x32xf32, #tpu.memory_space<vmem>>, vector<2x8x32xf32>
      tpu.vector_store %arg14[%c0_345, %c0_346, %c0_347], %724 {strides = array<i32>} : memref<2x8x32xf32, #tpu.memory_space<vmem>>, vector<2x8x32xf32>,
      %cst_348 = arith.constant 0.000000e+00 : f32
      %726 = vector.broadcast %cst_348 : f32 to vector<8x1xf32>
      %c0_349 = arith.constant 0 : index
      %c0_350 = arith.constant 0 : index
      %727 = vector.load %arg10[%c0_349, %c0_350] : memref<8x1xf32, #tpu.memory_space<vmem>>, vector<8x1xf32>
      tpu.vector_store %arg10[%c0_349, %c0_350], %726 {strides = array<i32>} : memref<8x1xf32, #tpu.memory_space<vmem>>, vector<8x1xf32>,
    } else {
    }
    %c0 = arith.constant 0 : index
    %c0_1 = arith.constant 0 : index
    %c0_2 = arith.constant 0 : index
    %3 = vector.load %arg1[%c0, %c0_1, %c0_2] : memref<8x8x16xbf16, #tpu.memory_space<vmem>>, vector<8x8x16xbf16>
    %4 = vector.shape_cast %3 : vector<8x8x16xbf16> to vector<64x16xbf16>
    %c0_3 = arith.constant 0 : index
    %c0_4 = arith.constant 0 : index
    %5 = vector.load %arg2[%c0_3, %c0_4] : memref<16x128xbf16, #tpu.memory_space<vmem>>, vector<16x128xbf16>
    %cst = arith.constant dense<0.000000e+00> : vector<64x128xf32>
    %6 = tpu.matmul %4, %5, %cst {dimension_numbers = #tpu.dot_dimension_numbers<[1], [0], [0], [1], [0, 0, 1, 1], [], []>} : vector<64x16xbf16>, vector<16x128xbf16>, vector<64x128xf32> -> vector<64x128xf32>
    %c0_5 = arith.constant 0 : index
    %c0_6 = arith.constant 0 : index
    %7 = vector.load %arg4[%c0_5, %c0_6] : memref<1x128xf32, #tpu.memory_space<vmem>>, vector<1x128xf32>
    %8 = vector.broadcast %7 : vector<1x128xf32> to vector<64x128xf32>
    %9 = arith.addf %6, %8 : vector<64x128xf32>
    %10 = vector.shape_cast %9 : vector<64x128xf32> to vector<8x8x128xf32>
    %c0_7 = arith.constant 0 : index
    %c0_8 = arith.constant 0 : index
    %c0_9 = arith.constant 0 : index
    %11 = vector.load %arg11[%c0_7, %c0_8, %c0_9] : memref<8x8x128xf32, #tpu.memory_space<vmem>>, vector<8x8x128xf32>
    tpu.vector_store %arg11[%c0_7, %c0_8, %c0_9], %10 {strides = array<i32>} : memref<8x8x128xf32, #tpu.memory_space<vmem>>, vector<8x8x128xf32>,
    %c0_10 = arith.constant 0 : index
    %c0_11 = arith.constant 0 : index
    %12 = vector.load %arg3[%c0_10, %c0_11] : memref<32x128xbf16, #tpu.memory_space<vmem>>, vector<32x128xbf16>
    %c0_i32_12 = arith.constant 0 : i32
    %13 = arith.index_cast %c0_i32_12 : i32 to index
    %c0_13 = arith.constant 0 : index
    %c0_14 = arith.constant 0 : index
    %14 = vector.load %arg11[%13, %c0_13, %c0_14] : memref<8x8x128xf32, #tpu.memory_space<vmem>>, vector<1x8x128xf32>
    %15 = vector.shape_cast %14 : vector<1x8x128xf32> to vector<8x128xf32>
    %c0_15 = arith.constant 0 : index
    %c0_16 = arith.constant 0 : index
    %c0_17 = arith.constant 0 : index
    %16 = vector.load %arg13[%c0_15, %c0_16, %c0_17] : memref<2x8x32xf32, #tpu.memory_space<vmem>>, vector<1x8x32xf32>
    %17 = vector.shape_cast %16 : vector<1x8x32xf32> to vector<8x32xf32>
    %18 = arith.truncf %17 : vector<8x32xf32> to vector<8x32xbf16>
    %cst_18 = arith.constant dense<0.000000e+00> : vector<8x128xf32>
    %19 = tpu.matmul %18, %12, %cst_18 {dimension_numbers = #tpu.dot_dimension_numbers<[1], [0], [0], [1], [0, 0, 1, 1], [], []>} : vector<8x32xbf16>, vector<32x128xbf16>, vector<8x128xf32> -> vector<8x128xf32>
    %20 = arith.addf %15, %19 : vector<8x128xf32>
    %21 = vector.extract_strided_slice %20 {offsets = [0, 0], sizes = [8, 32], strides = [1, 1]} : vector<8x128xf32> to vector<8x32xf32>
    %22 = arith.negf %21 : vector<8x32xf32>
    %23 = math.exp %22 : vector<8x32xf32>
    %cst_19 = arith.constant 1.000000e+00 : f32
    %24 = vector.broadcast %cst_19 : f32 to vector<8x32xf32>
    %25 = arith.addf %24, %23 : vector<8x32xf32>
    %26 = arith.divf %24, %25 : vector<8x32xf32>
    %27 = vector.extract_strided_slice %20 {offsets = [0, 32], sizes = [8, 32], strides = [1, 1]} : vector<8x128xf32> to vector<8x32xf32>
    %28 = arith.negf %27 : vector<8x32xf32>
    %29 = math.exp %28 : vector<8x32xf32>
    %cst_20 = arith.constant 1.000000e+00 : f32
    %30 = vector.broadcast %cst_20 : f32 to vector<8x32xf32>
    %31 = arith.addf %30, %29 : vector<8x32xf32>
    %32 = arith.divf %30, %31 : vector<8x32xf32>
    %33 = vector.extract_strided_slice %20 {offsets = [0, 64], sizes = [8, 32], strides = [1, 1]} : vector<8x128xf32> to vector<8x32xf32>
    %34 = math.tanh %33 : vector<8x32xf32>
    %35 = vector.extract_strided_slice %20 {offsets = [0, 96], sizes = [8, 32], strides = [1, 1]} : vector<8x128xf32> to vector<8x32xf32>
    %36 = arith.negf %35 : vector<8x32xf32>
    %37 = math.exp %36 : vector<8x32xf32>
    %cst_21 = arith.constant 1.000000e+00 : f32
    %38 = vector.broadcast %cst_21 : f32 to vector<8x32xf32>
    %39 = arith.addf %38, %37 : vector<8x32xf32>
    %40 = arith.divf %38, %39 : vector<8x32xf32>
    %c0_22 = arith.constant 0 : index
    %c0_23 = arith.constant 0 : index
    %c0_24 = arith.constant 0 : index
    %41 = vector.load %arg14[%c0_22, %c0_23, %c0_24] : memref<2x8x32xf32, #tpu.memory_space<vmem>>, vector<1x8x32xf32>
    %42 = vector.shape_cast %41 : vector<1x8x32xf32> to vector<8x32xf32>
    %43 = arith.mulf %32, %42 : vector<8x32xf32>
    %44 = arith.mulf %26, %34 : vector<8x32xf32>
    %45 = arith.addf %43, %44 : vector<8x32xf32>
    %46 = math.tanh %45 : vector<8x32xf32>
    %47 = arith.mulf %40, %46 : vector<8x32xf32>
    %c0_25 = arith.constant 0 : index
    %c0_26 = arith.constant 0 : index
    %c0_27 = arith.constant 0 : index
    %48 = vector.load %arg14[%c0_25, %c0_26, %c0_27] : memref<2x8x32xf32, #tpu.memory_space<vmem>>, vector<1x8x32xf32>
    %49 = vector.shape_cast %48 : vector<1x8x32xf32> to vector<8x32xf32>
    %50 = vector.shape_cast %45 : vector<8x32xf32> to vector<1x8x32xf32>
    tpu.vector_store %arg14[%c0_25, %c0_26, %c0_27], %50 {strides = array<i32>} : memref<2x8x32xf32, #tpu.memory_space<vmem>>, vector<1x8x32xf32>,
    %c0_28 = arith.constant 0 : index
    %c0_29 = arith.constant 0 : index
    %c0_30 = arith.constant 0 : index
    %51 = vector.load %arg13[%c0_28, %c0_29, %c0_30] : memref<2x8x32xf32, #tpu.memory_space<vmem>>, vector<1x8x32xf32>
    %52 = vector.shape_cast %51 : vector<1x8x32xf32> to vector<8x32xf32>
    %53 = vector.shape_cast %47 : vector<8x32xf32> to vector<1x8x32xf32>
    tpu.vector_store %arg13[%c0_28, %c0_29, %c0_30], %53 {strides = array<i32>} : memref<2x8x32xf32, #tpu.memory_space<vmem>>, vector<1x8x32xf32>,
    %54 = arith.truncf %47 : vector<8x32xf32> to vector<8x32xbf16>
    %55 = arith.index_cast %c0_i32_12 : i32 to index
    %c0_31 = arith.constant 0 : index
    %c0_32 = arith.constant 0 : index
    %56 = vector.load %arg12[%55, %c0_31, %c0_32] : memref<8x8x32xbf16, #tpu.memory_space<vmem>>, vector<1x8x32xbf16>
    %57 = vector.shape_cast %56 : vector<1x8x32xbf16> to vector<8x32xbf16>
    %58 = vector.shape_cast %54 : vector<8x32xbf16> to vector<1x8x32xbf16>
    tpu.vector_store %arg12[%55, %c0_31, %c0_32], %58 {strides = array<i32>} : memref<8x8x32xbf16, #tpu.memory_space<vmem>>, vector<1x8x32xbf16>,
    %c1_i32 = arith.constant 1 : i32
    %59 = arith.index_cast %c1_i32 : i32 to index
    %c0_33 = arith.constant 0 : index
    %c0_34 = arith.constant 0 : index
    %60 = vector.load %arg11[%59, %c0_33, %c0_34] : memref<8x8x128xf32, #tpu.memory_space<vmem>>, vector<1x8x128xf32>
    %61 = vector.shape_cast %60 : vector<1x8x128xf32> to vector<8x128xf32>
    %c0_35 = arith.constant 0 : index
    %c0_36 = arith.constant 0 : index
    %c0_37 = arith.constant 0 : index
    %62 = vector.load %arg13[%c0_35, %c0_36, %c0_37] : memref<2x8x32xf32, #tpu.memory_space<vmem>>, vector<1x8x32xf32>
    %63 = vector.shape_cast %62 : vector<1x8x32xf32> to vector<8x32xf32>
    %64 = arith.truncf %63 : vector<8x32xf32> to vector<8x32xbf16>
    %cst_38 = arith.constant dense<0.000000e+00> : vector<8x128xf32>
    %65 = tpu.matmul %64, %12, %cst_38 {dimension_numbers = #tpu.dot_dimension_numbers<[1], [0], [0], [1], [0, 0, 1, 1], [], []>} : vector<8x32xbf16>, vector<32x128xbf16>, vector<8x128xf32> -> vector<8x128xf32>
    %66 = arith.addf %61, %65 : vector<8x128xf32>
    %67 = vector.extract_strided_slice %66 {offsets = [0, 0], sizes = [8, 32], strides = [1, 1]} : vector<8x128xf32> to vector<8x32xf32>
    %68 = arith.negf %67 : vector<8x32xf32>
    %69 = math.exp %68 : vector<8x32xf32>
    %cst_39 = arith.constant 1.000000e+00 : f32
    %70 = vector.broadcast %cst_39 : f32 to vector<8x32xf32>
    %71 = arith.addf %70, %69 : vector<8x32xf32>
    %72 = arith.divf %70, %71 : vector<8x32xf32>
    %73 = vector.extract_strided_slice %66 {offsets = [0, 32], sizes = [8, 32], strides = [1, 1]} : vector<8x128xf32> to vector<8x32xf32>
    %74 = arith.negf %73 : vector<8x32xf32>
    %75 = math.exp %74 : vector<8x32xf32>
    %cst_40 = arith.constant 1.000000e+00 : f32
    %76 = vector.broadcast %cst_40 : f32 to vector<8x32xf32>
    %77 = arith.addf %76, %75 : vector<8x32xf32>
    %78 = arith.divf %76, %77 : vector<8x32xf32>
    %79 = vector.extract_strided_slice %66 {offsets = [0, 64], sizes = [8, 32], strides = [1, 1]} : vector<8x128xf32> to vector<8x32xf32>
    %80 = math.tanh %79 : vector<8x32xf32>
    %81 = vector.extract_strided_slice %66 {offsets = [0, 96], sizes = [8, 32], strides = [1, 1]} : vector<8x128xf32> to vector<8x32xf32>
    %82 = arith.negf %81 : vector<8x32xf32>
    %83 = math.exp %82 : vector<8x32xf32>
    %cst_41 = arith.constant 1.000000e+00 : f32
    %84 = vector.broadcast %cst_41 : f32 to vector<8x32xf32>
    %85 = arith.addf %84, %83 : vector<8x32xf32>
    %86 = arith.divf %84, %85 : vector<8x32xf32>
    %c0_42 = arith.constant 0 : index
    %c0_43 = arith.constant 0 : index
    %c0_44 = arith.constant 0 : index
    %87 = vector.load %arg14[%c0_42, %c0_43, %c0_44] : memref<2x8x32xf32, #tpu.memory_space<vmem>>, vector<1x8x32xf32>
    %88 = vector.shape_cast %87 : vector<1x8x32xf32> to vector<8x32xf32>
    %89 = arith.mulf %78, %88 : vector<8x32xf32>
    %90 = arith.mulf %72, %80 : vector<8x32xf32>
    %91 = arith.addf %89, %90 : vector<8x32xf32>
    %92 = math.tanh %91 : vector<8x32xf32>
    %93 = arith.mulf %86, %92 : vector<8x32xf32>
    %c0_45 = arith.constant 0 : index
    %c0_46 = arith.constant 0 : index
    %c0_47 = arith.constant 0 : index
    %94 = vector.load %arg14[%c0_45, %c0_46, %c0_47] : memref<2x8x32xf32, #tpu.memory_space<vmem>>, vector<1x8x32xf32>
    %95 = vector.shape_cast %94 : vector<1x8x32xf32> to vector<8x32xf32>
    %96 = vector.shape_cast %91 : vector<8x32xf32> to vector<1x8x32xf32>
    tpu.vector_store %arg14[%c0_45, %c0_46, %c0_47], %96 {strides = array<i32>} : memref<2x8x32xf32, #tpu.memory_space<vmem>>, vector<1x8x32xf32>,
    %c0_48 = arith.constant 0 : index
    %c0_49 = arith.constant 0 : index
    %c0_50 = arith.constant 0 : index
    %97 = vector.load %arg13[%c0_48, %c0_49, %c0_50] : memref<2x8x32xf32, #tpu.memory_space<vmem>>, vector<1x8x32xf32>
    %98 = vector.shape_cast %97 : vector<1x8x32xf32> to vector<8x32xf32>
    %99 = vector.shape_cast %93 : vector<8x32xf32> to vector<1x8x32xf32>
    tpu.vector_store %arg13[%c0_48, %c0_49, %c0_50], %99 {strides = array<i32>} : memref<2x8x32xf32, #tpu.memory_space<vmem>>, vector<1x8x32xf32>,
    %100 = arith.truncf %93 : vector<8x32xf32> to vector<8x32xbf16>
    %101 = arith.index_cast %c1_i32 : i32 to index
    %c0_51 = arith.constant 0 : index
    %c0_52 = arith.constant 0 : index
    %102 = vector.load %arg12[%101, %c0_51, %c0_52] : memref<8x8x32xbf16, #tpu.memory_space<vmem>>, vector<1x8x32xbf16>
    %103 = vector.shape_cast %102 : vector<1x8x32xbf16> to vector<8x32xbf16>
    %104 = vector.shape_cast %100 : vector<8x32xbf16> to vector<1x8x32xbf16>
    tpu.vector_store %arg12[%101, %c0_51, %c0_52], %104 {strides = array<i32>} : memref<8x8x32xbf16, #tpu.memory_space<vmem>>, vector<1x8x32xbf16>,
    %c2_i32 = arith.constant 2 : i32
    %105 = arith.index_cast %c2_i32 : i32 to index
    %c0_53 = arith.constant 0 : index
    %c0_54 = arith.constant 0 : index
    %106 = vector.load %arg11[%105, %c0_53, %c0_54] : memref<8x8x128xf32, #tpu.memory_space<vmem>>, vector<1x8x128xf32>
    %107 = vector.shape_cast %106 : vector<1x8x128xf32> to vector<8x128xf32>
    %c0_55 = arith.constant 0 : index
    %c0_56 = arith.constant 0 : index
    %c0_57 = arith.constant 0 : index
    %108 = vector.load %arg13[%c0_55, %c0_56, %c0_57] : memref<2x8x32xf32, #tpu.memory_space<vmem>>, vector<1x8x32xf32>
    %109 = vector.shape_cast %108 : vector<1x8x32xf32> to vector<8x32xf32>
    %110 = arith.truncf %109 : vector<8x32xf32> to vector<8x32xbf16>
    %cst_58 = arith.constant dense<0.000000e+00> : vector<8x128xf32>
    %111 = tpu.matmul %110, %12, %cst_58 {dimension_numbers = #tpu.dot_dimension_numbers<[1], [0], [0], [1], [0, 0, 1, 1], [], []>} : vector<8x32xbf16>, vector<32x128xbf16>, vector<8x128xf32> -> vector<8x128xf32>
    %112 = arith.addf %107, %111 : vector<8x128xf32>
    %113 = vector.extract_strided_slice %112 {offsets = [0, 0], sizes = [8, 32], strides = [1, 1]} : vector<8x128xf32> to vector<8x32xf32>
    %114 = arith.negf %113 : vector<8x32xf32>
    %115 = math.exp %114 : vector<8x32xf32>
    %cst_59 = arith.constant 1.000000e+00 : f32
    %116 = vector.broadcast %cst_59 : f32 to vector<8x32xf32>
    %117 = arith.addf %116, %115 : vector<8x32xf32>
    %118 = arith.divf %116, %117 : vector<8x32xf32>
    %119 = vector.extract_strided_slice %112 {offsets = [0, 32], sizes = [8, 32], strides = [1, 1]} : vector<8x128xf32> to vector<8x32xf32>
    %120 = arith.negf %119 : vector<8x32xf32>
    %121 = math.exp %120 : vector<8x32xf32>
    %cst_60 = arith.constant 1.000000e+00 : f32
    %122 = vector.broadcast %cst_60 : f32 to vector<8x32xf32>
    %123 = arith.addf %122, %121 : vector<8x32xf32>
    %124 = arith.divf %122, %123 : vector<8x32xf32>
    %125 = vector.extract_strided_slice %112 {offsets = [0, 64], sizes = [8, 32], strides = [1, 1]} : vector<8x128xf32> to vector<8x32xf32>
    %126 = math.tanh %125 : vector<8x32xf32>
    %127 = vector.extract_strided_slice %112 {offsets = [0, 96], sizes = [8, 32], strides = [1, 1]} : vector<8x128xf32> to vector<8x32xf32>
    %128 = arith.negf %127 : vector<8x32xf32>
    %129 = math.exp %128 : vector<8x32xf32>
    %cst_61 = arith.constant 1.000000e+00 : f32
    %130 = vector.broadcast %cst_61 : f32 to vector<8x32xf32>
    %131 = arith.addf %130, %129 : vector<8x32xf32>
    %132 = arith.divf %130, %131 : vector<8x32xf32>
    %c0_62 = arith.constant 0 : index
    %c0_63 = arith.constant 0 : index
    %c0_64 = arith.constant 0 : index
    %133 = vector.load %arg14[%c0_62, %c0_63, %c0_64] : memref<2x8x32xf32, #tpu.memory_space<vmem>>, vector<1x8x32xf32>
    %134 = vector.shape_cast %133 : vector<1x8x32xf32> to vector<8x32xf32>
    %135 = arith.mulf %124, %134 : vector<8x32xf32>
    %136 = arith.mulf %118, %126 : vector<8x32xf32>
    %137 = arith.addf %135, %136 : vector<8x32xf32>
    %138 = math.tanh %137 : vector<8x32xf32>
    %139 = arith.mulf %132, %138 : vector<8x32xf32>
    %c0_65 = arith.constant 0 : index
    %c0_66 = arith.constant 0 : index
    %c0_67 = arith.constant 0 : index
    %140 = vector.load %arg14[%c0_65, %c0_66, %c0_67] : memref<2x8x32xf32, #tpu.memory_space<vmem>>, vector<1x8x32xf32>
    %141 = vector.shape_cast %140 : vector<1x8x32xf32> to vector<8x32xf32>
    %142 = vector.shape_cast %137 : vector<8x32xf32> to vector<1x8x32xf32>
    tpu.vector_store %arg14[%c0_65, %c0_66, %c0_67], %142 {strides = array<i32>} : memref<2x8x32xf32, #tpu.memory_space<vmem>>, vector<1x8x32xf32>,
    %c0_68 = arith.constant 0 : index
    %c0_69 = arith.constant 0 : index
    %c0_70 = arith.constant 0 : index
    %143 = vector.load %arg13[%c0_68, %c0_69, %c0_70] : memref<2x8x32xf32, #tpu.memory_space<vmem>>, vector<1x8x32xf32>
    %144 = vector.shape_cast %143 : vector<1x8x32xf32> to vector<8x32xf32>
    %145 = vector.shape_cast %139 : vector<8x32xf32> to vector<1x8x32xf32>
    tpu.vector_store %arg13[%c0_68, %c0_69, %c0_70], %145 {strides = array<i32>} : memref<2x8x32xf32, #tpu.memory_space<vmem>>, vector<1x8x32xf32>,
    %146 = arith.truncf %139 : vector<8x32xf32> to vector<8x32xbf16>
    %147 = arith.index_cast %c2_i32 : i32 to index
    %c0_71 = arith.constant 0 : index
    %c0_72 = arith.constant 0 : index
    %148 = vector.load %arg12[%147, %c0_71, %c0_72] : memref<8x8x32xbf16, #tpu.memory_space<vmem>>, vector<1x8x32xbf16>
    %149 = vector.shape_cast %148 : vector<1x8x32xbf16> to vector<8x32xbf16>
    %150 = vector.shape_cast %146 : vector<8x32xbf16> to vector<1x8x32xbf16>
    tpu.vector_store %arg12[%147, %c0_71, %c0_72], %150 {strides = array<i32>} : memref<8x8x32xbf16, #tpu.memory_space<vmem>>, vector<1x8x32xbf16>,
    %c3_i32 = arith.constant 3 : i32
    %151 = arith.index_cast %c3_i32 : i32 to index
    %c0_73 = arith.constant 0 : index
    %c0_74 = arith.constant 0 : index
    %152 = vector.load %arg11[%151, %c0_73, %c0_74] : memref<8x8x128xf32, #tpu.memory_space<vmem>>, vector<1x8x128xf32>
    %153 = vector.shape_cast %152 : vector<1x8x128xf32> to vector<8x128xf32>
    %c0_75 = arith.constant 0 : index
    %c0_76 = arith.constant 0 : index
    %c0_77 = arith.constant 0 : index
    %154 = vector.load %arg13[%c0_75, %c0_76, %c0_77] : memref<2x8x32xf32, #tpu.memory_space<vmem>>, vector<1x8x32xf32>
    %155 = vector.shape_cast %154 : vector<1x8x32xf32> to vector<8x32xf32>
    %156 = arith.truncf %155 : vector<8x32xf32> to vector<8x32xbf16>
    %cst_78 = arith.constant dense<0.000000e+00> : vector<8x128xf32>
    %157 = tpu.matmul %156, %12, %cst_78 {dimension_numbers = #tpu.dot_dimension_numbers<[1], [0], [0], [1], [0, 0, 1, 1], [], []>} : vector<8x32xbf16>, vector<32x128xbf16>, vector<8x128xf32> -> vector<8x128xf32>
    %158 = arith.addf %153, %157 : vector<8x128xf32>
    %159 = vector.extract_strided_slice %158 {offsets = [0, 0], sizes = [8, 32], strides = [1, 1]} : vector<8x128xf32> to vector<8x32xf32>
    %160 = arith.negf %159 : vector<8x32xf32>
    %161 = math.exp %160 : vector<8x32xf32>
    %cst_79 = arith.constant 1.000000e+00 : f32
    %162 = vector.broadcast %cst_79 : f32 to vector<8x32xf32>
    %163 = arith.addf %162, %161 : vector<8x32xf32>
    %164 = arith.divf %162, %163 : vector<8x32xf32>
    %165 = vector.extract_strided_slice %158 {offsets = [0, 32], sizes = [8, 32], strides = [1, 1]} : vector<8x128xf32> to vector<8x32xf32>
    %166 = arith.negf %165 : vector<8x32xf32>
    %167 = math.exp %166 : vector<8x32xf32>
    %cst_80 = arith.constant 1.000000e+00 : f32
    %168 = vector.broadcast %cst_80 : f32 to vector<8x32xf32>
    %169 = arith.addf %168, %167 : vector<8x32xf32>
    %170 = arith.divf %168, %169 : vector<8x32xf32>
    %171 = vector.extract_strided_slice %158 {offsets = [0, 64], sizes = [8, 32], strides = [1, 1]} : vector<8x128xf32> to vector<8x32xf32>
    %172 = math.tanh %171 : vector<8x32xf32>
    %173 = vector.extract_strided_slice %158 {offsets = [0, 96], sizes = [8, 32], strides = [1, 1]} : vector<8x128xf32> to vector<8x32xf32>
    %174 = arith.negf %173 : vector<8x32xf32>
    %175 = math.exp %174 : vector<8x32xf32>
    %cst_81 = arith.constant 1.000000e+00 : f32
    %176 = vector.broadcast %cst_81 : f32 to vector<8x32xf32>
    %177 = arith.addf %176, %175 : vector<8x32xf32>
    %178 = arith.divf %176, %177 : vector<8x32xf32>
    %c0_82 = arith.constant 0 : index
    %c0_83 = arith.constant 0 : index
    %c0_84 = arith.constant 0 : index
    %179 = vector.load %arg14[%c0_82, %c0_83, %c0_84] : memref<2x8x32xf32, #tpu.memory_space<vmem>>, vector<1x8x32xf32>
    %180 = vector.shape_cast %179 : vector<1x8x32xf32> to vector<8x32xf32>
    %181 = arith.mulf %170, %180 : vector<8x32xf32>
    %182 = arith.mulf %164, %172 : vector<8x32xf32>
    %183 = arith.addf %181, %182 : vector<8x32xf32>
    %184 = math.tanh %183 : vector<8x32xf32>
    %185 = arith.mulf %178, %184 : vector<8x32xf32>
    %c0_85 = arith.constant 0 : index
    %c0_86 = arith.constant 0 : index
    %c0_87 = arith.constant 0 : index
    %186 = vector.load %arg14[%c0_85, %c0_86, %c0_87] : memref<2x8x32xf32, #tpu.memory_space<vmem>>, vector<1x8x32xf32>
    %187 = vector.shape_cast %186 : vector<1x8x32xf32> to vector<8x32xf32>
    %188 = vector.shape_cast %183 : vector<8x32xf32> to vector<1x8x32xf32>
    tpu.vector_store %arg14[%c0_85, %c0_86, %c0_87], %188 {strides = array<i32>} : memref<2x8x32xf32, #tpu.memory_space<vmem>>, vector<1x8x32xf32>,
    %c0_88 = arith.constant 0 : index
    %c0_89 = arith.constant 0 : index
    %c0_90 = arith.constant 0 : index
    %189 = vector.load %arg13[%c0_88, %c0_89, %c0_90] : memref<2x8x32xf32, #tpu.memory_space<vmem>>, vector<1x8x32xf32>
    %190 = vector.shape_cast %189 : vector<1x8x32xf32> to vector<8x32xf32>
    %191 = vector.shape_cast %185 : vector<8x32xf32> to vector<1x8x32xf32>
    tpu.vector_store %arg13[%c0_88, %c0_89, %c0_90], %191 {strides = array<i32>} : memref<2x8x32xf32, #tpu.memory_space<vmem>>, vector<1x8x32xf32>,
    %192 = arith.truncf %185 : vector<8x32xf32> to vector<8x32xbf16>
    %193 = arith.index_cast %c3_i32 : i32 to index
    %c0_91 = arith.constant 0 : index
    %c0_92 = arith.constant 0 : index
    %194 = vector.load %arg12[%193, %c0_91, %c0_92] : memref<8x8x32xbf16, #tpu.memory_space<vmem>>, vector<1x8x32xbf16>
    %195 = vector.shape_cast %194 : vector<1x8x32xbf16> to vector<8x32xbf16>
    %196 = vector.shape_cast %192 : vector<8x32xbf16> to vector<1x8x32xbf16>
    tpu.vector_store %arg12[%193, %c0_91, %c0_92], %196 {strides = array<i32>} : memref<8x8x32xbf16, #tpu.memory_space<vmem>>, vector<1x8x32xbf16>,
    %c4_i32 = arith.constant 4 : i32
    %197 = arith.index_cast %c4_i32 : i32 to index
    %c0_93 = arith.constant 0 : index
    %c0_94 = arith.constant 0 : index
    %198 = vector.load %arg11[%197, %c0_93, %c0_94] : memref<8x8x128xf32, #tpu.memory_space<vmem>>, vector<1x8x128xf32>
    %199 = vector.shape_cast %198 : vector<1x8x128xf32> to vector<8x128xf32>
    %c0_95 = arith.constant 0 : index
    %c0_96 = arith.constant 0 : index
    %c0_97 = arith.constant 0 : index
    %200 = vector.load %arg13[%c0_95, %c0_96, %c0_97] : memref<2x8x32xf32, #tpu.memory_space<vmem>>, vector<1x8x32xf32>
    %201 = vector.shape_cast %200 : vector<1x8x32xf32> to vector<8x32xf32>
    %202 = arith.truncf %201 : vector<8x32xf32> to vector<8x32xbf16>
    %cst_98 = arith.constant dense<0.000000e+00> : vector<8x128xf32>
    %203 = tpu.matmul %202, %12, %cst_98 {dimension_numbers = #tpu.dot_dimension_numbers<[1], [0], [0], [1], [0, 0, 1, 1], [], []>} : vector<8x32xbf16>, vector<32x128xbf16>, vector<8x128xf32> -> vector<8x128xf32>
    %204 = arith.addf %199, %203 : vector<8x128xf32>
    %205 = vector.extract_strided_slice %204 {offsets = [0, 0], sizes = [8, 32], strides = [1, 1]} : vector<8x128xf32> to vector<8x32xf32>
    %206 = arith.negf %205 : vector<8x32xf32>
    %207 = math.exp %206 : vector<8x32xf32>
    %cst_99 = arith.constant 1.000000e+00 : f32
    %208 = vector.broadcast %cst_99 : f32 to vector<8x32xf32>
    %209 = arith.addf %208, %207 : vector<8x32xf32>
    %210 = arith.divf %208, %209 : vector<8x32xf32>
    %211 = vector.extract_strided_slice %204 {offsets = [0, 32], sizes = [8, 32], strides = [1, 1]} : vector<8x128xf32> to vector<8x32xf32>
    %212 = arith.negf %211 : vector<8x32xf32>
    %213 = math.exp %212 : vector<8x32xf32>
    %cst_100 = arith.constant 1.000000e+00 : f32
    %214 = vector.broadcast %cst_100 : f32 to vector<8x32xf32>
    %215 = arith.addf %214, %213 : vector<8x32xf32>
    %216 = arith.divf %214, %215 : vector<8x32xf32>
    %217 = vector.extract_strided_slice %204 {offsets = [0, 64], sizes = [8, 32], strides = [1, 1]} : vector<8x128xf32> to vector<8x32xf32>
    %218 = math.tanh %217 : vector<8x32xf32>
    %219 = vector.extract_strided_slice %204 {offsets = [0, 96], sizes = [8, 32], strides = [1, 1]} : vector<8x128xf32> to vector<8x32xf32>
    %220 = arith.negf %219 : vector<8x32xf32>
    %221 = math.exp %220 : vector<8x32xf32>
    %cst_101 = arith.constant 1.000000e+00 : f32
    %222 = vector.broadcast %cst_101 : f32 to vector<8x32xf32>
    %223 = arith.addf %222, %221 : vector<8x32xf32>
    %224 = arith.divf %222, %223 : vector<8x32xf32>
    %c0_102 = arith.constant 0 : index
    %c0_103 = arith.constant 0 : index
    %c0_104 = arith.constant 0 : index
    %225 = vector.load %arg14[%c0_102, %c0_103, %c0_104] : memref<2x8x32xf32, #tpu.memory_space<vmem>>, vector<1x8x32xf32>
    %226 = vector.shape_cast %225 : vector<1x8x32xf32> to vector<8x32xf32>
    %227 = arith.mulf %216, %226 : vector<8x32xf32>
    %228 = arith.mulf %210, %218 : vector<8x32xf32>
    %229 = arith.addf %227, %228 : vector<8x32xf32>
    %230 = math.tanh %229 : vector<8x32xf32>
    %231 = arith.mulf %224, %230 : vector<8x32xf32>
    %c0_105 = arith.constant 0 : index
    %c0_106 = arith.constant 0 : index
    %c0_107 = arith.constant 0 : index
    %232 = vector.load %arg14[%c0_105, %c0_106, %c0_107] : memref<2x8x32xf32, #tpu.memory_space<vmem>>, vector<1x8x32xf32>
    %233 = vector.shape_cast %232 : vector<1x8x32xf32> to vector<8x32xf32>
    %234 = vector.shape_cast %229 : vector<8x32xf32> to vector<1x8x32xf32>
    tpu.vector_store %arg14[%c0_105, %c0_106, %c0_107], %234 {strides = array<i32>} : memref<2x8x32xf32, #tpu.memory_space<vmem>>, vector<1x8x32xf32>,
    %c0_108 = arith.constant 0 : index
    %c0_109 = arith.constant 0 : index
    %c0_110 = arith.constant 0 : index
    %235 = vector.load %arg13[%c0_108, %c0_109, %c0_110] : memref<2x8x32xf32, #tpu.memory_space<vmem>>, vector<1x8x32xf32>
    %236 = vector.shape_cast %235 : vector<1x8x32xf32> to vector<8x32xf32>
    %237 = vector.shape_cast %231 : vector<8x32xf32> to vector<1x8x32xf32>
    tpu.vector_store %arg13[%c0_108, %c0_109, %c0_110], %237 {strides = array<i32>} : memref<2x8x32xf32, #tpu.memory_space<vmem>>, vector<1x8x32xf32>,
    %238 = arith.truncf %231 : vector<8x32xf32> to vector<8x32xbf16>
    %239 = arith.index_cast %c4_i32 : i32 to index
    %c0_111 = arith.constant 0 : index
    %c0_112 = arith.constant 0 : index
    %240 = vector.load %arg12[%239, %c0_111, %c0_112] : memref<8x8x32xbf16, #tpu.memory_space<vmem>>, vector<1x8x32xbf16>
    %241 = vector.shape_cast %240 : vector<1x8x32xbf16> to vector<8x32xbf16>
    %242 = vector.shape_cast %238 : vector<8x32xbf16> to vector<1x8x32xbf16>
    tpu.vector_store %arg12[%239, %c0_111, %c0_112], %242 {strides = array<i32>} : memref<8x8x32xbf16, #tpu.memory_space<vmem>>, vector<1x8x32xbf16>,
    %c5_i32 = arith.constant 5 : i32
    %243 = arith.index_cast %c5_i32 : i32 to index
    %c0_113 = arith.constant 0 : index
    %c0_114 = arith.constant 0 : index
    %244 = vector.load %arg11[%243, %c0_113, %c0_114] : memref<8x8x128xf32, #tpu.memory_space<vmem>>, vector<1x8x128xf32>
    %245 = vector.shape_cast %244 : vector<1x8x128xf32> to vector<8x128xf32>
    %c0_115 = arith.constant 0 : index
    %c0_116 = arith.constant 0 : index
    %c0_117 = arith.constant 0 : index
    %246 = vector.load %arg13[%c0_115, %c0_116, %c0_117] : memref<2x8x32xf32, #tpu.memory_space<vmem>>, vector<1x8x32xf32>
    %247 = vector.shape_cast %246 : vector<1x8x32xf32> to vector<8x32xf32>
    %248 = arith.truncf %247 : vector<8x32xf32> to vector<8x32xbf16>
    %cst_118 = arith.constant dense<0.000000e+00> : vector<8x128xf32>
    %249 = tpu.matmul %248, %12, %cst_118 {dimension_numbers = #tpu.dot_dimension_numbers<[1], [0], [0], [1], [0, 0, 1, 1], [], []>} : vector<8x32xbf16>, vector<32x128xbf16>, vector<8x128xf32> -> vector<8x128xf32>
    %250 = arith.addf %245, %249 : vector<8x128xf32>
    %251 = vector.extract_strided_slice %250 {offsets = [0, 0], sizes = [8, 32], strides = [1, 1]} : vector<8x128xf32> to vector<8x32xf32>
    %252 = arith.negf %251 : vector<8x32xf32>
    %253 = math.exp %252 : vector<8x32xf32>
    %cst_119 = arith.constant 1.000000e+00 : f32
    %254 = vector.broadcast %cst_119 : f32 to vector<8x32xf32>
    %255 = arith.addf %254, %253 : vector<8x32xf32>
    %256 = arith.divf %254, %255 : vector<8x32xf32>
    %257 = vector.extract_strided_slice %250 {offsets = [0, 32], sizes = [8, 32], strides = [1, 1]} : vector<8x128xf32> to vector<8x32xf32>
    %258 = arith.negf %257 : vector<8x32xf32>
    %259 = math.exp %258 : vector<8x32xf32>
    %cst_120 = arith.constant 1.000000e+00 : f32
    %260 = vector.broadcast %cst_120 : f32 to vector<8x32xf32>
    %261 = arith.addf %260, %259 : vector<8x32xf32>
    %262 = arith.divf %260, %261 : vector<8x32xf32>
    %263 = vector.extract_strided_slice %250 {offsets = [0, 64], sizes = [8, 32], strides = [1, 1]} : vector<8x128xf32> to vector<8x32xf32>
    %264 = math.tanh %263 : vector<8x32xf32>
    %265 = vector.extract_strided_slice %250 {offsets = [0, 96], sizes = [8, 32], strides = [1, 1]} : vector<8x128xf32> to vector<8x32xf32>
    %266 = arith.negf %265 : vector<8x32xf32>
    %267 = math.exp %266 : vector<8x32xf32>
    %cst_121 = arith.constant 1.000000e+00 : f32
    %268 = vector.broadcast %cst_121 : f32 to vector<8x32xf32>
    %269 = arith.addf %268, %267 : vector<8x32xf32>
    %270 = arith.divf %268, %269 : vector<8x32xf32>
    %c0_122 = arith.constant 0 : index
    %c0_123 = arith.constant 0 : index
    %c0_124 = arith.constant 0 : index
    %271 = vector.load %arg14[%c0_122, %c0_123, %c0_124] : memref<2x8x32xf32, #tpu.memory_space<vmem>>, vector<1x8x32xf32>
    %272 = vector.shape_cast %271 : vector<1x8x32xf32> to vector<8x32xf32>
    %273 = arith.mulf %262, %272 : vector<8x32xf32>
    %274 = arith.mulf %256, %264 : vector<8x32xf32>
    %275 = arith.addf %273, %274 : vector<8x32xf32>
    %276 = math.tanh %275 : vector<8x32xf32>
    %277 = arith.mulf %270, %276 : vector<8x32xf32>
    %c0_125 = arith.constant 0 : index
    %c0_126 = arith.constant 0 : index
    %c0_127 = arith.constant 0 : index
    %278 = vector.load %arg14[%c0_125, %c0_126, %c0_127] : memref<2x8x32xf32, #tpu.memory_space<vmem>>, vector<1x8x32xf32>
    %279 = vector.shape_cast %278 : vector<1x8x32xf32> to vector<8x32xf32>
    %280 = vector.shape_cast %275 : vector<8x32xf32> to vector<1x8x32xf32>
    tpu.vector_store %arg14[%c0_125, %c0_126, %c0_127], %280 {strides = array<i32>} : memref<2x8x32xf32, #tpu.memory_space<vmem>>, vector<1x8x32xf32>,
    %c0_128 = arith.constant 0 : index
    %c0_129 = arith.constant 0 : index
    %c0_130 = arith.constant 0 : index
    %281 = vector.load %arg13[%c0_128, %c0_129, %c0_130] : memref<2x8x32xf32, #tpu.memory_space<vmem>>, vector<1x8x32xf32>
    %282 = vector.shape_cast %281 : vector<1x8x32xf32> to vector<8x32xf32>
    %283 = vector.shape_cast %277 : vector<8x32xf32> to vector<1x8x32xf32>
    tpu.vector_store %arg13[%c0_128, %c0_129, %c0_130], %283 {strides = array<i32>} : memref<2x8x32xf32, #tpu.memory_space<vmem>>, vector<1x8x32xf32>,
    %284 = arith.truncf %277 : vector<8x32xf32> to vector<8x32xbf16>
    %285 = arith.index_cast %c5_i32 : i32 to index
    %c0_131 = arith.constant 0 : index
    %c0_132 = arith.constant 0 : index
    %286 = vector.load %arg12[%285, %c0_131, %c0_132] : memref<8x8x32xbf16, #tpu.memory_space<vmem>>, vector<1x8x32xbf16>
    %287 = vector.shape_cast %286 : vector<1x8x32xbf16> to vector<8x32xbf16>
    %288 = vector.shape_cast %284 : vector<8x32xbf16> to vector<1x8x32xbf16>
    tpu.vector_store %arg12[%285, %c0_131, %c0_132], %288 {strides = array<i32>} : memref<8x8x32xbf16, #tpu.memory_space<vmem>>, vector<1x8x32xbf16>,
    %c6_i32 = arith.constant 6 : i32
    %289 = arith.index_cast %c6_i32 : i32 to index
    %c0_133 = arith.constant 0 : index
    %c0_134 = arith.constant 0 : index
    %290 = vector.load %arg11[%289, %c0_133, %c0_134] : memref<8x8x128xf32, #tpu.memory_space<vmem>>, vector<1x8x128xf32>
    %291 = vector.shape_cast %290 : vector<1x8x128xf32> to vector<8x128xf32>
    %c0_135 = arith.constant 0 : index
    %c0_136 = arith.constant 0 : index
    %c0_137 = arith.constant 0 : index
    %292 = vector.load %arg13[%c0_135, %c0_136, %c0_137] : memref<2x8x32xf32, #tpu.memory_space<vmem>>, vector<1x8x32xf32>
    %293 = vector.shape_cast %292 : vector<1x8x32xf32> to vector<8x32xf32>
    %294 = arith.truncf %293 : vector<8x32xf32> to vector<8x32xbf16>
    %cst_138 = arith.constant dense<0.000000e+00> : vector<8x128xf32>
    %295 = tpu.matmul %294, %12, %cst_138 {dimension_numbers = #tpu.dot_dimension_numbers<[1], [0], [0], [1], [0, 0, 1, 1], [], []>} : vector<8x32xbf16>, vector<32x128xbf16>, vector<8x128xf32> -> vector<8x128xf32>
    %296 = arith.addf %291, %295 : vector<8x128xf32>
    %297 = vector.extract_strided_slice %296 {offsets = [0, 0], sizes = [8, 32], strides = [1, 1]} : vector<8x128xf32> to vector<8x32xf32>
    %298 = arith.negf %297 : vector<8x32xf32>
    %299 = math.exp %298 : vector<8x32xf32>
    %cst_139 = arith.constant 1.000000e+00 : f32
    %300 = vector.broadcast %cst_139 : f32 to vector<8x32xf32>
    %301 = arith.addf %300, %299 : vector<8x32xf32>
    %302 = arith.divf %300, %301 : vector<8x32xf32>
    %303 = vector.extract_strided_slice %296 {offsets = [0, 32], sizes = [8, 32], strides = [1, 1]} : vector<8x128xf32> to vector<8x32xf32>
    %304 = arith.negf %303 : vector<8x32xf32>
    %305 = math.exp %304 : vector<8x32xf32>
    %cst_140 = arith.constant 1.000000e+00 : f32
    %306 = vector.broadcast %cst_140 : f32 to vector<8x32xf32>
    %307 = arith.addf %306, %305 : vector<8x32xf32>
    %308 = arith.divf %306, %307 : vector<8x32xf32>
    %309 = vector.extract_strided_slice %296 {offsets = [0, 64], sizes = [8, 32], strides = [1, 1]} : vector<8x128xf32> to vector<8x32xf32>
    %310 = math.tanh %309 : vector<8x32xf32>
    %311 = vector.extract_strided_slice %296 {offsets = [0, 96], sizes = [8, 32], strides = [1, 1]} : vector<8x128xf32> to vector<8x32xf32>
    %312 = arith.negf %311 : vector<8x32xf32>
    %313 = math.exp %312 : vector<8x32xf32>
    %cst_141 = arith.constant 1.000000e+00 : f32
    %314 = vector.broadcast %cst_141 : f32 to vector<8x32xf32>
    %315 = arith.addf %314, %313 : vector<8x32xf32>
    %316 = arith.divf %314, %315 : vector<8x32xf32>
    %c0_142 = arith.constant 0 : index
    %c0_143 = arith.constant 0 : index
    %c0_144 = arith.constant 0 : index
    %317 = vector.load %arg14[%c0_142, %c0_143, %c0_144] : memref<2x8x32xf32, #tpu.memory_space<vmem>>, vector<1x8x32xf32>
    %318 = vector.shape_cast %317 : vector<1x8x32xf32> to vector<8x32xf32>
    %319 = arith.mulf %308, %318 : vector<8x32xf32>
    %320 = arith.mulf %302, %310 : vector<8x32xf32>
    %321 = arith.addf %319, %320 : vector<8x32xf32>
    %322 = math.tanh %321 : vector<8x32xf32>
    %323 = arith.mulf %316, %322 : vector<8x32xf32>
    %c0_145 = arith.constant 0 : index
    %c0_146 = arith.constant 0 : index
    %c0_147 = arith.constant 0 : index
    %324 = vector.load %arg14[%c0_145, %c0_146, %c0_147] : memref<2x8x32xf32, #tpu.memory_space<vmem>>, vector<1x8x32xf32>
    %325 = vector.shape_cast %324 : vector<1x8x32xf32> to vector<8x32xf32>
    %326 = vector.shape_cast %321 : vector<8x32xf32> to vector<1x8x32xf32>
    tpu.vector_store %arg14[%c0_145, %c0_146, %c0_147], %326 {strides = array<i32>} : memref<2x8x32xf32, #tpu.memory_space<vmem>>, vector<1x8x32xf32>,
    %c0_148 = arith.constant 0 : index
    %c0_149 = arith.constant 0 : index
    %c0_150 = arith.constant 0 : index
    %327 = vector.load %arg13[%c0_148, %c0_149, %c0_150] : memref<2x8x32xf32, #tpu.memory_space<vmem>>, vector<1x8x32xf32>
    %328 = vector.shape_cast %327 : vector<1x8x32xf32> to vector<8x32xf32>
    %329 = vector.shape_cast %323 : vector<8x32xf32> to vector<1x8x32xf32>
    tpu.vector_store %arg13[%c0_148, %c0_149, %c0_150], %329 {strides = array<i32>} : memref<2x8x32xf32, #tpu.memory_space<vmem>>, vector<1x8x32xf32>,
    %330 = arith.truncf %323 : vector<8x32xf32> to vector<8x32xbf16>
    %331 = arith.index_cast %c6_i32 : i32 to index
    %c0_151 = arith.constant 0 : index
    %c0_152 = arith.constant 0 : index
    %332 = vector.load %arg12[%331, %c0_151, %c0_152] : memref<8x8x32xbf16, #tpu.memory_space<vmem>>, vector<1x8x32xbf16>
    %333 = vector.shape_cast %332 : vector<1x8x32xbf16> to vector<8x32xbf16>
    %334 = vector.shape_cast %330 : vector<8x32xbf16> to vector<1x8x32xbf16>
    tpu.vector_store %arg12[%331, %c0_151, %c0_152], %334 {strides = array<i32>} : memref<8x8x32xbf16, #tpu.memory_space<vmem>>, vector<1x8x32xbf16>,
    %c7_i32 = arith.constant 7 : i32
    %335 = arith.index_cast %c7_i32 : i32 to index
    %c0_153 = arith.constant 0 : index
    %c0_154 = arith.constant 0 : index
    %336 = vector.load %arg11[%335, %c0_153, %c0_154] : memref<8x8x128xf32, #tpu.memory_space<vmem>>, vector<1x8x128xf32>
    %337 = vector.shape_cast %336 : vector<1x8x128xf32> to vector<8x128xf32>
    %c0_155 = arith.constant 0 : index
    %c0_156 = arith.constant 0 : index
    %c0_157 = arith.constant 0 : index
    %338 = vector.load %arg13[%c0_155, %c0_156, %c0_157] : memref<2x8x32xf32, #tpu.memory_space<vmem>>, vector<1x8x32xf32>
    %339 = vector.shape_cast %338 : vector<1x8x32xf32> to vector<8x32xf32>
    %340 = arith.truncf %339 : vector<8x32xf32> to vector<8x32xbf16>
    %cst_158 = arith.constant dense<0.000000e+00> : vector<8x128xf32>
    %341 = tpu.matmul %340, %12, %cst_158 {dimension_numbers = #tpu.dot_dimension_numbers<[1], [0], [0], [1], [0, 0, 1, 1], [], []>} : vector<8x32xbf16>, vector<32x128xbf16>, vector<8x128xf32> -> vector<8x128xf32>
    %342 = arith.addf %337, %341 : vector<8x128xf32>
    %343 = vector.extract_strided_slice %342 {offsets = [0, 0], sizes = [8, 32], strides = [1, 1]} : vector<8x128xf32> to vector<8x32xf32>
    %344 = arith.negf %343 : vector<8x32xf32>
    %345 = math.exp %344 : vector<8x32xf32>
    %cst_159 = arith.constant 1.000000e+00 : f32
    %346 = vector.broadcast %cst_159 : f32 to vector<8x32xf32>
    %347 = arith.addf %346, %345 : vector<8x32xf32>
    %348 = arith.divf %346, %347 : vector<8x32xf32>
    %349 = vector.extract_strided_slice %342 {offsets = [0, 32], sizes = [8, 32], strides = [1, 1]} : vector<8x128xf32> to vector<8x32xf32>
    %350 = arith.negf %349 : vector<8x32xf32>
    %351 = math.exp %350 : vector<8x32xf32>
    %cst_160 = arith.constant 1.000000e+00 : f32
    %352 = vector.broadcast %cst_160 : f32 to vector<8x32xf32>
    %353 = arith.addf %352, %351 : vector<8x32xf32>
    %354 = arith.divf %352, %353 : vector<8x32xf32>
    %355 = vector.extract_strided_slice %342 {offsets = [0, 64], sizes = [8, 32], strides = [1, 1]} : vector<8x128xf32> to vector<8x32xf32>
    %356 = math.tanh %355 : vector<8x32xf32>
    %357 = vector.extract_strided_slice %342 {offsets = [0, 96], sizes = [8, 32], strides = [1, 1]} : vector<8x128xf32> to vector<8x32xf32>
    %358 = arith.negf %357 : vector<8x32xf32>
    %359 = math.exp %358 : vector<8x32xf32>
    %cst_161 = arith.constant 1.000000e+00 : f32
    %360 = vector.broadcast %cst_161 : f32 to vector<8x32xf32>
    %361 = arith.addf %360, %359 : vector<8x32xf32>
    %362 = arith.divf %360, %361 : vector<8x32xf32>
    %c0_162 = arith.constant 0 : index
    %c0_163 = arith.constant 0 : index
    %c0_164 = arith.constant 0 : index
    %363 = vector.load %arg14[%c0_162, %c0_163, %c0_164] : memref<2x8x32xf32, #tpu.memory_space<vmem>>, vector<1x8x32xf32>
    %364 = vector.shape_cast %363 : vector<1x8x32xf32> to vector<8x32xf32>
    %365 = arith.mulf %354, %364 : vector<8x32xf32>
    %366 = arith.mulf %348, %356 : vector<8x32xf32>
    %367 = arith.addf %365, %366 : vector<8x32xf32>
    %368 = math.tanh %367 : vector<8x32xf32>
    %369 = arith.mulf %362, %368 : vector<8x32xf32>
    %c0_165 = arith.constant 0 : index
    %c0_166 = arith.constant 0 : index
    %c0_167 = arith.constant 0 : index
    %370 = vector.load %arg14[%c0_165, %c0_166, %c0_167] : memref<2x8x32xf32, #tpu.memory_space<vmem>>, vector<1x8x32xf32>
    %371 = vector.shape_cast %370 : vector<1x8x32xf32> to vector<8x32xf32>
    %372 = vector.shape_cast %367 : vector<8x32xf32> to vector<1x8x32xf32>
    tpu.vector_store %arg14[%c0_165, %c0_166, %c0_167], %372 {strides = array<i32>} : memref<2x8x32xf32, #tpu.memory_space<vmem>>, vector<1x8x32xf32>,
    %c0_168 = arith.constant 0 : index
    %c0_169 = arith.constant 0 : index
    %c0_170 = arith.constant 0 : index
    %373 = vector.load %arg13[%c0_168, %c0_169, %c0_170] : memref<2x8x32xf32, #tpu.memory_space<vmem>>, vector<1x8x32xf32>
    %374 = vector.shape_cast %373 : vector<1x8x32xf32> to vector<8x32xf32>
    %375 = vector.shape_cast %369 : vector<8x32xf32> to vector<1x8x32xf32>
    tpu.vector_store %arg13[%c0_168, %c0_169, %c0_170], %375 {strides = array<i32>} : memref<2x8x32xf32, #tpu.memory_space<vmem>>, vector<1x8x32xf32>,
    %376 = arith.truncf %369 : vector<8x32xf32> to vector<8x32xbf16>
    %377 = arith.index_cast %c7_i32 : i32 to index
    %c0_171 = arith.constant 0 : index
    %c0_172 = arith.constant 0 : index
    %378 = vector.load %arg12[%377, %c0_171, %c0_172] : memref<8x8x32xbf16, #tpu.memory_space<vmem>>, vector<1x8x32xbf16>
    %379 = vector.shape_cast %378 : vector<1x8x32xbf16> to vector<8x32xbf16>
    %380 = vector.shape_cast %376 : vector<8x32xbf16> to vector<1x8x32xbf16>
    tpu.vector_store %arg12[%377, %c0_171, %c0_172], %380 {strides = array<i32>} : memref<8x8x32xbf16, #tpu.memory_space<vmem>>, vector<1x8x32xbf16>,
    %c8_i32 = arith.constant 8 : i32
    %c0_173 = arith.constant 0 : index
    %c0_174 = arith.constant 0 : index
    %c0_175 = arith.constant 0 : index
    %381 = vector.load %arg12[%c0_173, %c0_174, %c0_175] : memref<8x8x32xbf16, #tpu.memory_space<vmem>>, vector<8x8x32xbf16>
    %382 = vector.shape_cast %381 : vector<8x8x32xbf16> to vector<64x32xbf16>
    %c0_176 = arith.constant 0 : index
    %c0_177 = arith.constant 0 : index
    %383 = vector.load %arg5[%c0_176, %c0_177] : memref<32x128xbf16, #tpu.memory_space<vmem>>, vector<32x128xbf16>
    %cst_178 = arith.constant dense<0.000000e+00> : vector<64x128xf32>
    %384 = tpu.matmul %382, %383, %cst_178 {dimension_numbers = #tpu.dot_dimension_numbers<[1], [0], [0], [1], [0, 0, 1, 1], [], []>} : vector<64x32xbf16>, vector<32x128xbf16>, vector<64x128xf32> -> vector<64x128xf32>
    %c0_179 = arith.constant 0 : index
    %c0_180 = arith.constant 0 : index
    %385 = vector.load %arg7[%c0_179, %c0_180] : memref<1x128xf32, #tpu.memory_space<vmem>>, vector<1x128xf32>
    %386 = vector.broadcast %385 : vector<1x128xf32> to vector<64x128xf32>
    %387 = arith.addf %384, %386 : vector<64x128xf32>
    %388 = vector.shape_cast %387 : vector<64x128xf32> to vector<8x8x128xf32>
    %c0_181 = arith.constant 0 : index
    %c0_182 = arith.constant 0 : index
    %c0_183 = arith.constant 0 : index
    %389 = vector.load %arg11[%c0_181, %c0_182, %c0_183] : memref<8x8x128xf32, #tpu.memory_space<vmem>>, vector<8x8x128xf32>
    tpu.vector_store %arg11[%c0_181, %c0_182, %c0_183], %388 {strides = array<i32>} : memref<8x8x128xf32, #tpu.memory_space<vmem>>, vector<8x8x128xf32>,
    %c0_184 = arith.constant 0 : index
    %c0_185 = arith.constant 0 : index
    %390 = vector.load %arg6[%c0_184, %c0_185] : memref<32x128xbf16, #tpu.memory_space<vmem>>, vector<32x128xbf16>
    %c0_i32_186 = arith.constant 0 : i32
    %391 = arith.index_cast %c0_i32_186 : i32 to index
    %c0_187 = arith.constant 0 : index
    %c0_188 = arith.constant 0 : index
    %392 = vector.load %arg11[%391, %c0_187, %c0_188] : memref<8x8x128xf32, #tpu.memory_space<vmem>>, vector<1x8x128xf32>
    %393 = vector.shape_cast %392 : vector<1x8x128xf32> to vector<8x128xf32>
    %c1 = arith.constant 1 : index
    %c0_189 = arith.constant 0 : index
    %c0_190 = arith.constant 0 : index
    %394 = vector.load %arg13[%c1, %c0_189, %c0_190] : memref<2x8x32xf32, #tpu.memory_space<vmem>>, vector<1x8x32xf32>
    %395 = vector.shape_cast %394 : vector<1x8x32xf32> to vector<8x32xf32>
    %396 = arith.truncf %395 : vector<8x32xf32> to vector<8x32xbf16>
    %cst_191 = arith.constant dense<0.000000e+00> : vector<8x128xf32>
    %397 = tpu.matmul %396, %390, %cst_191 {dimension_numbers = #tpu.dot_dimension_numbers<[1], [0], [0], [1], [0, 0, 1, 1], [], []>} : vector<8x32xbf16>, vector<32x128xbf16>, vector<8x128xf32> -> vector<8x128xf32>
    %398 = arith.addf %393, %397 : vector<8x128xf32>
    %399 = vector.extract_strided_slice %398 {offsets = [0, 0], sizes = [8, 32], strides = [1, 1]} : vector<8x128xf32> to vector<8x32xf32>
    %400 = arith.negf %399 : vector<8x32xf32>
    %401 = math.exp %400 : vector<8x32xf32>
    %cst_192 = arith.constant 1.000000e+00 : f32
    %402 = vector.broadcast %cst_192 : f32 to vector<8x32xf32>
    %403 = arith.addf %402, %401 : vector<8x32xf32>
    %404 = arith.divf %402, %403 : vector<8x32xf32>
    %405 = vector.extract_strided_slice %398 {offsets = [0, 32], sizes = [8, 32], strides = [1, 1]} : vector<8x128xf32> to vector<8x32xf32>
    %406 = arith.negf %405 : vector<8x32xf32>
    %407 = math.exp %406 : vector<8x32xf32>
    %cst_193 = arith.constant 1.000000e+00 : f32
    %408 = vector.broadcast %cst_193 : f32 to vector<8x32xf32>
    %409 = arith.addf %408, %407 : vector<8x32xf32>
    %410 = arith.divf %408, %409 : vector<8x32xf32>
    %411 = vector.extract_strided_slice %398 {offsets = [0, 64], sizes = [8, 32], strides = [1, 1]} : vector<8x128xf32> to vector<8x32xf32>
    %412 = math.tanh %411 : vector<8x32xf32>
    %413 = vector.extract_strided_slice %398 {offsets = [0, 96], sizes = [8, 32], strides = [1, 1]} : vector<8x128xf32> to vector<8x32xf32>
    %414 = arith.negf %413 : vector<8x32xf32>
    %415 = math.exp %414 : vector<8x32xf32>
    %cst_194 = arith.constant 1.000000e+00 : f32
    %416 = vector.broadcast %cst_194 : f32 to vector<8x32xf32>
    %417 = arith.addf %416, %415 : vector<8x32xf32>
    %418 = arith.divf %416, %417 : vector<8x32xf32>
    %c1_195 = arith.constant 1 : index
    %c0_196 = arith.constant 0 : index
    %c0_197 = arith.constant 0 : index
    %419 = vector.load %arg14[%c1_195, %c0_196, %c0_197] : memref<2x8x32xf32, #tpu.memory_space<vmem>>, vector<1x8x32xf32>
    %420 = vector.shape_cast %419 : vector<1x8x32xf32> to vector<8x32xf32>
    %421 = arith.mulf %410, %420 : vector<8x32xf32>
    %422 = arith.mulf %404, %412 : vector<8x32xf32>
    %423 = arith.addf %421, %422 : vector<8x32xf32>
    %424 = math.tanh %423 : vector<8x32xf32>
    %425 = arith.mulf %418, %424 : vector<8x32xf32>
    %c1_198 = arith.constant 1 : index
    %c0_199 = arith.constant 0 : index
    %c0_200 = arith.constant 0 : index
    %426 = vector.load %arg14[%c1_198, %c0_199, %c0_200] : memref<2x8x32xf32, #tpu.memory_space<vmem>>, vector<1x8x32xf32>
    %427 = vector.shape_cast %426 : vector<1x8x32xf32> to vector<8x32xf32>
    %428 = vector.shape_cast %423 : vector<8x32xf32> to vector<1x8x32xf32>
    tpu.vector_store %arg14[%c1_198, %c0_199, %c0_200], %428 {strides = array<i32>} : memref<2x8x32xf32, #tpu.memory_space<vmem>>, vector<1x8x32xf32>,
    %c1_201 = arith.constant 1 : index
    %c0_202 = arith.constant 0 : index
    %c0_203 = arith.constant 0 : index
    %429 = vector.load %arg13[%c1_201, %c0_202, %c0_203] : memref<2x8x32xf32, #tpu.memory_space<vmem>>, vector<1x8x32xf32>
    %430 = vector.shape_cast %429 : vector<1x8x32xf32> to vector<8x32xf32>
    %431 = vector.shape_cast %425 : vector<8x32xf32> to vector<1x8x32xf32>
    tpu.vector_store %arg13[%c1_201, %c0_202, %c0_203], %431 {strides = array<i32>} : memref<2x8x32xf32, #tpu.memory_space<vmem>>, vector<1x8x32xf32>,
    %c1_i32_204 = arith.constant 1 : i32
    %432 = arith.index_cast %c1_i32_204 : i32 to index
    %c0_205 = arith.constant 0 : index
    %c0_206 = arith.constant 0 : index
    %433 = vector.load %arg11[%432, %c0_205, %c0_206] : memref<8x8x128xf32, #tpu.memory_space<vmem>>, vector<1x8x128xf32>
    %434 = vector.shape_cast %433 : vector<1x8x128xf32> to vector<8x128xf32>
    %c1_207 = arith.constant 1 : index
    %c0_208 = arith.constant 0 : index
    %c0_209 = arith.constant 0 : index
    %435 = vector.load %arg13[%c1_207, %c0_208, %c0_209] : memref<2x8x32xf32, #tpu.memory_space<vmem>>, vector<1x8x32xf32>
    %436 = vector.shape_cast %435 : vector<1x8x32xf32> to vector<8x32xf32>
    %437 = arith.truncf %436 : vector<8x32xf32> to vector<8x32xbf16>
    %cst_210 = arith.constant dense<0.000000e+00> : vector<8x128xf32>
    %438 = tpu.matmul %437, %390, %cst_210 {dimension_numbers = #tpu.dot_dimension_numbers<[1], [0], [0], [1], [0, 0, 1, 1], [], []>} : vector<8x32xbf16>, vector<32x128xbf16>, vector<8x128xf32> -> vector<8x128xf32>
    %439 = arith.addf %434, %438 : vector<8x128xf32>
    %440 = vector.extract_strided_slice %439 {offsets = [0, 0], sizes = [8, 32], strides = [1, 1]} : vector<8x128xf32> to vector<8x32xf32>
    %441 = arith.negf %440 : vector<8x32xf32>
    %442 = math.exp %441 : vector<8x32xf32>
    %cst_211 = arith.constant 1.000000e+00 : f32
    %443 = vector.broadcast %cst_211 : f32 to vector<8x32xf32>
    %444 = arith.addf %443, %442 : vector<8x32xf32>
    %445 = arith.divf %443, %444 : vector<8x32xf32>
    %446 = vector.extract_strided_slice %439 {offsets = [0, 32], sizes = [8, 32], strides = [1, 1]} : vector<8x128xf32> to vector<8x32xf32>
    %447 = arith.negf %446 : vector<8x32xf32>
    %448 = math.exp %447 : vector<8x32xf32>
    %cst_212 = arith.constant 1.000000e+00 : f32
    %449 = vector.broadcast %cst_212 : f32 to vector<8x32xf32>
    %450 = arith.addf %449, %448 : vector<8x32xf32>
    %451 = arith.divf %449, %450 : vector<8x32xf32>
    %452 = vector.extract_strided_slice %439 {offsets = [0, 64], sizes = [8, 32], strides = [1, 1]} : vector<8x128xf32> to vector<8x32xf32>
    %453 = math.tanh %452 : vector<8x32xf32>
    %454 = vector.extract_strided_slice %439 {offsets = [0, 96], sizes = [8, 32], strides = [1, 1]} : vector<8x128xf32> to vector<8x32xf32>
    %455 = arith.negf %454 : vector<8x32xf32>
    %456 = math.exp %455 : vector<8x32xf32>
    %cst_213 = arith.constant 1.000000e+00 : f32
    %457 = vector.broadcast %cst_213 : f32 to vector<8x32xf32>
    %458 = arith.addf %457, %456 : vector<8x32xf32>
    %459 = arith.divf %457, %458 : vector<8x32xf32>
    %c1_214 = arith.constant 1 : index
    %c0_215 = arith.constant 0 : index
    %c0_216 = arith.constant 0 : index
    %460 = vector.load %arg14[%c1_214, %c0_215, %c0_216] : memref<2x8x32xf32, #tpu.memory_space<vmem>>, vector<1x8x32xf32>
    %461 = vector.shape_cast %460 : vector<1x8x32xf32> to vector<8x32xf32>
    %462 = arith.mulf %451, %461 : vector<8x32xf32>
    %463 = arith.mulf %445, %453 : vector<8x32xf32>
    %464 = arith.addf %462, %463 : vector<8x32xf32>
    %465 = math.tanh %464 : vector<8x32xf32>
    %466 = arith.mulf %459, %465 : vector<8x32xf32>
    %c1_217 = arith.constant 1 : index
    %c0_218 = arith.constant 0 : index
    %c0_219 = arith.constant 0 : index
    %467 = vector.load %arg14[%c1_217, %c0_218, %c0_219] : memref<2x8x32xf32, #tpu.memory_space<vmem>>, vector<1x8x32xf32>
    %468 = vector.shape_cast %467 : vector<1x8x32xf32> to vector<8x32xf32>
    %469 = vector.shape_cast %464 : vector<8x32xf32> to vector<1x8x32xf32>
    tpu.vector_store %arg14[%c1_217, %c0_218, %c0_219], %469 {strides = array<i32>} : memref<2x8x32xf32, #tpu.memory_space<vmem>>, vector<1x8x32xf32>,
    %c1_220 = arith.constant 1 : index
    %c0_221 = arith.constant 0 : index
    %c0_222 = arith.constant 0 : index
    %470 = vector.load %arg13[%c1_220, %c0_221, %c0_222] : memref<2x8x32xf32, #tpu.memory_space<vmem>>, vector<1x8x32xf32>
    %471 = vector.shape_cast %470 : vector<1x8x32xf32> to vector<8x32xf32>
    %472 = vector.shape_cast %466 : vector<8x32xf32> to vector<1x8x32xf32>
    tpu.vector_store %arg13[%c1_220, %c0_221, %c0_222], %472 {strides = array<i32>} : memref<2x8x32xf32, #tpu.memory_space<vmem>>, vector<1x8x32xf32>,
    %c2_i32_223 = arith.constant 2 : i32
    %473 = arith.index_cast %c2_i32_223 : i32 to index
    %c0_224 = arith.constant 0 : index
    %c0_225 = arith.constant 0 : index
    %474 = vector.load %arg11[%473, %c0_224, %c0_225] : memref<8x8x128xf32, #tpu.memory_space<vmem>>, vector<1x8x128xf32>
    %475 = vector.shape_cast %474 : vector<1x8x128xf32> to vector<8x128xf32>
    %c1_226 = arith.constant 1 : index
    %c0_227 = arith.constant 0 : index
    %c0_228 = arith.constant 0 : index
    %476 = vector.load %arg13[%c1_226, %c0_227, %c0_228] : memref<2x8x32xf32, #tpu.memory_space<vmem>>, vector<1x8x32xf32>
    %477 = vector.shape_cast %476 : vector<1x8x32xf32> to vector<8x32xf32>
    %478 = arith.truncf %477 : vector<8x32xf32> to vector<8x32xbf16>
    %cst_229 = arith.constant dense<0.000000e+00> : vector<8x128xf32>
    %479 = tpu.matmul %478, %390, %cst_229 {dimension_numbers = #tpu.dot_dimension_numbers<[1], [0], [0], [1], [0, 0, 1, 1], [], []>} : vector<8x32xbf16>, vector<32x128xbf16>, vector<8x128xf32> -> vector<8x128xf32>
    %480 = arith.addf %475, %479 : vector<8x128xf32>
    %481 = vector.extract_strided_slice %480 {offsets = [0, 0], sizes = [8, 32], strides = [1, 1]} : vector<8x128xf32> to vector<8x32xf32>
    %482 = arith.negf %481 : vector<8x32xf32>
    %483 = math.exp %482 : vector<8x32xf32>
    %cst_230 = arith.constant 1.000000e+00 : f32
    %484 = vector.broadcast %cst_230 : f32 to vector<8x32xf32>
    %485 = arith.addf %484, %483 : vector<8x32xf32>
    %486 = arith.divf %484, %485 : vector<8x32xf32>
    %487 = vector.extract_strided_slice %480 {offsets = [0, 32], sizes = [8, 32], strides = [1, 1]} : vector<8x128xf32> to vector<8x32xf32>
    %488 = arith.negf %487 : vector<8x32xf32>
    %489 = math.exp %488 : vector<8x32xf32>
    %cst_231 = arith.constant 1.000000e+00 : f32
    %490 = vector.broadcast %cst_231 : f32 to vector<8x32xf32>
    %491 = arith.addf %490, %489 : vector<8x32xf32>
    %492 = arith.divf %490, %491 : vector<8x32xf32>
    %493 = vector.extract_strided_slice %480 {offsets = [0, 64], sizes = [8, 32], strides = [1, 1]} : vector<8x128xf32> to vector<8x32xf32>
    %494 = math.tanh %493 : vector<8x32xf32>
    %495 = vector.extract_strided_slice %480 {offsets = [0, 96], sizes = [8, 32], strides = [1, 1]} : vector<8x128xf32> to vector<8x32xf32>
    %496 = arith.negf %495 : vector<8x32xf32>
    %497 = math.exp %496 : vector<8x32xf32>
    %cst_232 = arith.constant 1.000000e+00 : f32
    %498 = vector.broadcast %cst_232 : f32 to vector<8x32xf32>
    %499 = arith.addf %498, %497 : vector<8x32xf32>
    %500 = arith.divf %498, %499 : vector<8x32xf32>
    %c1_233 = arith.constant 1 : index
    %c0_234 = arith.constant 0 : index
    %c0_235 = arith.constant 0 : index
    %501 = vector.load %arg14[%c1_233, %c0_234, %c0_235] : memref<2x8x32xf32, #tpu.memory_space<vmem>>, vector<1x8x32xf32>
    %502 = vector.shape_cast %501 : vector<1x8x32xf32> to vector<8x32xf32>
    %503 = arith.mulf %492, %502 : vector<8x32xf32>
    %504 = arith.mulf %486, %494 : vector<8x32xf32>
    %505 = arith.addf %503, %504 : vector<8x32xf32>
    %506 = math.tanh %505 : vector<8x32xf32>
    %507 = arith.mulf %500, %506 : vector<8x32xf32>
    %c1_236 = arith.constant 1 : index
    %c0_237 = arith.constant 0 : index
    %c0_238 = arith.constant 0 : index
    %508 = vector.load %arg14[%c1_236, %c0_237, %c0_238] : memref<2x8x32xf32, #tpu.memory_space<vmem>>, vector<1x8x32xf32>
    %509 = vector.shape_cast %508 : vector<1x8x32xf32> to vector<8x32xf32>
    %510 = vector.shape_cast %505 : vector<8x32xf32> to vector<1x8x32xf32>
    tpu.vector_store %arg14[%c1_236, %c0_237, %c0_238], %510 {strides = array<i32>} : memref<2x8x32xf32, #tpu.memory_space<vmem>>, vector<1x8x32xf32>,
    %c1_239 = arith.constant 1 : index
    %c0_240 = arith.constant 0 : index
    %c0_241 = arith.constant 0 : index
    %511 = vector.load %arg13[%c1_239, %c0_240, %c0_241] : memref<2x8x32xf32, #tpu.memory_space<vmem>>, vector<1x8x32xf32>
    %512 = vector.shape_cast %511 : vector<1x8x32xf32> to vector<8x32xf32>
    %513 = vector.shape_cast %507 : vector<8x32xf32> to vector<1x8x32xf32>
    tpu.vector_store %arg13[%c1_239, %c0_240, %c0_241], %513 {strides = array<i32>} : memref<2x8x32xf32, #tpu.memory_space<vmem>>, vector<1x8x32xf32>,
    %c3_i32_242 = arith.constant 3 : i32
    %514 = arith.index_cast %c3_i32_242 : i32 to index
    %c0_243 = arith.constant 0 : index
    %c0_244 = arith.constant 0 : index
    %515 = vector.load %arg11[%514, %c0_243, %c0_244] : memref<8x8x128xf32, #tpu.memory_space<vmem>>, vector<1x8x128xf32>
    %516 = vector.shape_cast %515 : vector<1x8x128xf32> to vector<8x128xf32>
    %c1_245 = arith.constant 1 : index
    %c0_246 = arith.constant 0 : index
    %c0_247 = arith.constant 0 : index
    %517 = vector.load %arg13[%c1_245, %c0_246, %c0_247] : memref<2x8x32xf32, #tpu.memory_space<vmem>>, vector<1x8x32xf32>
    %518 = vector.shape_cast %517 : vector<1x8x32xf32> to vector<8x32xf32>
    %519 = arith.truncf %518 : vector<8x32xf32> to vector<8x32xbf16>
    %cst_248 = arith.constant dense<0.000000e+00> : vector<8x128xf32>
    %520 = tpu.matmul %519, %390, %cst_248 {dimension_numbers = #tpu.dot_dimension_numbers<[1], [0], [0], [1], [0, 0, 1, 1], [], []>} : vector<8x32xbf16>, vector<32x128xbf16>, vector<8x128xf32> -> vector<8x128xf32>
    %521 = arith.addf %516, %520 : vector<8x128xf32>
    %522 = vector.extract_strided_slice %521 {offsets = [0, 0], sizes = [8, 32], strides = [1, 1]} : vector<8x128xf32> to vector<8x32xf32>
    %523 = arith.negf %522 : vector<8x32xf32>
    %524 = math.exp %523 : vector<8x32xf32>
    %cst_249 = arith.constant 1.000000e+00 : f32
    %525 = vector.broadcast %cst_249 : f32 to vector<8x32xf32>
    %526 = arith.addf %525, %524 : vector<8x32xf32>
    %527 = arith.divf %525, %526 : vector<8x32xf32>
    %528 = vector.extract_strided_slice %521 {offsets = [0, 32], sizes = [8, 32], strides = [1, 1]} : vector<8x128xf32> to vector<8x32xf32>
    %529 = arith.negf %528 : vector<8x32xf32>
    %530 = math.exp %529 : vector<8x32xf32>
    %cst_250 = arith.constant 1.000000e+00 : f32
    %531 = vector.broadcast %cst_250 : f32 to vector<8x32xf32>
    %532 = arith.addf %531, %530 : vector<8x32xf32>
    %533 = arith.divf %531, %532 : vector<8x32xf32>
    %534 = vector.extract_strided_slice %521 {offsets = [0, 64], sizes = [8, 32], strides = [1, 1]} : vector<8x128xf32> to vector<8x32xf32>
    %535 = math.tanh %534 : vector<8x32xf32>
    %536 = vector.extract_strided_slice %521 {offsets = [0, 96], sizes = [8, 32], strides = [1, 1]} : vector<8x128xf32> to vector<8x32xf32>
    %537 = arith.negf %536 : vector<8x32xf32>
    %538 = math.exp %537 : vector<8x32xf32>
    %cst_251 = arith.constant 1.000000e+00 : f32
    %539 = vector.broadcast %cst_251 : f32 to vector<8x32xf32>
    %540 = arith.addf %539, %538 : vector<8x32xf32>
    %541 = arith.divf %539, %540 : vector<8x32xf32>
    %c1_252 = arith.constant 1 : index
    %c0_253 = arith.constant 0 : index
    %c0_254 = arith.constant 0 : index
    %542 = vector.load %arg14[%c1_252, %c0_253, %c0_254] : memref<2x8x32xf32, #tpu.memory_space<vmem>>, vector<1x8x32xf32>
    %543 = vector.shape_cast %542 : vector<1x8x32xf32> to vector<8x32xf32>
    %544 = arith.mulf %533, %543 : vector<8x32xf32>
    %545 = arith.mulf %527, %535 : vector<8x32xf32>
    %546 = arith.addf %544, %545 : vector<8x32xf32>
    %547 = math.tanh %546 : vector<8x32xf32>
    %548 = arith.mulf %541, %547 : vector<8x32xf32>
    %c1_255 = arith.constant 1 : index
    %c0_256 = arith.constant 0 : index
    %c0_257 = arith.constant 0 : index
    %549 = vector.load %arg14[%c1_255, %c0_256, %c0_257] : memref<2x8x32xf32, #tpu.memory_space<vmem>>, vector<1x8x32xf32>
    %550 = vector.shape_cast %549 : vector<1x8x32xf32> to vector<8x32xf32>
    %551 = vector.shape_cast %546 : vector<8x32xf32> to vector<1x8x32xf32>
    tpu.vector_store %arg14[%c1_255, %c0_256, %c0_257], %551 {strides = array<i32>} : memref<2x8x32xf32, #tpu.memory_space<vmem>>, vector<1x8x32xf32>,
    %c1_258 = arith.constant 1 : index
    %c0_259 = arith.constant 0 : index
    %c0_260 = arith.constant 0 : index
    %552 = vector.load %arg13[%c1_258, %c0_259, %c0_260] : memref<2x8x32xf32, #tpu.memory_space<vmem>>, vector<1x8x32xf32>
    %553 = vector.shape_cast %552 : vector<1x8x32xf32> to vector<8x32xf32>
    %554 = vector.shape_cast %548 : vector<8x32xf32> to vector<1x8x32xf32>
    tpu.vector_store %arg13[%c1_258, %c0_259, %c0_260], %554 {strides = array<i32>} : memref<2x8x32xf32, #tpu.memory_space<vmem>>, vector<1x8x32xf32>,
    %c4_i32_261 = arith.constant 4 : i32
    %555 = arith.index_cast %c4_i32_261 : i32 to index
    %c0_262 = arith.constant 0 : index
    %c0_263 = arith.constant 0 : index
    %556 = vector.load %arg11[%555, %c0_262, %c0_263] : memref<8x8x128xf32, #tpu.memory_space<vmem>>, vector<1x8x128xf32>
    %557 = vector.shape_cast %556 : vector<1x8x128xf32> to vector<8x128xf32>
    %c1_264 = arith.constant 1 : index
    %c0_265 = arith.constant 0 : index
    %c0_266 = arith.constant 0 : index
    %558 = vector.load %arg13[%c1_264, %c0_265, %c0_266] : memref<2x8x32xf32, #tpu.memory_space<vmem>>, vector<1x8x32xf32>
    %559 = vector.shape_cast %558 : vector<1x8x32xf32> to vector<8x32xf32>
    %560 = arith.truncf %559 : vector<8x32xf32> to vector<8x32xbf16>
    %cst_267 = arith.constant dense<0.000000e+00> : vector<8x128xf32>
    %561 = tpu.matmul %560, %390, %cst_267 {dimension_numbers = #tpu.dot_dimension_numbers<[1], [0], [0], [1], [0, 0, 1, 1], [], []>} : vector<8x32xbf16>, vector<32x128xbf16>, vector<8x128xf32> -> vector<8x128xf32>
    %562 = arith.addf %557, %561 : vector<8x128xf32>
    %563 = vector.extract_strided_slice %562 {offsets = [0, 0], sizes = [8, 32], strides = [1, 1]} : vector<8x128xf32> to vector<8x32xf32>
    %564 = arith.negf %563 : vector<8x32xf32>
    %565 = math.exp %564 : vector<8x32xf32>
    %cst_268 = arith.constant 1.000000e+00 : f32
    %566 = vector.broadcast %cst_268 : f32 to vector<8x32xf32>
    %567 = arith.addf %566, %565 : vector<8x32xf32>
    %568 = arith.divf %566, %567 : vector<8x32xf32>
    %569 = vector.extract_strided_slice %562 {offsets = [0, 32], sizes = [8, 32], strides = [1, 1]} : vector<8x128xf32> to vector<8x32xf32>
    %570 = arith.negf %569 : vector<8x32xf32>
    %571 = math.exp %570 : vector<8x32xf32>
    %cst_269 = arith.constant 1.000000e+00 : f32
    %572 = vector.broadcast %cst_269 : f32 to vector<8x32xf32>
    %573 = arith.addf %572, %571 : vector<8x32xf32>
    %574 = arith.divf %572, %573 : vector<8x32xf32>
    %575 = vector.extract_strided_slice %562 {offsets = [0, 64], sizes = [8, 32], strides = [1, 1]} : vector<8x128xf32> to vector<8x32xf32>
    %576 = math.tanh %575 : vector<8x32xf32>
    %577 = vector.extract_strided_slice %562 {offsets = [0, 96], sizes = [8, 32], strides = [1, 1]} : vector<8x128xf32> to vector<8x32xf32>
    %578 = arith.negf %577 : vector<8x32xf32>
    %579 = math.exp %578 : vector<8x32xf32>
    %cst_270 = arith.constant 1.000000e+00 : f32
    %580 = vector.broadcast %cst_270 : f32 to vector<8x32xf32>
    %581 = arith.addf %580, %579 : vector<8x32xf32>
    %582 = arith.divf %580, %581 : vector<8x32xf32>
    %c1_271 = arith.constant 1 : index
    %c0_272 = arith.constant 0 : index
    %c0_273 = arith.constant 0 : index
    %583 = vector.load %arg14[%c1_271, %c0_272, %c0_273] : memref<2x8x32xf32, #tpu.memory_space<vmem>>, vector<1x8x32xf32>
    %584 = vector.shape_cast %583 : vector<1x8x32xf32> to vector<8x32xf32>
    %585 = arith.mulf %574, %584 : vector<8x32xf32>
    %586 = arith.mulf %568, %576 : vector<8x32xf32>
    %587 = arith.addf %585, %586 : vector<8x32xf32>
    %588 = math.tanh %587 : vector<8x32xf32>
    %589 = arith.mulf %582, %588 : vector<8x32xf32>
    %c1_274 = arith.constant 1 : index
    %c0_275 = arith.constant 0 : index
    %c0_276 = arith.constant 0 : index
    %590 = vector.load %arg14[%c1_274, %c0_275, %c0_276] : memref<2x8x32xf32, #tpu.memory_space<vmem>>, vector<1x8x32xf32>
    %591 = vector.shape_cast %590 : vector<1x8x32xf32> to vector<8x32xf32>
    %592 = vector.shape_cast %587 : vector<8x32xf32> to vector<1x8x32xf32>
    tpu.vector_store %arg14[%c1_274, %c0_275, %c0_276], %592 {strides = array<i32>} : memref<2x8x32xf32, #tpu.memory_space<vmem>>, vector<1x8x32xf32>,
    %c1_277 = arith.constant 1 : index
    %c0_278 = arith.constant 0 : index
    %c0_279 = arith.constant 0 : index
    %593 = vector.load %arg13[%c1_277, %c0_278, %c0_279] : memref<2x8x32xf32, #tpu.memory_space<vmem>>, vector<1x8x32xf32>
    %594 = vector.shape_cast %593 : vector<1x8x32xf32> to vector<8x32xf32>
    %595 = vector.shape_cast %589 : vector<8x32xf32> to vector<1x8x32xf32>
    tpu.vector_store %arg13[%c1_277, %c0_278, %c0_279], %595 {strides = array<i32>} : memref<2x8x32xf32, #tpu.memory_space<vmem>>, vector<1x8x32xf32>,
    %c5_i32_280 = arith.constant 5 : i32
    %596 = arith.index_cast %c5_i32_280 : i32 to index
    %c0_281 = arith.constant 0 : index
    %c0_282 = arith.constant 0 : index
    %597 = vector.load %arg11[%596, %c0_281, %c0_282] : memref<8x8x128xf32, #tpu.memory_space<vmem>>, vector<1x8x128xf32>
    %598 = vector.shape_cast %597 : vector<1x8x128xf32> to vector<8x128xf32>
    %c1_283 = arith.constant 1 : index
    %c0_284 = arith.constant 0 : index
    %c0_285 = arith.constant 0 : index
    %599 = vector.load %arg13[%c1_283, %c0_284, %c0_285] : memref<2x8x32xf32, #tpu.memory_space<vmem>>, vector<1x8x32xf32>
    %600 = vector.shape_cast %599 : vector<1x8x32xf32> to vector<8x32xf32>
    %601 = arith.truncf %600 : vector<8x32xf32> to vector<8x32xbf16>
    %cst_286 = arith.constant dense<0.000000e+00> : vector<8x128xf32>
    %602 = tpu.matmul %601, %390, %cst_286 {dimension_numbers = #tpu.dot_dimension_numbers<[1], [0], [0], [1], [0, 0, 1, 1], [], []>} : vector<8x32xbf16>, vector<32x128xbf16>, vector<8x128xf32> -> vector<8x128xf32>
    %603 = arith.addf %598, %602 : vector<8x128xf32>
    %604 = vector.extract_strided_slice %603 {offsets = [0, 0], sizes = [8, 32], strides = [1, 1]} : vector<8x128xf32> to vector<8x32xf32>
    %605 = arith.negf %604 : vector<8x32xf32>
    %606 = math.exp %605 : vector<8x32xf32>
    %cst_287 = arith.constant 1.000000e+00 : f32
    %607 = vector.broadcast %cst_287 : f32 to vector<8x32xf32>
    %608 = arith.addf %607, %606 : vector<8x32xf32>
    %609 = arith.divf %607, %608 : vector<8x32xf32>
    %610 = vector.extract_strided_slice %603 {offsets = [0, 32], sizes = [8, 32], strides = [1, 1]} : vector<8x128xf32> to vector<8x32xf32>
    %611 = arith.negf %610 : vector<8x32xf32>
    %612 = math.exp %611 : vector<8x32xf32>
    %cst_288 = arith.constant 1.000000e+00 : f32
    %613 = vector.broadcast %cst_288 : f32 to vector<8x32xf32>
    %614 = arith.addf %613, %612 : vector<8x32xf32>
    %615 = arith.divf %613, %614 : vector<8x32xf32>
    %616 = vector.extract_strided_slice %603 {offsets = [0, 64], sizes = [8, 32], strides = [1, 1]} : vector<8x128xf32> to vector<8x32xf32>
    %617 = math.tanh %616 : vector<8x32xf32>
    %618 = vector.extract_strided_slice %603 {offsets = [0, 96], sizes = [8, 32], strides = [1, 1]} : vector<8x128xf32> to vector<8x32xf32>
    %619 = arith.negf %618 : vector<8x32xf32>
    %620 = math.exp %619 : vector<8x32xf32>
    %cst_289 = arith.constant 1.000000e+00 : f32
    %621 = vector.broadcast %cst_289 : f32 to vector<8x32xf32>
    %622 = arith.addf %621, %620 : vector<8x32xf32>
    %623 = arith.divf %621, %622 : vector<8x32xf32>
    %c1_290 = arith.constant 1 : index
    %c0_291 = arith.constant 0 : index
    %c0_292 = arith.constant 0 : index
    %624 = vector.load %arg14[%c1_290, %c0_291, %c0_292] : memref<2x8x32xf32, #tpu.memory_space<vmem>>, vector<1x8x32xf32>
    %625 = vector.shape_cast %624 : vector<1x8x32xf32> to vector<8x32xf32>
    %626 = arith.mulf %615, %625 : vector<8x32xf32>
    %627 = arith.mulf %609, %617 : vector<8x32xf32>
    %628 = arith.addf %626, %627 : vector<8x32xf32>
    %629 = math.tanh %628 : vector<8x32xf32>
    %630 = arith.mulf %623, %629 : vector<8x32xf32>
    %c1_293 = arith.constant 1 : index
    %c0_294 = arith.constant 0 : index
    %c0_295 = arith.constant 0 : index
    %631 = vector.load %arg14[%c1_293, %c0_294, %c0_295] : memref<2x8x32xf32, #tpu.memory_space<vmem>>, vector<1x8x32xf32>
    %632 = vector.shape_cast %631 : vector<1x8x32xf32> to vector<8x32xf32>
    %633 = vector.shape_cast %628 : vector<8x32xf32> to vector<1x8x32xf32>
    tpu.vector_store %arg14[%c1_293, %c0_294, %c0_295], %633 {strides = array<i32>} : memref<2x8x32xf32, #tpu.memory_space<vmem>>, vector<1x8x32xf32>,
    %c1_296 = arith.constant 1 : index
    %c0_297 = arith.constant 0 : index
    %c0_298 = arith.constant 0 : index
    %634 = vector.load %arg13[%c1_296, %c0_297, %c0_298] : memref<2x8x32xf32, #tpu.memory_space<vmem>>, vector<1x8x32xf32>
    %635 = vector.shape_cast %634 : vector<1x8x32xf32> to vector<8x32xf32>
    %636 = vector.shape_cast %630 : vector<8x32xf32> to vector<1x8x32xf32>
    tpu.vector_store %arg13[%c1_296, %c0_297, %c0_298], %636 {strides = array<i32>} : memref<2x8x32xf32, #tpu.memory_space<vmem>>, vector<1x8x32xf32>,
    %c6_i32_299 = arith.constant 6 : i32
    %637 = arith.index_cast %c6_i32_299 : i32 to index
    %c0_300 = arith.constant 0 : index
    %c0_301 = arith.constant 0 : index
    %638 = vector.load %arg11[%637, %c0_300, %c0_301] : memref<8x8x128xf32, #tpu.memory_space<vmem>>, vector<1x8x128xf32>
    %639 = vector.shape_cast %638 : vector<1x8x128xf32> to vector<8x128xf32>
    %c1_302 = arith.constant 1 : index
    %c0_303 = arith.constant 0 : index
    %c0_304 = arith.constant 0 : index
    %640 = vector.load %arg13[%c1_302, %c0_303, %c0_304] : memref<2x8x32xf32, #tpu.memory_space<vmem>>, vector<1x8x32xf32>
    %641 = vector.shape_cast %640 : vector<1x8x32xf32> to vector<8x32xf32>
    %642 = arith.truncf %641 : vector<8x32xf32> to vector<8x32xbf16>
    %cst_305 = arith.constant dense<0.000000e+00> : vector<8x128xf32>
    %643 = tpu.matmul %642, %390, %cst_305 {dimension_numbers = #tpu.dot_dimension_numbers<[1], [0], [0], [1], [0, 0, 1, 1], [], []>} : vector<8x32xbf16>, vector<32x128xbf16>, vector<8x128xf32> -> vector<8x128xf32>
    %644 = arith.addf %639, %643 : vector<8x128xf32>
    %645 = vector.extract_strided_slice %644 {offsets = [0, 0], sizes = [8, 32], strides = [1, 1]} : vector<8x128xf32> to vector<8x32xf32>
    %646 = arith.negf %645 : vector<8x32xf32>
    %647 = math.exp %646 : vector<8x32xf32>
    %cst_306 = arith.constant 1.000000e+00 : f32
    %648 = vector.broadcast %cst_306 : f32 to vector<8x32xf32>
    %649 = arith.addf %648, %647 : vector<8x32xf32>
    %650 = arith.divf %648, %649 : vector<8x32xf32>
    %651 = vector.extract_strided_slice %644 {offsets = [0, 32], sizes = [8, 32], strides = [1, 1]} : vector<8x128xf32> to vector<8x32xf32>
    %652 = arith.negf %651 : vector<8x32xf32>
    %653 = math.exp %652 : vector<8x32xf32>
    %cst_307 = arith.constant 1.000000e+00 : f32
    %654 = vector.broadcast %cst_307 : f32 to vector<8x32xf32>
    %655 = arith.addf %654, %653 : vector<8x32xf32>
    %656 = arith.divf %654, %655 : vector<8x32xf32>
    %657 = vector.extract_strided_slice %644 {offsets = [0, 64], sizes = [8, 32], strides = [1, 1]} : vector<8x128xf32> to vector<8x32xf32>
    %658 = math.tanh %657 : vector<8x32xf32>
    %659 = vector.extract_strided_slice %644 {offsets = [0, 96], sizes = [8, 32], strides = [1, 1]} : vector<8x128xf32> to vector<8x32xf32>
    %660 = arith.negf %659 : vector<8x32xf32>
    %661 = math.exp %660 : vector<8x32xf32>
    %cst_308 = arith.constant 1.000000e+00 : f32
    %662 = vector.broadcast %cst_308 : f32 to vector<8x32xf32>
    %663 = arith.addf %662, %661 : vector<8x32xf32>
    %664 = arith.divf %662, %663 : vector<8x32xf32>
    %c1_309 = arith.constant 1 : index
    %c0_310 = arith.constant 0 : index
    %c0_311 = arith.constant 0 : index
    %665 = vector.load %arg14[%c1_309, %c0_310, %c0_311] : memref<2x8x32xf32, #tpu.memory_space<vmem>>, vector<1x8x32xf32>
    %666 = vector.shape_cast %665 : vector<1x8x32xf32> to vector<8x32xf32>
    %667 = arith.mulf %656, %666 : vector<8x32xf32>
    %668 = arith.mulf %650, %658 : vector<8x32xf32>
    %669 = arith.addf %667, %668 : vector<8x32xf32>
    %670 = math.tanh %669 : vector<8x32xf32>
    %671 = arith.mulf %664, %670 : vector<8x32xf32>
    %c1_312 = arith.constant 1 : index
    %c0_313 = arith.constant 0 : index
    %c0_314 = arith.constant 0 : index
    %672 = vector.load %arg14[%c1_312, %c0_313, %c0_314] : memref<2x8x32xf32, #tpu.memory_space<vmem>>, vector<1x8x32xf32>
    %673 = vector.shape_cast %672 : vector<1x8x32xf32> to vector<8x32xf32>
    %674 = vector.shape_cast %669 : vector<8x32xf32> to vector<1x8x32xf32>
    tpu.vector_store %arg14[%c1_312, %c0_313, %c0_314], %674 {strides = array<i32>} : memref<2x8x32xf32, #tpu.memory_space<vmem>>, vector<1x8x32xf32>,
    %c1_315 = arith.constant 1 : index
    %c0_316 = arith.constant 0 : index
    %c0_317 = arith.constant 0 : index
    %675 = vector.load %arg13[%c1_315, %c0_316, %c0_317] : memref<2x8x32xf32, #tpu.memory_space<vmem>>, vector<1x8x32xf32>
    %676 = vector.shape_cast %675 : vector<1x8x32xf32> to vector<8x32xf32>
    %677 = vector.shape_cast %671 : vector<8x32xf32> to vector<1x8x32xf32>
    tpu.vector_store %arg13[%c1_315, %c0_316, %c0_317], %677 {strides = array<i32>} : memref<2x8x32xf32, #tpu.memory_space<vmem>>, vector<1x8x32xf32>,
    %c7_i32_318 = arith.constant 7 : i32
    %678 = arith.index_cast %c7_i32_318 : i32 to index
    %c0_319 = arith.constant 0 : index
    %c0_320 = arith.constant 0 : index
    %679 = vector.load %arg11[%678, %c0_319, %c0_320] : memref<8x8x128xf32, #tpu.memory_space<vmem>>, vector<1x8x128xf32>
    %680 = vector.shape_cast %679 : vector<1x8x128xf32> to vector<8x128xf32>
    %c1_321 = arith.constant 1 : index
    %c0_322 = arith.constant 0 : index
    %c0_323 = arith.constant 0 : index
    %681 = vector.load %arg13[%c1_321, %c0_322, %c0_323] : memref<2x8x32xf32, #tpu.memory_space<vmem>>, vector<1x8x32xf32>
    %682 = vector.shape_cast %681 : vector<1x8x32xf32> to vector<8x32xf32>
    %683 = arith.truncf %682 : vector<8x32xf32> to vector<8x32xbf16>
    %cst_324 = arith.constant dense<0.000000e+00> : vector<8x128xf32>
    %684 = tpu.matmul %683, %390, %cst_324 {dimension_numbers = #tpu.dot_dimension_numbers<[1], [0], [0], [1], [0, 0, 1, 1], [], []>} : vector<8x32xbf16>, vector<32x128xbf16>, vector<8x128xf32> -> vector<8x128xf32>
    %685 = arith.addf %680, %684 : vector<8x128xf32>
    %686 = vector.extract_strided_slice %685 {offsets = [0, 0], sizes = [8, 32], strides = [1, 1]} : vector<8x128xf32> to vector<8x32xf32>
    %687 = arith.negf %686 : vector<8x32xf32>
    %688 = math.exp %687 : vector<8x32xf32>
    %cst_325 = arith.constant 1.000000e+00 : f32
    %689 = vector.broadcast %cst_325 : f32 to vector<8x32xf32>
    %690 = arith.addf %689, %688 : vector<8x32xf32>
    %691 = arith.divf %689, %690 : vector<8x32xf32>
    %692 = vector.extract_strided_slice %685 {offsets = [0, 32], sizes = [8, 32], strides = [1, 1]} : vector<8x128xf32> to vector<8x32xf32>
    %693 = arith.negf %692 : vector<8x32xf32>
    %694 = math.exp %693 : vector<8x32xf32>
    %cst_326 = arith.constant 1.000000e+00 : f32
    %695 = vector.broadcast %cst_326 : f32 to vector<8x32xf32>
    %696 = arith.addf %695, %694 : vector<8x32xf32>
    %697 = arith.divf %695, %696 : vector<8x32xf32>
    %698 = vector.extract_strided_slice %685 {offsets = [0, 64], sizes = [8, 32], strides = [1, 1]} : vector<8x128xf32> to vector<8x32xf32>
    %699 = math.tanh %698 : vector<8x32xf32>
    %700 = vector.extract_strided_slice %685 {offsets = [0, 96], sizes = [8, 32], strides = [1, 1]} : vector<8x128xf32> to vector<8x32xf32>
    %701 = arith.negf %700 : vector<8x32xf32>
    %702 = math.exp %701 : vector<8x32xf32>
    %cst_327 = arith.constant 1.000000e+00 : f32
    %703 = vector.broadcast %cst_327 : f32 to vector<8x32xf32>
    %704 = arith.addf %703, %702 : vector<8x32xf32>
    %705 = arith.divf %703, %704 : vector<8x32xf32>
    %c1_328 = arith.constant 1 : index
    %c0_329 = arith.constant 0 : index
    %c0_330 = arith.constant 0 : index
    %706 = vector.load %arg14[%c1_328, %c0_329, %c0_330] : memref<2x8x32xf32, #tpu.memory_space<vmem>>, vector<1x8x32xf32>
    %707 = vector.shape_cast %706 : vector<1x8x32xf32> to vector<8x32xf32>
    %708 = arith.mulf %697, %707 : vector<8x32xf32>
    %709 = arith.mulf %691, %699 : vector<8x32xf32>
    %710 = arith.addf %708, %709 : vector<8x32xf32>
    %711 = math.tanh %710 : vector<8x32xf32>
    %712 = arith.mulf %705, %711 : vector<8x32xf32>
    %c1_331 = arith.constant 1 : index
    %c0_332 = arith.constant 0 : index
    %c0_333 = arith.constant 0 : index
    %713 = vector.load %arg14[%c1_331, %c0_332, %c0_333] : memref<2x8x32xf32, #tpu.memory_space<vmem>>, vector<1x8x32xf32>
    %714 = vector.shape_cast %713 : vector<1x8x32xf32> to vector<8x32xf32>
    %715 = vector.shape_cast %710 : vector<8x32xf32> to vector<1x8x32xf32>
    tpu.vector_store %arg14[%c1_331, %c0_332, %c0_333], %715 {strides = array<i32>} : memref<2x8x32xf32, #tpu.memory_space<vmem>>, vector<1x8x32xf32>,
    %c1_334 = arith.constant 1 : index
    %c0_335 = arith.constant 0 : index
    %c0_336 = arith.constant 0 : index
    %716 = vector.load %arg13[%c1_334, %c0_335, %c0_336] : memref<2x8x32xf32, #tpu.memory_space<vmem>>, vector<1x8x32xf32>
    %717 = vector.shape_cast %716 : vector<1x8x32xf32> to vector<8x32xf32>
    %718 = vector.shape_cast %712 : vector<8x32xf32> to vector<1x8x32xf32>
    tpu.vector_store %arg13[%c1_334, %c0_335, %c0_336], %718 {strides = array<i32>} : memref<2x8x32xf32, #tpu.memory_space<vmem>>, vector<1x8x32xf32>,
    %c8_i32_337 = arith.constant 8 : i32
    %c0_i32_338 = arith.constant 0 : i32
    %719 = arith.cmpi eq, %arg0, %c0_i32_338 : i32
    %720 = arith.extui %719 : i1 to i32
    %c0_i32_339 = arith.constant 0 : i32
    %721 = arith.cmpi ne, %720, %c0_i32_339 : i32
    scf.if %721 {
      %c1_340 = arith.constant 1 : index
      %c0_341 = arith.constant 0 : index
      %c0_342 = arith.constant 0 : index
      %722 = vector.load %arg13[%c1_340, %c0_341, %c0_342] : memref<2x8x32xf32, #tpu.memory_space<vmem>>, vector<1x8x32xf32>
      %723 = vector.shape_cast %722 : vector<1x8x32xf32> to vector<8x32xf32>
      %724 = arith.truncf %723 : vector<8x32xf32> to vector<8x32xbf16>
      %c0_343 = arith.constant 0 : index
      %c0_344 = arith.constant 0 : index
      %725 = vector.load %arg8[%c0_343, %c0_344] : memref<32x1xbf16, #tpu.memory_space<vmem>>, vector<32x1xbf16>
      %cst_345 = arith.constant dense<0.000000e+00> : vector<8x1xf32>
      %726 = tpu.matmul %724, %725, %cst_345 {dimension_numbers = #tpu.dot_dimension_numbers<[1], [0], [0], [1], [0, 0, 1, 1], [], []>} : vector<8x32xbf16>, vector<32x1xbf16>, vector<8x1xf32> -> vector<8x1xf32>
      %c0_346 = arith.constant 0 : index
      %c0_347 = arith.constant 0 : index
      %727 = vector.load %arg9[%c0_346, %c0_347] : memref<1x1xf32, #tpu.memory_space<vmem>>, vector<1x1xf32>
      %728 = vector.broadcast %727 : vector<1x1xf32> to vector<8x1xf32>
      %729 = arith.addf %726, %728 : vector<8x1xf32>
      %730 = arith.negf %729 : vector<8x1xf32>
      %731 = math.exp %730 : vector<8x1xf32>
      %cst_348 = arith.constant 1.000000e+00 : f32
      %732 = vector.broadcast %cst_348 : f32 to vector<8x1xf32>
      %733 = arith.addf %732, %731 : vector<8x1xf32>
      %734 = arith.divf %732, %733 : vector<8x1xf32>
      %c0_349 = arith.constant 0 : index
      %c0_350 = arith.constant 0 : index
      %735 = vector.load %arg10[%c0_349, %c0_350] : memref<8x1xf32, #tpu.memory_space<vmem>>, vector<8x1xf32>
      tpu.vector_store %arg10[%c0_349, %c0_350], %734 {strides = array<i32>} : memref<8x1xf32, #tpu.memory_space<vmem>>, vector<8x1xf32>,
    } else {
    }
    return
  }
  func.func @transform_0(%arg0: i32) -> (i32, i32, i32) {
    %c0_i32 = arith.constant 0 : i32
    %c0_i32_0 = arith.constant 0 : i32
    %c0_i32_1 = arith.constant 0 : i32
    return %arg0, %c0_i32, %c0_i32_0 : i32, i32, i32
  }
  func.func @transform_1(%arg0: i32) -> (i32, i32) {
    %c0_i32 = arith.constant 0 : i32
    %c0_i32_0 = arith.constant 0 : i32
    %c0_i32_1 = arith.constant 0 : i32
    return %c0_i32, %c0_i32_0 : i32, i32
  }
  func.func @transform_2(%arg0: i32) -> (i32, i32) {
    %c0_i32 = arith.constant 0 : i32
    %c0_i32_0 = arith.constant 0 : i32
    %c0_i32_1 = arith.constant 0 : i32
    return %c0_i32, %c0_i32_0 : i32, i32
  }
  func.func @transform_3(%arg0: i32) -> (i32, i32) {
    %c0_i32 = arith.constant 0 : i32
    %c0_i32_0 = arith.constant 0 : i32
    %c0_i32_1 = arith.constant 0 : i32
    return %c0_i32, %c0_i32_0 : i32, i32
  }
  func.func @transform_4(%arg0: i32) -> (i32, i32) {
    %c0_i32 = arith.constant 0 : i32
    %c0_i32_0 = arith.constant 0 : i32
    %c0_i32_1 = arith.constant 0 : i32
    return %c0_i32, %c0_i32_0 : i32, i32
  }
  func.func @transform_5(%arg0: i32) -> (i32, i32) {
    %c0_i32 = arith.constant 0 : i32
    %c0_i32_0 = arith.constant 0 : i32
    %c0_i32_1 = arith.constant 0 : i32
    return %c0_i32, %c0_i32_0 : i32, i32
  }
  func.func @transform_6(%arg0: i32) -> (i32, i32) {
    %c0_i32 = arith.constant 0 : i32
    %c0_i32_0 = arith.constant 0 : i32
    %c0_i32_1 = arith.constant 0 : i32
    return %c0_i32, %c0_i32_0 : i32, i32
  }
  func.func @transform_7(%arg0: i32) -> (i32, i32) {
    %c0_i32 = arith.constant 0 : i32
    %c0_i32_0 = arith.constant 0 : i32
    %c0_i32_1 = arith.constant 0 : i32
    return %c0_i32, %c0_i32_0 : i32, i32
  }
  func.func @transform_8(%arg0: i32) -> (i32, i32) {
    %c0_i32 = arith.constant 0 : i32
    %c0_i32_0 = arith.constant 0 : i32
    %c0_i32_1 = arith.constant 0 : i32
    return %c0_i32, %c0_i32_0 : i32, i32
  }
  func.func @transform_9(%arg0: i32) -> (i32, i32) {
    %c0_i32 = arith.constant 0 : i32
    %c0_i32_0 = arith.constant 0 : i32
    %c0_i32_1 = arith.constant 0 : i32
    return %c0_i32, %c0_i32_0 : i32, i32
  }
}

</mosaic_0001>

<bundles_post_ra>
// kernel: lstm_classifier_forward.1
= control target key start
LH: loop header
LB: loop body
LE: loop exit
PB: predicated region body
PF: predicated region fallthrough
CT: control target
= control target key end

     0   :  { %vm39_vm0 = vcmask 261120   ;;  %v1816_v2 = vmov 0.0   ;;  %vm86_vm1 = vcmask 130048   ;;  %s1817_s17 = smov 64   ;;  %s1818_s18 = smov 32   ;;  %s2220_s1 = inlined_call_operand.vmem [shape: bf16[16,128], index: 1, kind: input, shape index: {}]   ;;  %s2221_s2 = inlined_call_operand.vmem [shape: bf16[32,128], index: 2, kind: input, shape index: {}]   ;;  %s2222_s0 = inlined_call_operand.vmem [shape: bf16[8,8,16], index: 0, kind: input, shape index: {}]   ;;  %s2223_s3 = inlined_call_operand.vmem [shape: f32[1,128], index: 3, kind: input, shape index: {}]   ;;  %s2224_s4 = inlined_call_operand.vmem [shape: bf16[32,128], index: 4, kind: input, shape index: {}]   ;;  %s2225_s6 = inlined_call_operand.vmem [shape: f32[1,128], index: 6, kind: input, shape index: {}]   ;;  %s2226_s5 = inlined_call_operand.vmem [shape: bf16[32,128], index: 5, kind: input, shape index: {}]   ;;  %s2227_s7 = inlined_call_operand.vmem [shape: bf16[32,1], index: 7, kind: input, shape index: {}]   ;;  %s2228_s8 = inlined_call_operand.<no memory space> [shape: f32[1,1], index: 8, kind: input, shape index: {}]   ;;  %s2229_s9 = inlined_call_operand.vmem [shape: f32[8,1], index: 9, kind: output, shape index: {}]  }
   0x1   :  { %v1663_v0 = vld [vmem:[%s2220_s1] sm:$0xff]  ;;  %v1876_v1 = vld [vmem:[%s2221_s2 + $0x8] sm:$0xff]  ;;  %40 = vst.msk [vmem:[#allocation4] sm:$0xff] %vm39_vm0, %v1816_v2  ;;  %s1819_s19 = smov 96  }
   0x2   :  { %v1659_v3 = vld [vmem:[%s2222_s0] sm:$0xff]  ;;  %41 = vst.msk [vmem:[#allocation4 + $0x8] sm:$0xff] %vm39_vm0, %v1816_v2  ;;  %106 = vmatpush.bf16.msra.mxu0 %v1663_v0  ;;  %165 = vmatpush.bf16.msra.mxu1 %v1876_v1 }
   0x3   :  { %v1889_v4 = vld [vmem:[%s2221_s2] sm:$0xff]  ;;  %42 = vst.msk [vmem:[#allocation5] sm:$0xff] %vm39_vm0, %v1816_v2  ;;  %245 = vmatpush.bf16.msra.mxu2 %v1876_v1  ;;  %325 = vmatpush.bf16.msra.mxu3 %v1876_v1 }
   0x4   :  { %43 = vst.msk [vmem:[#allocation5 + $0x8] sm:$0xff] %vm39_vm0, %v1816_v2  ;;  %v1913_v7 = vld [vmem:[%s2223_s3] ss:$0 sm:$0xff] }
   0x5   :  { %1569 = vmatmul.msk.bf16.vlgmr.msra.gmra.mxu0 %vm86_vm1, %v1659_v3 }
   0x6   :  { %166 = vmatpush.bf16.msra.mxu1 %v1889_v4 }
   0x7   :  { %246 = vmatpush.bf16.msra.mxu2 %v1889_v4  ;;  %326 = vmatpush.bf16.msra.mxu3 %v1889_v4 }
   0x8   :  { %v141_v5 = vld [vmem:[#allocation4] sm:$0xff] }
   0x9   :  { %v142_v6 = vpack.c.bf16 %v141_v5, %v141_v5 }
   0xa   :  { %405 = vmatpush.bf16.msrb.mxu1 %v1876_v1  ;;  %v193_v14 = vld [vmem:[#allocation5] sm:$0xff] }
   0xb   :  { %485 = vmatpush.bf16.msrb.mxu2 %v1876_v1  ;;  %565 = vmatpush.bf16.msrb.mxu3 %v1876_v1 }
   0xc   :  { %1581 = vmatmul.msk.bf16.vlgmr.msra.gmra.mxu1 %vm39_vm0, %v142_v6 }
   0xe   :  { %406 = vmatpush.bf16.msrb.mxu1 %v1889_v4 }
   0xf   :  { %486 = vmatpush.bf16.msrb.mxu2 %v1889_v4  ;;  %566 = vmatpush.bf16.msrb.mxu3 %v1889_v4 }
  0x12   :  { %645 = vmatpush.bf16.msra.mxu1 %v1876_v1 }
  0x16   :  { %646 = vmatpush.bf16.msra.mxu1 %v1889_v4 }
  0x82   :  { %v108_v8 = vpop.f32.mrf.mxu0 }
  0x83   :  { %v109_v9 = vadd.f32 %v1913_v7, %v108_v8 }
  0x89   :  { %v168_v10 = vpop.f32.mrf.mxu1 }
  0x8a   :  { %v172_v11 = vadd.f32 %v168_v10, %v109_v9  ;;  %v110_v42 = vpop.f32.mrf.mxu0  ;;  %v1660_v10 = vld [vmem:[%s2222_s0 + $0x8] sm:$0xff] }
  0x8b   :  { %v111_v43 = vadd.f32 %v1913_v7, %v110_v42  ;;  %1570 = vmatmul.msk.bf16.gmra.mxu0 %vm86_vm1, %v1660_v10 }
  0x8c   :  { %1683 = vtanh.f32 %v172_v11  ;;  %v1582_v15 = vmul.f32 -1.442695, %v172_v11 }
  0x8e   :  { %1685 = vpow2.f32 %v1582_v15 }
  0x91   :  { %v170_v12 = vpop.f32.mrf.mxu1 }
  0x92   :  { %v1684_v13 = vpop.eup %1683 }
  0x93   :  { %200 = vrot.lane.b32.xlu0 %v1684_v13, %s1817_s17 }
  0x94   :  { %v1686_v16 = vpop.eup %1685 }
  0x95   :  { %v176_v17 = vadd.f32 1.0, %v1686_v16 }
  0x97   :  { %1687 = vrcp.f32 %v176_v17  ;;  %v188_v23 = vand.u32 2147483648, %v176_v17  ;;  %vm182_vm3 = vweird.f32 %v176_v17  ;;  %v186_v24 = vand.u32 2147483647, %v176_v17 }
  0x99   :  { %v189_v26 = vor.u32 1.1754944e-38, %v188_v23  ;;  %vm187_vm5 = vcmp.eq.f32.partialorder %v186_v24, 8.507059e+37 }
  0x9b   :  { %195 = vrot.lane.b32.xlu0 %v193_v14, %s1818_s18 }
  0x9d   :  { %v1688_v18 = vpop.eup %1687 }
  0x9e   :  { %v178_v19 = vmul.f32 %v1688_v18, %v176_v17  ;;  %vm183_vm2 = vweird.f32 %v1688_v18 }
  0x9f   :  { %vm184_vm4 = vmor %vm182_vm3, %vm183_vm2 }
  0xa0   :  { %v179_v20 = vsub.f32 1.0, %v178_v19 }
  0xa2   :  { %v180_v21 = vmul.f32 %v1688_v18, %v179_v20 }
  0xa4   :  { %v181_v22 = vadd.f32 %v1688_v18, %v180_v21 }
  0xa6   :  { %v185_v25 = vsel %vm184_vm4, %v1688_v18, %v181_v22 }
  0xa7   :  { %v190_v28 = vsel %vm187_vm5, %v189_v26, %v185_v25 }
 0x105   :  { %v201_v27 = vpop.permute.xlu0 %200 }
 0x106   :  { %v203_v29 = vmul.f32 %v201_v27, %v190_v28 }
 0x108   :  { %205 = vrot.lane.b32.xlu1 %v203_v29, %s1818_s18  ;;  %v113_v14 = vpop.f32.mrf.mxu0 }
 0x109   :  { %v114_v15 = vadd.f32 %v1913_v7, %v113_v14 }
 0x10d   :  { %v196_v30 = vpop.permute.xlu0 %195 }
 0x10e   :  { %v198_v31 = vmul.f32 %v196_v30, %v190_v28 }
 0x17a   :  { %v206_v32 = vpop.permute.xlu1 %205 }
 0x17b   :  { %v208_v33 = vadd.f32 %v206_v32, %v198_v31 }
 0x17d   :  { %1689 = vtanh.f32 %v208_v33 }
 0x183   :  { %v1690_v34 = vpop.eup %1689 }
 0x184   :  { %211 = vrot.lane.b32.xlu1 %v1690_v34, %s1817_s17 }
 0x1f6   :  { %v212_v35 = vpop.permute.xlu1 %211 }
 0x1f7   :  { %v1920_v36 = vmul.f32 %v212_v35, %v190_v28 }
 0x1f9   :  { %221 = vrot.lane.b32.xlu2 %v1920_v36, %s1818_s18 }
 0x201   :  { %216 = vrot.lane.b32.xlu2 %v208_v33, %s1819_s19 }
 0x253   :  { %v222_v37 = vpop.permute.xlu2 %221 }
 0x254   :  { %224 = vst.msk [vmem:[#allocation4] sm:$0xff] %vm39_vm0, %v222_v37 }
 0x25b   :  { %v217_v38 = vpop.permute.xlu2 %216  ;;  %v234_v39 = vld [vmem:[#allocation4] sm:$0xff] }
 0x25c   :  { %219 = vst.msk [vmem:[#allocation5] sm:$0xff] %vm39_vm0, %v217_v38  ;;  %v235_v40 = vpack.c.bf16 %v234_v39, %v234_v39 }
 0x25e   :  { %1583 = vmatmul.msk.bf16.vlgmr.msra.gmra.mxu2 %vm39_vm0, %v235_v40 }
 0x25f   :  { %725 = vmatpush.bf16.msra.mxu2 %v1876_v1 }
 0x263   :  { %v273_v41 = vld [vmem:[#allocation5] sm:$0xff]  ;;  %726 = vmatpush.bf16.msra.mxu2 %v1889_v4 }
 0x264   :  { %275 = vrot.lane.b32.xlu1 %v273_v41, %s1818_s18 }
 0x2d6   :  { %v276_v63 = vpop.permute.xlu1 %275 }
 0x2e1   :  { %v248_v44 = vpop.f32.mrf.mxu2 }
 0x2e2   :  { %v252_v45 = vadd.f32 %v248_v44, %v111_v43 }
 0x2e4   :  { %1691 = vtanh.f32 %v252_v45  ;;  %v1584_v48 = vmul.f32 -1.442695, %v252_v45 }
 0x2e6   :  { %1693 = vpow2.f32 %v1584_v48  ;;  %v115_v48 = vpop.f32.mrf.mxu0 }
 0x2e9   :  { %v250_v46 = vpop.f32.mrf.mxu2 }
 0x2ea   :  { %v1692_v47 = vpop.eup %1691 }
 0x2eb   :  { %280 = vrot.lane.b32.xlu0 %v1692_v47, %s1817_s17 }
 0x2ec   :  { %v1694_v49 = vpop.eup %1693 }
 0x2ed   :  { %v256_v50 = vadd.f32 1.0, %v1694_v49  ;;  %v116_v49 = vadd.f32 %v1913_v7, %v115_v48 }
 0x2ef   :  { %1695 = vrcp.f32 %v256_v50  ;;  %v268_v56 = vand.u32 2147483648, %v256_v50  ;;  %vm262_vm7 = vweird.f32 %v256_v50  ;;  %v266_v57 = vand.u32 2147483647, %v256_v50 }
 0x2f1   :  { %v269_v59 = vor.u32 1.1754944e-38, %v268_v56  ;;  %vm267_vm9 = vcmp.eq.f32.partialorder %v266_v57, 8.507059e+37 }
 0x2f5   :  { %v1696_v51 = vpop.eup %1695 }
 0x2f6   :  { %v258_v52 = vmul.f32 %v1696_v51, %v256_v50  ;;  %vm263_vm6 = vweird.f32 %v1696_v51 }
 0x2f7   :  { %vm264_vm8 = vmor %vm262_vm7, %vm263_vm6 }
 0x2f8   :  { %v259_v53 = vsub.f32 1.0, %v258_v52 }
 0x2fa   :  { %v260_v54 = vmul.f32 %v1696_v51, %v259_v53 }
 0x2fc   :  { %v261_v55 = vadd.f32 %v1696_v51, %v260_v54 }
 0x2fe   :  { %v265_v58 = vsel %vm264_vm8, %v1696_v51, %v261_v55 }
 0x2ff   :  { %v270_v61 = vsel %vm267_vm9, %v269_v59, %v265_v58 }
 0x300   :  { %v278_v0 = vmul.f32 %v276_v63, %v270_v61 }
 0x35d   :  { %v281_v60 = vpop.permute.xlu0 %280 }
 0x35e   :  { %v283_v62 = vmul.f32 %v281_v60, %v270_v61 }
 0x360   :  { %285 = vrot.lane.b32.xlu2 %v283_v62, %s1818_s18 }
 0x3ba   :  { %v286_v1 = vpop.permute.xlu2 %285 }
 0x3bb   :  { %v288_v3 = vadd.f32 %v286_v1, %v278_v0 }
 0x3bd   :  { %1697 = vtanh.f32 %v288_v3  ;;  %296 = vrot.lane.b32.xlu2 %v288_v3, %s1819_s19 }
 0x3c3   :  { %v1698_v4 = vpop.eup %1697 }
 0x3c4   :  { %291 = vrot.lane.b32.xlu0 %v1698_v4, %s1817_s17 }
 0x417   :  { %v297_v5 = vpop.permute.xlu2 %296 }
 0x418   :  { %299 = vst.msk [vmem:[#allocation5] sm:$0xff] %vm39_vm0, %v297_v5 }
 0x41f   :  { %v353_v9 = vld [vmem:[#allocation5] sm:$0xff] }
 0x436   :  { %v292_v6 = vpop.permute.xlu0 %291 }
 0x437   :  { %v1937_v8 = vmul.f32 %v292_v6, %v270_v61 }
 0x439   :  { %301 = vrot.lane.b32.xlu1 %v1937_v8, %s1818_s18 }
 0x441   :  { %355 = vrot.lane.b32.xlu1 %v353_v9, %s1818_s18 }
 0x4ab   :  { %v302_v11 = vpop.permute.xlu1 %301 }
 0x4ac   :  { %304 = vst.msk [vmem:[#allocation4] sm:$0xff] %vm39_vm0, %v302_v11 }
 0x4b3   :  { %v314_v12 = vld [vmem:[#allocation4] sm:$0xff]  ;;  %v356_v35 = vpop.permute.xlu1 %355 }
 0x4b4   :  { %v315_v13 = vpack.c.bf16 %v314_v12, %v314_v12 }
 0x4b6   :  { %1585 = vmatmul.msk.bf16.vlgmr.msra.gmra.mxu3 %vm39_vm0, %v315_v13 }
 0x539   :  { %v328_v16 = vpop.f32.mrf.mxu3 }
 0x53a   :  { %v332_v17 = vadd.f32 %v328_v16, %v114_v15 }
 0x53c   :  { %1699 = vtanh.f32 %v332_v17  ;;  %v1586_v20 = vmul.f32 -1.442695, %v332_v17  ;;  %v1661_v17 = vld [vmem:[%s2222_s0 + $0x10] sm:$0xff] }
 0x53d   :  { %1571 = vmatmul.msk.bf16.gmra.mxu0 %vm86_vm1, %v1661_v17  ;;  %v225_v17 = vpack.c.bf16 %v1920_v36, %v1920_v36  ;;  %v1671_v36 = vld [vmem:[%s2224_s4 + $0x8] sm:$0xff] }
 0x53e   :  { %1701 = vpow2.f32 %v1586_v20  ;;  %858 = vmatpush.bf16.msra.mxu3 %v1671_v36 }
 0x541   :  { %v330_v18 = vpop.f32.mrf.mxu3 }
 0x542   :  { %v1700_v19 = vpop.eup %1699 }
 0x543   :  { %360 = vrot.lane.b32.xlu0 %v1700_v19, %s1817_s17 }
 0x544   :  { %v1702_v21 = vpop.eup %1701 }
 0x545   :  { %v336_v22 = vadd.f32 1.0, %v1702_v21 }
 0x547   :  { %1703 = vrcp.f32 %v336_v22  ;;  %v348_v28 = vand.u32 2147483648, %v336_v22  ;;  %vm342_vm11 = vweird.f32 %v336_v22  ;;  %v346_v29 = vand.u32 2147483647, %v336_v22 }
 0x549   :  { %v349_v31 = vor.u32 1.1754944e-38, %v348_v28  ;;  %vm347_vm13 = vcmp.eq.f32.partialorder %v346_v29, 8.507059e+37 }
 0x54d   :  { %v1704_v23 = vpop.eup %1703 }
 0x54e   :  { %v338_v24 = vmul.f32 %v1704_v23, %v336_v22  ;;  %vm343_vm10 = vweird.f32 %v1704_v23 }
 0x54f   :  { %vm344_vm12 = vmor %vm342_vm11, %vm343_vm10 }
 0x550   :  { %v339_v25 = vsub.f32 1.0, %v338_v24 }
 0x552   :  { %v340_v26 = vmul.f32 %v1704_v23, %v339_v25 }
 0x554   :  { %v341_v27 = vadd.f32 %v1704_v23, %v340_v26 }
 0x556   :  { %v345_v30 = vsel %vm344_vm12, %v1704_v23, %v341_v27  ;;  %vm230_vm12 = vcmask 257024  }
 0x557   :  { %v350_v33 = vsel %vm347_vm13, %v349_v31, %v345_v30 }
 0x558   :  { %v358_v37 = vmul.f32 %v356_v35, %v350_v33 }
 0x5b5   :  { %v361_v32 = vpop.permute.xlu0 %360 }
 0x5b6   :  { %v363_v34 = vmul.f32 %v361_v32, %v350_v33 }
 0x5b8   :  { %365 = vrot.lane.b32.xlu2 %v363_v34, %s1818_s18 }
 0x5ba   :  { %v118_v21 = vpop.f32.mrf.mxu0 }
 0x5bb   :  { %v119_v22 = vadd.f32 %v1913_v7, %v118_v21 }
 0x612   :  { %v366_v38 = vpop.permute.xlu2 %365 }
 0x613   :  { %v368_v39 = vadd.f32 %v366_v38, %v358_v37 }
 0x615   :  { %1705 = vtanh.f32 %v368_v39  ;;  %376 = vrot.lane.b32.xlu2 %v368_v39, %s1819_s19 }
 0x61b   :  { %v1706_v40 = vpop.eup %1705 }
 0x61c   :  { %371 = vrot.lane.b32.xlu0 %v1706_v40, %s1817_s17 }
 0x66f   :  { %v377_v41 = vpop.permute.xlu2 %376 }
 0x670   :  { %379 = vst.msk [vmem:[#allocation5] sm:$0xff] %vm39_vm0, %v377_v41 }
 0x677   :  { %v433_v44 = vld [vmem:[#allocation5] sm:$0xff] }
 0x68e   :  { %v372_v42 = vpop.permute.xlu0 %371 }
 0x68f   :  { %v1954_v43 = vmul.f32 %v372_v42, %v350_v33 }
 0x691   :  { %381 = vrot.lane.b32.xlu1 %v1954_v43, %s1818_s18 }
 0x699   :  { %435 = vrot.lane.b32.xlu1 %v433_v44, %s1818_s18 }
 0x703   :  { %v382_v45 = vpop.permute.xlu1 %381 }
 0x704   :  { %384 = vst.msk [vmem:[#allocation4] sm:$0xff] %vm39_vm0, %v382_v45 }
 0x70b   :  { %v394_v46 = vld [vmem:[#allocation4] sm:$0xff]  ;;  %v436_v6 = vpop.permute.xlu1 %435 }
 0x70c   :  { %v395_v47 = vpack.c.bf16 %v394_v46, %v394_v46 }
 0x70e   :  { %1587 = vmatmul.msk.bf16.vlgmr.msrb.gmra.mxu1 %vm39_vm0, %v395_v47 }
 0x78b   :  { %v408_v50 = vpop.f32.mrf.mxu1 }
 0x78c   :  { %v412_v51 = vadd.f32 %v408_v50, %v116_v49 }
 0x78e   :  { %1707 = vtanh.f32 %v412_v51  ;;  %v1588_v54 = vmul.f32 -1.442695, %v412_v51 }
 0x790   :  { %1709 = vpow2.f32 %v1588_v54 }
 0x793   :  { %v410_v52 = vpop.f32.mrf.mxu1 }
 0x794   :  { %v1708_v53 = vpop.eup %1707 }
 0x795   :  { %440 = vrot.lane.b32.xlu0 %v1708_v53, %s1817_s17 }
 0x796   :  { %v1710_v55 = vpop.eup %1709 }
 0x797   :  { %v416_v56 = vadd.f32 1.0, %v1710_v55 }
 0x799   :  { %1711 = vrcp.f32 %v416_v56  ;;  %v428_v62 = vand.u32 2147483648, %v416_v56  ;;  %vm422_vm15 = vweird.f32 %v416_v56  ;;  %v426_v63 = vand.u32 2147483647, %v416_v56 }
 0x79b   :  { %v429_v1 = vor.u32 1.1754944e-38, %v428_v62  ;;  %vm427_vm3 = vcmp.eq.f32.partialorder %v426_v63, 8.507059e+37 }
 0x79f   :  { %v1712_v57 = vpop.eup %1711 }
 0x7a0   :  { %v418_v58 = vmul.f32 %v1712_v57, %v416_v56  ;;  %vm423_vm14 = vweird.f32 %v1712_v57  ;;  %v120_v56 = vpop.f32.mrf.mxu0 }
 0x7a1   :  { %vm424_vm2 = vmor %vm422_vm15, %vm423_vm14 }
 0x7a2   :  { %v419_v59 = vsub.f32 1.0, %v418_v58 }
 0x7a4   :  { %v420_v60 = vmul.f32 %v1712_v57, %v419_v59 }
 0x7a6   :  { %v421_v61 = vadd.f32 %v1712_v57, %v420_v60 }
 0x7a8   :  { %v425_v0 = vsel %vm424_vm2, %v1712_v57, %v421_v61  ;;  %v121_v57 = vadd.f32 %v1913_v7, %v120_v56 }
 0x7a9   :  { %v430_v4 = vsel %vm427_vm3, %v429_v1, %v425_v0 }
 0x7aa   :  { %v438_v9 = vmul.f32 %v436_v6, %v430_v4 }
 0x807   :  { %v441_v3 = vpop.permute.xlu0 %440 }
 0x808   :  { %v443_v5 = vmul.f32 %v441_v3, %v430_v4 }
 0x80a   :  { %445 = vrot.lane.b32.xlu2 %v443_v5, %s1818_s18 }
 0x864   :  { %v446_v10 = vpop.permute.xlu2 %445 }
 0x865   :  { %v448_v11 = vadd.f32 %v446_v10, %v438_v9 }
 0x867   :  { %1713 = vtanh.f32 %v448_v11  ;;  %456 = vrot.lane.b32.xlu2 %v448_v11, %s1819_s19 }
 0x86d   :  { %v1714_v12 = vpop.eup %1713 }
 0x86e   :  { %451 = vrot.lane.b32.xlu0 %v1714_v12, %s1817_s17 }
 0x8c1   :  { %v457_v13 = vpop.permute.xlu2 %456 }
 0x8c2   :  { %459 = vst.msk [vmem:[#allocation5] sm:$0xff] %vm39_vm0, %v457_v13 }
 0x8c9   :  { %v513_v16 = vld [vmem:[#allocation5] sm:$0xff] }
 0x8e0   :  { %v452_v14 = vpop.permute.xlu0 %451 }
 0x8e1   :  { %v1967_v15 = vmul.f32 %v452_v14, %v430_v4 }
 0x8e3   :  { %461 = vrot.lane.b32.xlu1 %v1967_v15, %s1818_s18 }
 0x8eb   :  { %515 = vrot.lane.b32.xlu1 %v513_v16, %s1818_s18 }
 0x955   :  { %v462_v18 = vpop.permute.xlu1 %461 }
 0x956   :  { %464 = vst.msk [vmem:[#allocation4] sm:$0xff] %vm39_vm0, %v462_v18 }
 0x95d   :  { %v474_v19 = vld [vmem:[#allocation4] sm:$0xff]  ;;  %v516_v44 = vpop.permute.xlu1 %515 }
 0x95e   :  { %v475_v20 = vpack.c.bf16 %v474_v19, %v474_v19 }
 0x960   :  { %1589 = vmatmul.msk.bf16.vlgmr.msrb.gmra.mxu2 %vm39_vm0, %v475_v20 }
 0x9e3   :  { %v488_v23 = vpop.f32.mrf.mxu2 }
 0x9e4   :  { %v492_v24 = vadd.f32 %v488_v23, %v119_v22 }
 0x9e6   :  { %1715 = vtanh.f32 %v492_v24  ;;  %v1590_v27 = vmul.f32 -1.442695, %v492_v24  ;;  %v305_v24 = vpack.c.bf16 %v1937_v8, %v1937_v8 }
 0x9e8   :  { %1717 = vpow2.f32 %v1590_v27 }
 0x9eb   :  { %v490_v25 = vpop.f32.mrf.mxu2 }
 0x9ec   :  { %v1716_v26 = vpop.eup %1715  ;;  %v1670_v25 = vld [vmem:[%s2224_s4] sm:$0xff] }
 0x9ed   :  { %520 = vrot.lane.b32.xlu0 %v1716_v26, %s1817_s17  ;;  %859 = vmatpush.bf16.msra.mxu3 %v1670_v25 }
 0x9ee   :  { %v1718_v28 = vpop.eup %1717 }
 0x9ef   :  { %v496_v29 = vadd.f32 1.0, %v1718_v28 }
 0x9f1   :  { %1719 = vrcp.f32 %v496_v29  ;;  %v508_v35 = vand.u32 2147483648, %v496_v29  ;;  %vm502_vm5 = vweird.f32 %v496_v29  ;;  %v506_v37 = vand.u32 2147483647, %v496_v29 }
 0x9f3   :  { %v509_v39 = vor.u32 1.1754944e-38, %v508_v35  ;;  %vm507_vm7 = vcmp.eq.f32.partialorder %v506_v37, 8.507059e+37 }
 0x9f7   :  { %v1720_v30 = vpop.eup %1719 }
 0x9f8   :  { %v498_v31 = vmul.f32 %v1720_v30, %v496_v29  ;;  %vm503_vm4 = vweird.f32 %v1720_v30  ;;  %v1662_v29 = vld [vmem:[%s2222_s0 + $0x18] sm:$0xff] }
 0x9f9   :  { %vm504_vm6 = vmor %vm502_vm5, %vm503_vm4  ;;  %1572 = vmatmul.msk.bf16.gmra.mxu0 %vm86_vm1, %v1662_v29 }
 0x9fa   :  { %v499_v32 = vsub.f32 1.0, %v498_v31  ;;  %v2030_v31 = vld [vmem:[%s2226_s5] sm:$0xff] }
 0x9fc   :  { %v500_v33 = vmul.f32 %v1720_v30, %v499_v32 }
 0x9fe   :  { %v501_v34 = vadd.f32 %v1720_v30, %v500_v33 }
 0xa00   :  { %v505_v38 = vsel %vm504_vm6, %v1720_v30, %v501_v34  ;;  %v2022_v30 = vld [vmem:[%s2226_s5 + $0x8] sm:$0xff] }
 0xa01   :  { %v510_v41 = vsel %vm507_vm7, %v509_v39, %v505_v38  ;;  %918 = vmatpush.bf16.msrb.mxu1 %v2022_v30  ;;  %991 = vmatpush.bf16.msrb.mxu2 %v2022_v30  ;;  %v895_v38 = vld [vmem:[#allocation4 + $0x8] sm:$0xff] }
 0xa02   :  { %v518_v45 = vmul.f32 %v516_v44, %v510_v41  ;;  %1063 = vmatpush.bf16.msrb.mxu0 %v2022_v30  ;;  %v896_v39 = vpack.c.bf16 %v895_v38, %v895_v38 }
 0xa05   :  { %919 = vmatpush.bf16.msrb.mxu1 %v2030_v31  ;;  %992 = vmatpush.bf16.msrb.mxu2 %v2030_v31 }
 0xa06   :  { %1064 = vmatpush.bf16.msrb.mxu0 %v2030_v31 }
 0xa0a   :  { %1279 = vmatpush.bf16.msra.mxu0 %v2022_v30 }
 0xa0e   :  { %1280 = vmatpush.bf16.msra.mxu0 %v2030_v31 }
 0xa5f   :  { %v521_v40 = vpop.permute.xlu0 %520 }
 0xa60   :  { %v523_v42 = vmul.f32 %v521_v40, %v510_v41 }
 0xa62   :  { %525 = vrot.lane.b32.xlu2 %v523_v42, %s1818_s18 }
 0xa76   :  { %v123_v40 = vpop.f32.mrf.mxu0 }
 0xabc   :  { %v526_v46 = vpop.permute.xlu2 %525 }
 0xabd   :  { %v528_v47 = vadd.f32 %v526_v46, %v518_v45 }
 0xabf   :  { %1721 = vtanh.f32 %v528_v47  ;;  %536 = vrot.lane.b32.xlu2 %v528_v47, %s1819_s19  ;;  %v2051_v47 = vld [vmem:[%s2225_s6] ss:$0 sm:$0xff] }
 0xac5   :  { %v1722_v48 = vpop.eup %1721 }
 0xac6   :  { %531 = vrot.lane.b32.xlu0 %v1722_v48, %s1817_s17 }
 0xb19   :  { %v537_v49 = vpop.permute.xlu2 %536 }
 0xb1a   :  { %539 = vst.msk [vmem:[#allocation5] sm:$0xff] %vm39_vm0, %v537_v49 }
 0xb21   :  { %v593_v52 = vld [vmem:[#allocation5] sm:$0xff] }
 0xb38   :  { %v532_v50 = vpop.permute.xlu0 %531 }
 0xb39   :  { %v1984_v51 = vmul.f32 %v532_v50, %v510_v41  ;;  %v124_v41 = vadd.f32 %v1913_v7, %v123_v40 }
 0xb3b   :  { %541 = vrot.lane.b32.xlu1 %v1984_v51, %s1818_s18 }
 0xb43   :  { %595 = vrot.lane.b32.xlu1 %v593_v52, %s1818_s18 }
 0xbad   :  { %v542_v53 = vpop.permute.xlu1 %541 }
 0xbae   :  { %544 = vst.msk [vmem:[#allocation4] sm:$0xff] %vm39_vm0, %v542_v53 }
 0xbb5   :  { %v554_v54 = vld [vmem:[#allocation4] sm:$0xff]  ;;  %v596_v18 = vpop.permute.xlu1 %595 }
 0xbb6   :  { %v555_v55 = vpack.c.bf16 %v554_v54, %v554_v54  ;;  %v947_v54 = vld [vmem:[#allocation5 + $0x8] sm:$0xff] }
 0xbb8   :  { %1591 = vmatmul.msk.bf16.vlgmr.msrb.gmra.mxu3 %vm39_vm0, %v555_v55 }
 0xc3b   :  { %v568_v58 = vpop.f32.mrf.mxu3 }
 0xc3c   :  { %v572_v59 = vadd.f32 %v568_v58, %v121_v57 }
 0xc3e   :  { %1723 = vtanh.f32 %v572_v59  ;;  %v1592_v62 = vmul.f32 -1.442695, %v572_v59 }
 0xc40   :  { %1725 = vpow2.f32 %v1592_v62 }
 0xc43   :  { %v570_v60 = vpop.f32.mrf.mxu3 }
 0xc44   :  { %v1724_v61 = vpop.eup %1723 }
 0xc45   :  { %600 = vrot.lane.b32.xlu0 %v1724_v61, %s1817_s17 }
 0xc46   :  { %v1726_v63 = vpop.eup %1725 }
 0xc47   :  { %v576_v0 = vadd.f32 1.0, %v1726_v63 }
 0xc49   :  { %1727 = vrcp.f32 %v576_v0  ;;  %v588_v9 = vand.u32 2147483648, %v576_v0  ;;  %vm582_vm9 = vweird.f32 %v576_v0  ;;  %v586_v10 = vand.u32 2147483647, %v576_v0 }
 0xc4b   :  { %v589_v12 = vor.u32 1.1754944e-38, %v588_v9  ;;  %vm587_vm11 = vcmp.eq.f32.partialorder %v586_v10, 8.507059e+37 }
 0xc4f   :  { %v1728_v1 = vpop.eup %1727 }
 0xc50   :  { %v578_v3 = vmul.f32 %v1728_v1, %v576_v0  ;;  %vm583_vm8 = vweird.f32 %v1728_v1 }
 0xc51   :  { %vm584_vm10 = vmor %vm582_vm9, %vm583_vm8 }
 0xc52   :  { %v579_v4 = vsub.f32 1.0, %v578_v3 }
 0xc54   :  { %v580_v5 = vmul.f32 %v1728_v1, %v579_v4 }
 0xc56   :  { %v581_v6 = vadd.f32 %v1728_v1, %v580_v5 }
 0xc58   :  { %v585_v11 = vsel %vm584_vm10, %v1728_v1, %v581_v6 }
 0xc59   :  { %v590_v14 = vsel %vm587_vm11, %v589_v12, %v585_v11 }
 0xc5a   :  { %v598_v19 = vmul.f32 %v596_v18, %v590_v14 }
 0xcb7   :  { %v601_v13 = vpop.permute.xlu0 %600 }
 0xcb8   :  { %v603_v16 = vmul.f32 %v601_v13, %v590_v14 }
 0xcba   :  { %605 = vrot.lane.b32.xlu2 %v603_v16, %s1818_s18 }
 0xcc2   :  { %227 = vrot.lane.b32.xlu2 %v225_v17, %s1818_s18 }
 0xd14   :  { %v606_v20 = vpop.permute.xlu2 %605 }
 0xd15   :  { %v608_v21 = vadd.f32 %v606_v20, %v598_v19 }
 0xd17   :  { %1729 = vtanh.f32 %v608_v21 }
 0xd1c   :  { %v228_v22 = vpop.permute.xlu2 %227 }
 0xd1d   :  { %v1730_v23 = vpop.eup %1729  ;;  %231 = vst.msk [vmem:[#allocation3] sm:$0xf] %vm230_vm12, %v228_v22 }
 0xd1e   :  { %611 = vrot.lane.b32.xlu0 %v1730_v23, %s1817_s17 }
 0xd26   :  { %307 = vrot.lane.b32.xlu0 %v305_v24, %s1818_s18 }
 0xd90   :  { %v612_v26 = vpop.permute.xlu0 %611 }
 0xd91   :  { %v2008_v27 = vmul.f32 %v612_v26, %v590_v14 }
 0xd93   :  { %621 = vrot.lane.b32.xlu1 %v2008_v27, %s1818_s18 }
 0xd98   :  { %v308_v28 = vpop.permute.xlu0 %307 }
 0xd99   :  { %311 = vst.msk [vmem:[#allocation3 + $0x4] sm:$0xf] %vm230_vm12, %v308_v28 }
 0xd9b   :  { %616 = vrot.lane.b32.xlu1 %v608_v21, %s1819_s19 }
 0xda0   :  { %v1666_v8 = vld [vmem:[#allocation3] sm:$0xff] }
 0xda1   :  { %1621 = vmatmul.msk.bf16.vlgmr.msra.gmra.mxu3 %vm39_vm0, %v1666_v8 }
 0xe05   :  { %v622_v32 = vpop.permute.xlu1 %621 }
 0xe06   :  { %624 = vst.msk [vmem:[#allocation4] sm:$0xff] %vm39_vm0, %v622_v32 }
 0xe0d   :  { %v617_v33 = vpop.permute.xlu1 %616  ;;  %v634_v34 = vld [vmem:[#allocation4] sm:$0xff] }
 0xe0e   :  { %619 = vst.msk [vmem:[#allocation5] sm:$0xff] %vm39_vm0, %v617_v33  ;;  %v635_v35 = vpack.c.bf16 %v634_v34, %v634_v34 }
 0xe10   :  { %1593 = vmatmul.msk.bf16.vlgmr.msra.gmra.mxu1 %vm39_vm0, %v635_v35 }
 0xe11   :  { %1135 = vmatpush.bf16.msra.mxu1 %v2022_v30 }
 0xe15   :  { %v673_v37 = vld [vmem:[#allocation5] sm:$0xff]  ;;  %1136 = vmatpush.bf16.msra.mxu1 %v2030_v31 }
 0xe16   :  { %675 = vrot.lane.b32.xlu1 %v673_v37, %s1818_s18 }
 0xe20   :  { %1633 = vmatmul.msk.bf16.vlgmr.msrb.gmra.mxu1 %vm39_vm0, %v896_v39 }
 0xe21   :  { %1351 = vmatpush.bf16.msrb.mxu1 %v2022_v30 }
 0xe24   :  { %v861_v48 = vpop.f32.mrf.mxu3 }
 0xe25   :  { %1352 = vmatpush.bf16.msrb.mxu1 %v2030_v31  ;;  %v862_v49 = vadd.f32 %v2051_v47, %v861_v48 }
 0xe88   :  { %v676_v36 = vpop.permute.xlu1 %675 }
 0xe8d   :  { %v648_v42 = vpop.f32.mrf.mxu1 }
 0xe8e   :  { %v652_v44 = vadd.f32 %v648_v42, %v124_v41 }
 0xe90   :  { %1731 = vtanh.f32 %v652_v44  ;;  %v1594_v55 = vmul.f32 -1.442695, %v652_v44  ;;  %v385_v44 = vpack.c.bf16 %v1954_v43, %v1954_v43 }
 0xe95   :  { %v650_v45 = vpop.f32.mrf.mxu1 }
 0xe96   :  { %v1732_v46 = vpop.eup %1731 }
 0xe97   :  { %680 = vrot.lane.b32.xlu2 %v1732_v46, %s1817_s17 }
 0xe9d   :  { %v921_v50 = vpop.f32.mrf.mxu1 }
 0xe9e   :  { %v925_v52 = vadd.f32 %v921_v50, %v862_v49 }
 0xea0   :  { %1733 = vtanh.f32 %v925_v52  ;;  %v1634_v0 = vmul.f32 -1.442695, %v925_v52 }
 0xea1   :  { %1735 = vpow2.f32 %v1594_v55  ;;  %v863_v55 = vpop.f32.mrf.mxu3 }
 0xea5   :  { %v923_v53 = vpop.f32.mrf.mxu1 }
 0xea6   :  { %v1734_v7 = vpop.eup %1733 }
 0xea7   :  { %954 = vrot.lane.b32.xlu0 %v1734_v7, %s1817_s17  ;;  %v1736_v56 = vpop.eup %1735 }
 0xea8   :  { %v656_v57 = vadd.f32 1.0, %v1736_v56  ;;  %v864_v56 = vadd.f32 %v2051_v47, %v863_v55 }
 0xeaa   :  { %1737 = vrcp.f32 %v656_v57  ;;  %v668_v63 = vand.u32 2147483648, %v656_v57  ;;  %vm662_vm13 = vweird.f32 %v656_v57  ;;  %v666_v1 = vand.u32 2147483647, %v656_v57 }
 0xeab   :  { %1739 = vpow2.f32 %v1634_v0 }
 0xeac   :  { %v669_v4 = vor.u32 1.1754944e-38, %v668_v63  ;;  %vm667_vm15 = vcmp.eq.f32.partialorder %v666_v1, 8.507059e+37 }
 0xeaf   :  { %949 = vrot.lane.b32.xlu0 %v947_v54, %s1818_s18 }
 0xeb0   :  { %v1738_v58 = vpop.eup %1737 }
 0xeb1   :  { %v658_v59 = vmul.f32 %v1738_v58, %v656_v57  ;;  %vm663_vm1 = vweird.f32 %v1738_v58  ;;  %v1740_v10 = vpop.eup %1739 }
 0xeb2   :  { %vm664_vm14 = vmor %vm662_vm13, %vm663_vm1  ;;  %v929_v11 = vadd.f32 1.0, %v1740_v10 }
 0xeb3   :  { %v659_v60 = vsub.f32 1.0, %v658_v59 }
 0xeb4   :  { %1741 = vrcp.f32 %v929_v11  ;;  %v941_v18 = vand.u32 2147483648, %v929_v11  ;;  %vm935_vm3 = vweird.f32 %v929_v11  ;;  %v939_v19 = vand.u32 2147483647, %v929_v11 }
 0xeb5   :  { %v660_v61 = vmul.f32 %v1738_v58, %v659_v60 }
 0xeb6   :  { %v942_v21 = vor.u32 1.1754944e-38, %v941_v18  ;;  %vm940_vm5 = vcmp.eq.f32.partialorder %v939_v19, 8.507059e+37 }
 0xeb7   :  { %v661_v62 = vadd.f32 %v1738_v58, %v660_v61 }
 0xeb9   :  { %v665_v3 = vsel %vm664_vm14, %v1738_v58, %v661_v62 }
 0xeba   :  { %v670_v5 = vsel %vm667_vm15, %v669_v4, %v665_v3  ;;  %v1742_v12 = vpop.eup %1741 }
 0xebb   :  { %v931_v13 = vmul.f32 %v1742_v12, %v929_v11  ;;  %vm936_vm2 = vweird.f32 %v1742_v12  ;;  %v678_v25 = vmul.f32 %v676_v36, %v670_v5 }
 0xebc   :  { %vm937_vm4 = vmor %vm935_vm3, %vm936_vm2 }
 0xebd   :  { %v932_v14 = vsub.f32 1.0, %v931_v13  ;;  %v465_v13 = vpack.c.bf16 %v1967_v15, %v1967_v15 }
 0xebf   :  { %v933_v16 = vmul.f32 %v1742_v12, %v932_v14 }
 0xec1   :  { %v934_v17 = vadd.f32 %v1742_v12, %v933_v16 }
 0xec3   :  { %v938_v20 = vsel %vm937_vm4, %v1742_v12, %v934_v17 }
 0xec4   :  { %v943_v23 = vsel %vm940_vm5, %v942_v21, %v938_v20 }
 0xef1   :  { %v681_v6 = vpop.permute.xlu2 %680 }
 0xef2   :  { %v683_v9 = vmul.f32 %v681_v6, %v670_v5 }
 0xef4   :  { %685 = vrot.lane.b32.xlu2 %v683_v9, %s1818_s18 }
 0xf19   :  { %v955_v22 = vpop.permute.xlu0 %954 }
 0xf1a   :  { %v957_v24 = vmul.f32 %v955_v22, %v943_v23 }
 0xf1c   :  { %959 = vrot.lane.b32.xlu1 %v957_v24, %s1818_s18 }
 0xf21   :  { %v950_v29 = vpop.permute.xlu0 %949 }
 0xf22   :  { %v952_v32 = vmul.f32 %v950_v29, %v943_v23 }
 0xf4e   :  { %v686_v26 = vpop.permute.xlu2 %685 }
 0xf4f   :  { %v2058_v28 = vadd.f32 %v686_v26, %v678_v25  ;;  %v2100_v26 = vpop.f32.mrf.mxu0 }
 0xf51   :  { %1743 = vtanh.f32 %v2058_v28 }
 0xf57   :  { %v1744_v8 = vpop.eup %1743 }
 0xf58   :  { %691 = vrot.lane.b32.xlu2 %v1744_v8, %s1817_s17 }
 0xf8e   :  { %v960_v33 = vpop.permute.xlu1 %959 }
 0xf8f   :  { %v962_v34 = vadd.f32 %v960_v33, %v952_v32 }
 0xf91   :  { %1745 = vtanh.f32 %v962_v34 }
 0xf97   :  { %v1746_v35 = vpop.eup %1745 }
 0xf98   :  { %965 = vrot.lane.b32.xlu0 %v1746_v35, %s1817_s17 }
 0xfa0   :  { %970 = vrot.lane.b32.xlu0 %v962_v34, %s1819_s19 }
 0xfb2   :  { %v692_v37 = vpop.permute.xlu2 %691 }
 0xfb3   :  { %v2064_v38 = vmul.f32 %v692_v37, %v670_v5 }
 0xfb5   :  { %701 = vrot.lane.b32.xlu1 %v2064_v38, %s1818_s18 }
0x100a   :  { %v966_v39 = vpop.permute.xlu0 %965 }
0x100b   :  { %v968_v40 = vmul.f32 %v966_v39, %v943_v23 }
0x100d   :  { %975 = vrot.lane.b32.xlu2 %v968_v40, %s1818_s18 }
0x1012   :  { %v971_v41 = vpop.permute.xlu0 %970 }
0x1013   :  { %973 = vst.msk [vmem:[#allocation5 + $0x8] sm:$0xff] %vm39_vm0, %v971_v41 }
0x101a   :  { %v1019_v42 = vld [vmem:[#allocation5 + $0x8] sm:$0xff] }
0x101b   :  { %1021 = vrot.lane.b32.xlu2 %v1019_v42, %s1818_s18 }
0x1023   :  { %387 = vrot.lane.b32.xlu2 %v385_v44, %s1818_s18 }
0x1027   :  { %v702_v45 = vpop.permute.xlu1 %701 }
0x1028   :  { %704 = vst.msk [vmem:[#allocation4] sm:$0xff] %vm39_vm0, %v702_v45 }
0x102f   :  { %v714_v46 = vld [vmem:[#allocation4] sm:$0xff] }
0x1030   :  { %v715_v48 = vpack.c.bf16 %v714_v46, %v714_v46 }
0x1032   :  { %1595 = vmatmul.msk.bf16.vlgmr.msra.gmra.mxu2 %vm39_vm0, %v715_v48 }
0x1033   :  { %1207 = vmatpush.bf16.msra.mxu2 %v2022_v30 }
0x1037   :  { %1208 = vmatpush.bf16.msra.mxu2 %v2030_v31 }
0x1067   :  { %v976_v49 = vpop.permute.xlu2 %975 }
0x1068   :  { %978 = vst.msk [vmem:[#allocation4 + $0x8] sm:$0xff] %vm39_vm0, %v976_v49 }
0x106f   :  { %v980_v50 = vld [vmem:[#allocation4 + $0x8] sm:$0xff] }
0x1070   :  { %v981_v52 = vpack.c.bf16 %v980_v50, %v980_v50 }
0x1072   :  { %1635 = vmatmul.msk.bf16.vlgmr.msrb.gmra.mxu2 %vm39_vm0, %v981_v52 }
0x1073   :  { %1423 = vmatpush.bf16.msrb.mxu2 %v2022_v30 }
0x1075   :  { %v1022_v43 = vpop.permute.xlu2 %1021 }
0x1077   :  { %1424 = vmatpush.bf16.msrb.mxu2 %v2030_v31 }
0x107d   :  { %v388_v53 = vpop.permute.xlu2 %387 }
0x107e   :  { %391 = vst.msk [vmem:[#allocation3 + $0x8] sm:$0xf] %vm230_vm12, %v388_v53 }
0x10b5   :  { %v2083_v7 = vpop.f32.mrf.mxu2 }
0x10bd   :  { %v730_v54 = vpop.f32.mrf.mxu2 }
0x10f5   :  { %v994_v57 = vpop.f32.mrf.mxu2 }
0x10f6   :  { %v998_v58 = vadd.f32 %v994_v57, %v864_v56 }
0x10f8   :  { %1747 = vtanh.f32 %v998_v58  ;;  %v1636_v30 = vmul.f32 -1.442695, %v998_v58 }
0x10fa   :  { %1749 = vpow2.f32 %v1636_v30 }
0x10fd   :  { %v996_v59 = vpop.f32.mrf.mxu2 }
0x10fe   :  { %v1748_v60 = vpop.eup %1747 }
0x10ff   :  { %1026 = vrot.lane.b32.xlu1 %v1748_v60, %s1817_s17 }
0x1100   :  { %v1750_v61 = vpop.eup %1749 }
0x1101   :  { %v1002_v31 = vadd.f32 1.0, %v1750_v61 }
0x1103   :  { %1751 = vrcp.f32 %v1002_v31  ;;  %v1014_v4 = vand.u32 2147483648, %v1002_v31  ;;  %vm1008_vm7 = vweird.f32 %v1002_v31  ;;  %v1012_v5 = vand.u32 2147483647, %v1002_v31 }
0x1105   :  { %v1015_v9 = vor.u32 1.1754944e-38, %v1014_v4  ;;  %vm1013_vm9 = vcmp.eq.f32.partialorder %v1012_v5, 8.507059e+37 }
0x1109   :  { %v1752_v62 = vpop.eup %1751 }
0x110a   :  { %v1004_v63 = vmul.f32 %v1752_v62, %v1002_v31  ;;  %vm1009_vm6 = vweird.f32 %v1752_v62 }
0x110b   :  { %vm1010_vm8 = vmor %vm1008_vm7, %vm1009_vm6 }
0x110c   :  { %v1005_v0 = vsub.f32 1.0, %v1004_v63 }
0x110e   :  { %v1006_v1 = vmul.f32 %v1752_v62, %v1005_v0 }
0x1110   :  { %v1007_v3 = vadd.f32 %v1752_v62, %v1006_v1 }
0x1112   :  { %v1011_v6 = vsel %vm1010_vm8, %v1752_v62, %v1007_v3  ;;  %v545_v62 = vpack.c.bf16 %v1984_v51, %v1984_v51 }
0x1113   :  { %v1016_v11 = vsel %vm1013_vm9, %v1015_v9, %v1011_v6 }
0x1114   :  { %v1024_v14 = vmul.f32 %v1022_v43, %v1016_v11 }
0x1171   :  { %v1027_v10 = vpop.permute.xlu1 %1026 }
0x1172   :  { %v1029_v12 = vmul.f32 %v1027_v10, %v1016_v11 }
0x1174   :  { %1031 = vrot.lane.b32.xlu0 %v1029_v12, %s1818_s18 }
0x117c   :  { %467 = vrot.lane.b32.xlu0 %v465_v13, %s1818_s18 }
0x11e6   :  { %v1032_v16 = vpop.permute.xlu0 %1031 }
0x11e7   :  { %v1034_v17 = vadd.f32 %v1032_v16, %v1024_v14 }
0x11e9   :  { %1753 = vtanh.f32 %v1034_v17  ;;  %1042 = vrot.lane.b32.xlu2 %v1034_v17, %s1819_s19 }
0x11ee   :  { %v468_v18 = vpop.permute.xlu0 %467 }
0x11ef   :  { %v1754_v19 = vpop.eup %1753  ;;  %471 = vst.msk [vmem:[#allocation3 + $0xc] sm:$0xf] %vm230_vm12, %v468_v18 }
0x11f0   :  { %1037 = vrot.lane.b32.xlu1 %v1754_v19, %s1817_s17 }
0x11f6   :  { %v1667_v20 = vld [vmem:[#allocation3 + $0x8] sm:$0xff] }
0x11f7   :  { %1622 = vmatmul.msk.bf16.gmra.mxu3 %vm39_vm0, %v1667_v20 }
0x1243   :  { %v1043_v21 = vpop.permute.xlu2 %1042 }
0x1244   :  { %1045 = vst.msk [vmem:[#allocation5 + $0x8] sm:$0xff] %vm39_vm0, %v1043_v21 }
0x124b   :  { %v1091_v23 = vld [vmem:[#allocation5 + $0x8] sm:$0xff] }
0x1262   :  { %v1038_v15 = vpop.permute.xlu1 %1037 }
0x1263   :  { %v1040_v22 = vmul.f32 %v1038_v15, %v1016_v11 }
0x1265   :  { %1047 = vrot.lane.b32.xlu1 %v1040_v22, %s1818_s18 }
0x126d   :  { %1093 = vrot.lane.b32.xlu1 %v1091_v23, %s1818_s18 }
0x127a   :  { %v866_v8 = vpop.f32.mrf.mxu3 }
0x127b   :  { %v867_v29 = vadd.f32 %v2051_v47, %v866_v8  ;;  %v625_v8 = vpack.c.bf16 %v2008_v27, %v2008_v27 }
0x1282   :  { %v868_v5 = vpop.f32.mrf.mxu3 }
0x1283   :  { %v869_v6 = vadd.f32 %v2051_v47, %v868_v5 }
0x12d7   :  { %v1048_v24 = vpop.permute.xlu1 %1047 }
0x12d8   :  { %1050 = vst.msk [vmem:[#allocation4 + $0x8] sm:$0xff] %vm39_vm0, %v1048_v24 }
0x12df   :  { %v1052_v36 = vld [vmem:[#allocation4 + $0x8] sm:$0xff]  ;;  %v1094_v55 = vpop.permute.xlu1 %1093 }
0x12e0   :  { %v1053_v25 = vpack.c.bf16 %v1052_v36, %v1052_v36 }
0x12e2   :  { %1637 = vmatmul.msk.bf16.vlgmr.msrb.gmra.mxu0 %vm39_vm0, %v1053_v25 }
0x135f   :  { %v1066_v32 = vpop.f32.mrf.mxu0 }
0x1360   :  { %v1070_v33 = vadd.f32 %v1066_v32, %v867_v29 }
0x1362   :  { %1755 = vtanh.f32 %v1070_v33  ;;  %v1638_v37 = vmul.f32 -1.442695, %v1070_v33 }
0x1364   :  { %1757 = vpow2.f32 %v1638_v37 }
0x1367   :  { %v1068_v34 = vpop.f32.mrf.mxu0 }
0x1368   :  { %v1756_v35 = vpop.eup %1755 }
0x1369   :  { %1098 = vrot.lane.b32.xlu0 %v1756_v35, %s1817_s17 }
0x136a   :  { %v1758_v39 = vpop.eup %1757 }
0x136b   :  { %v1074_v40 = vadd.f32 1.0, %v1758_v39 }
0x136d   :  { %1759 = vrcp.f32 %v1074_v40  ;;  %v1086_v48 = vand.u32 2147483648, %v1074_v40  ;;  %vm1080_vm11 = vweird.f32 %v1074_v40  ;;  %v1084_v49 = vand.u32 2147483647, %v1074_v40 }
0x136f   :  { %v1087_v52 = vor.u32 1.1754944e-38, %v1086_v48  ;;  %vm1085_vm13 = vcmp.eq.f32.partialorder %v1084_v49, 8.507059e+37 }
0x1373   :  { %v1760_v41 = vpop.eup %1759 }
0x1374   :  { %v1076_v42 = vmul.f32 %v1760_v41, %v1074_v40  ;;  %vm1081_vm10 = vweird.f32 %v1760_v41 }
0x1375   :  { %vm1082_vm1 = vmor %vm1080_vm11, %vm1081_vm10 }
0x1376   :  { %v1077_v44 = vsub.f32 1.0, %v1076_v42 }
0x1378   :  { %v1078_v45 = vmul.f32 %v1760_v41, %v1077_v44 }
0x137a   :  { %v1079_v46 = vadd.f32 %v1760_v41, %v1078_v45 }
0x137c   :  { %v1083_v50 = vsel %vm1082_vm1, %v1760_v41, %v1079_v46 }
0x137d   :  { %v1088_v53 = vsel %vm1085_vm13, %v1087_v52, %v1083_v50 }
0x137e   :  { %v1096_v56 = vmul.f32 %v1094_v55, %v1088_v53 }
0x13db   :  { %v1099_v43 = vpop.permute.xlu0 %1098 }
0x13dc   :  { %v1101_v54 = vmul.f32 %v1099_v43, %v1088_v53 }
0x13de   :  { %1103 = vrot.lane.b32.xlu2 %v1101_v54, %s1818_s18 }
0x1438   :  { %v1104_v57 = vpop.permute.xlu2 %1103 }
0x1439   :  { %v1106_v58 = vadd.f32 %v1104_v57, %v1096_v56 }
0x143b   :  { %1761 = vtanh.f32 %v1106_v58  ;;  %1114 = vrot.lane.b32.xlu2 %v1106_v58, %s1819_s19 }
0x1441   :  { %v1762_v59 = vpop.eup %1761 }
0x1442   :  { %1109 = vrot.lane.b32.xlu0 %v1762_v59, %s1817_s17 }
0x1495   :  { %v1115_v60 = vpop.permute.xlu2 %1114 }
0x1496   :  { %1117 = vst.msk [vmem:[#allocation5 + $0x8] sm:$0xff] %vm39_vm0, %v1115_v60 }
0x149d   :  { %v1163_v31 = vld [vmem:[#allocation5 + $0x8] sm:$0xff] }
0x14b4   :  { %v1110_v30 = vpop.permute.xlu0 %1109 }
0x14b5   :  { %v1112_v61 = vmul.f32 %v1110_v30, %v1088_v53 }
0x14b7   :  { %1119 = vrot.lane.b32.xlu1 %v1112_v61, %s1818_s18 }
0x14bf   :  { %1165 = vrot.lane.b32.xlu1 %v1163_v31, %s1818_s18 }
0x14c7   :  { %547 = vrot.lane.b32.xlu1 %v545_v62, %s1818_s18 }
0x1529   :  { %v1120_v63 = vpop.permute.xlu1 %1119 }
0x152a   :  { %1122 = vst.msk [vmem:[#allocation4 + $0x8] sm:$0xff] %vm39_vm0, %v1120_v63 }
0x1531   :  { %v1166_v0 = vpop.permute.xlu1 %1165  ;;  %v1124_v1 = vld [vmem:[#allocation4 + $0x8] sm:$0xff] }
0x1532   :  { %v1125_v3 = vpack.c.bf16 %v1124_v1, %v1124_v1 }
0x1534   :  { %1639 = vmatmul.msk.bf16.vlgmr.msra.gmra.mxu1 %vm39_vm0, %v1125_v3 }
0x1539   :  { %v548_v4 = vpop.permute.xlu1 %547 }
0x153a   :  { %551 = vst.msk [vmem:[#allocation3 + $0x10] sm:$0xf] %vm230_vm12, %v548_v4 }
0x15b1   :  { %v1138_v9 = vpop.f32.mrf.mxu1 }
0x15b2   :  { %v1142_v10 = vadd.f32 %v1138_v9, %v869_v6  ;;  %v1815_v9 = vld [vmem:[%s2223_s3] ss:$0 sm:$0xff] }
0x15b4   :  { %1763 = vtanh.f32 %v1142_v10  ;;  %v1640_v12 = vmul.f32 -1.442695, %v1142_v10  ;;  %v126_v10 = vadd.f32 %v1815_v9, %v2100_v26 }
0x15b6   :  { %1765 = vpow2.f32 %v1640_v12 }
0x15b9   :  { %v1140_v51 = vpop.f32.mrf.mxu1 }
0x15ba   :  { %v1764_v11 = vpop.eup %1763  ;;  %v732_v51 = vadd.f32 %v2083_v7, %v126_v10 }
0x15bb   :  { %1170 = vrot.lane.b32.xlu0 %v1764_v11, %s1817_s17 }
0x15bc   :  { %v1766_v13 = vpop.eup %1765 }
0x15bd   :  { %v1146_v14 = vadd.f32 1.0, %v1766_v13 }
0x15bf   :  { %1767 = vrcp.f32 %v1146_v14  ;;  %v1158_v21 = vand.u32 2147483648, %v1146_v14  ;;  %vm1152_vm15 = vweird.f32 %v1146_v14  ;;  %v1156_v15 = vand.u32 2147483647, %v1146_v14 }
0x15c1   :  { %v1159_v23 = vor.u32 1.1754944e-38, %v1158_v21  ;;  %vm1157_vm3 = vcmp.eq.f32.partialorder %v1156_v15, 8.507059e+37 }
0x15c5   :  { %v1768_v16 = vpop.eup %1767 }
0x15c6   :  { %v1148_v17 = vmul.f32 %v1768_v16, %v1146_v14  ;;  %vm1153_vm14 = vweird.f32 %v1768_v16  ;;  %v1596_v14 = vmul.f32 -1.442695, %v732_v51 }
0x15c7   :  { %vm1154_vm2 = vmor %vm1152_vm15, %vm1153_vm14 }
0x15c8   :  { %v1149_v18 = vsub.f32 1.0, %v1148_v17 }
0x15ca   :  { %v1150_v19 = vmul.f32 %v1768_v16, %v1149_v18 }
0x15cc   :  { %v1151_v20 = vadd.f32 %v1768_v16, %v1150_v19 }
0x15ce   :  { %v1155_v22 = vsel %vm1154_vm2, %v1768_v16, %v1151_v20 }
0x15cf   :  { %v1160_v36 = vsel %vm1157_vm3, %v1159_v23, %v1155_v22 }
0x15d0   :  { %v1168_v29 = vmul.f32 %v1166_v0, %v1160_v36 }
0x162d   :  { %v1171_v24 = vpop.permute.xlu0 %1170 }
0x162e   :  { %v1173_v25 = vmul.f32 %v1171_v24, %v1160_v36 }
0x1630   :  { %1175 = vrot.lane.b32.xlu2 %v1173_v25, %s1818_s18 }
0x1638   :  { %627 = vrot.lane.b32.xlu2 %v625_v8, %s1818_s18 }
0x168a   :  { %v1176_v32 = vpop.permute.xlu2 %1175 }
0x168b   :  { %v1178_v33 = vadd.f32 %v1176_v32, %v1168_v29 }
0x168d   :  { %1769 = vtanh.f32 %v1178_v33  ;;  %1186 = vrot.lane.b32.xlu1 %v1178_v33, %s1819_s19 }
0x1692   :  { %v628_v34 = vpop.permute.xlu2 %627 }
0x1693   :  { %v1770_v35 = vpop.eup %1769  ;;  %631 = vst.msk [vmem:[#allocation3 + $0x14] sm:$0xf] %vm230_vm12, %v628_v34 }
0x1694   :  { %1181 = vrot.lane.b32.xlu0 %v1770_v35, %s1817_s17 }
0x169a   :  { %v1668_v37 = vld [vmem:[#allocation3 + $0x10] sm:$0xff] }
0x169b   :  { %1623 = vmatmul.msk.bf16.gmra.mxu3 %vm39_vm0, %v1668_v37 }
0x16ff   :  { %v1187_v39 = vpop.permute.xlu1 %1186 }
0x1700   :  { %1189 = vst.msk [vmem:[#allocation5 + $0x8] sm:$0xff] %vm39_vm0, %v1187_v39 }
0x1706   :  { %v1182_v27 = vpop.permute.xlu0 %1181 }
0x1707   :  { %v1184_v40 = vmul.f32 %v1182_v27, %v1160_v36  ;;  %v1235_v41 = vld [vmem:[#allocation5 + $0x8] sm:$0xff] }
0x1709   :  { %1191 = vrot.lane.b32.xlu0 %v1184_v40, %s1818_s18 }
0x1711   :  { %1237 = vrot.lane.b32.xlu0 %v1235_v41, %s1818_s18 }
0x171e   :  { %v871_v46 = vpop.f32.mrf.mxu3 }
0x171f   :  { %v872_v48 = vadd.f32 %v2051_v47, %v871_v46 }
0x177b   :  { %v1192_v42 = vpop.permute.xlu0 %1191 }
0x177c   :  { %1194 = vst.msk [vmem:[#allocation4 + $0x8] sm:$0xff] %vm39_vm0, %v1192_v42  ;;  %v873_v42 = vpop.f32.mrf.mxu3 }
0x1783   :  { %v1196_v44 = vld [vmem:[#allocation4 + $0x8] sm:$0xff]  ;;  %v1238_v3 = vpop.permute.xlu0 %1237 }
0x1784   :  { %v1197_v45 = vpack.c.bf16 %v1196_v44, %v1196_v44  ;;  %v874_v44 = vadd.f32 %v2051_v47, %v873_v42 }
0x1786   :  { %1641 = vmatmul.msk.bf16.vlgmr.msra.gmra.mxu2 %vm39_vm0, %v1197_v45 }
0x1809   :  { %v1210_v49 = vpop.f32.mrf.mxu2 }
0x180a   :  { %v1214_v50 = vadd.f32 %v1210_v49, %v872_v48 }
0x180c   :  { %1771 = vtanh.f32 %v1214_v50  ;;  %v1642_v53 = vmul.f32 -1.442695, %v1214_v50 }
0x180e   :  { %1773 = vpow2.f32 %v1642_v53 }
0x1811   :  { %v1212_v52 = vpop.f32.mrf.mxu2 }
0x1812   :  { %v1772_v43 = vpop.eup %1771 }
0x1813   :  { %1242 = vrot.lane.b32.xlu2 %v1772_v43, %s1817_s17 }
0x1814   :  { %v1774_v54 = vpop.eup %1773 }
0x1815   :  { %v1218_v55 = vadd.f32 1.0, %v1774_v54 }
0x1817   :  { %1775 = vrcp.f32 %v1218_v55  ;;  %v1230_v30 = vand.u32 2147483648, %v1218_v55  ;;  %vm1224_vm5 = vweird.f32 %v1218_v55  ;;  %v1228_v61 = vand.u32 2147483647, %v1218_v55 }
0x1819   :  { %v1231_v62 = vor.u32 1.1754944e-38, %v1230_v30  ;;  %vm1229_vm7 = vcmp.eq.f32.partialorder %v1228_v61, 8.507059e+37 }
0x181d   :  { %v1776_v56 = vpop.eup %1775 }
0x181e   :  { %v1220_v57 = vmul.f32 %v1776_v56, %v1218_v55  ;;  %vm1225_vm4 = vweird.f32 %v1776_v56 }
0x181f   :  { %vm1226_vm6 = vmor %vm1224_vm5, %vm1225_vm4 }
0x1820   :  { %v1221_v58 = vsub.f32 1.0, %v1220_v57 }
0x1822   :  { %v1222_v59 = vmul.f32 %v1776_v56, %v1221_v58 }
0x1824   :  { %v1223_v60 = vadd.f32 %v1776_v56, %v1222_v59 }
0x1826   :  { %v1227_v31 = vsel %vm1226_vm6, %v1776_v56, %v1223_v60 }
0x1827   :  { %v1232_v0 = vsel %vm1229_vm7, %v1231_v62, %v1227_v31 }
0x1828   :  { %v1240_v4 = vmul.f32 %v1238_v3, %v1232_v0 }
0x186d   :  { %v1243_v63 = vpop.permute.xlu2 %1242 }
0x186e   :  { %v1245_v1 = vmul.f32 %v1243_v63, %v1232_v0 }
0x1870   :  { %1247 = vrot.lane.b32.xlu1 %v1245_v1, %s1818_s18 }
0x1878   :  { %696 = vrot.lane.b32.xlu1 %v2058_v28, %s1819_s19 }
0x18e2   :  { %v1248_v5 = vpop.permute.xlu1 %1247 }
0x18e3   :  { %v1250_v6 = vadd.f32 %v1248_v5, %v1240_v4  ;;  %v705_v5 = vpack.c.bf16 %v2064_v38, %v2064_v38 }
0x18e5   :  { %1777 = vtanh.f32 %v1250_v6 }
0x18e6   :  { %1779 = vtanh.f32 %v732_v51 }
0x18e7   :  { %1781 = vpow2.f32 %v1596_v14 }
0x18ea   :  { %v697_v11 = vpop.permute.xlu1 %696 }
0x18eb   :  { %v1778_v12 = vpop.eup %1777  ;;  %699 = vst.msk [vmem:[#allocation5] sm:$0xff] %vm39_vm0, %v697_v11 }
0x18ec   :  { %1253 = vrot.lane.b32.xlu2 %v1778_v12, %s1817_s17  ;;  %v1780_v28 = vpop.eup %1779 }
0x18ed   :  { %v1782_v16 = vpop.eup %1781 }
0x18ee   :  { %v736_v17 = vadd.f32 1.0, %v1782_v16 }
0x18f0   :  { %1783 = vrcp.f32 %v736_v17  ;;  %v748_v22 = vand.u32 2147483648, %v736_v17  ;;  %vm742_vm9 = vweird.f32 %v736_v17  ;;  %v746_v23 = vand.u32 2147483647, %v736_v17 }
0x18f2   :  { %v753_v13 = vld [vmem:[#allocation5] sm:$0xff]  ;;  %v749_v36 = vor.u32 1.1754944e-38, %v748_v22  ;;  %vm747_vm11 = vcmp.eq.f32.partialorder %v746_v23, 8.507059e+37 }
0x18f4   :  { %760 = vrot.lane.b32.xlu2 %v1780_v28, %s1817_s17 }
0x18f6   :  { %v1784_v26 = vpop.eup %1783 }
0x18f7   :  { %v738_v7 = vmul.f32 %v1784_v26, %v736_v17  ;;  %vm743_vm8 = vweird.f32 %v1784_v26 }
0x18f8   :  { %vm744_vm10 = vmor %vm742_vm9, %vm743_vm8  ;;  %vm44_vm9 = vcmask 7168  }
0x18f9   :  { %v739_v20 = vsub.f32 1.0, %v738_v7  ;;  %45 = vst.msk [vmem:[%s2229_s9] sm:$0xff] %vm44_vm9, %v1816_v2 }
0x18fb   :  { %v740_v21 = vmul.f32 %v1784_v26, %v739_v20 }
0x18fc   :  { %755 = vrot.lane.b32.xlu2 %v753_v13, %s1818_s18 }
0x18fd   :  { %v741_v15 = vadd.f32 %v1784_v26, %v740_v21 }
0x18ff   :  { %v745_v24 = vsel %vm744_vm10, %v1784_v26, %v741_v15 }
0x1900   :  { %v750_v8 = vsel %vm747_vm11, %v749_v36, %v745_v24 }
0x1946   :  { %v1254_v18 = vpop.permute.xlu2 %1253 }
0x1947   :  { %v1256_v19 = vmul.f32 %v1254_v18, %v1232_v0 }
0x1949   :  { %1263 = vrot.lane.b32.xlu0 %v1256_v19, %s1818_s18 }
0x194e   :  { %v761_v25 = vpop.permute.xlu2 %760 }
0x194f   :  { %v763_v29 = vmul.f32 %v761_v25, %v750_v8 }
0x1951   :  { %1258 = vrot.lane.b32.xlu0 %v1250_v6, %s1819_s19 }
0x1956   :  { %v756_v37 = vpop.permute.xlu2 %755 }
0x1957   :  { %v758_v39 = vmul.f32 %v756_v37, %v750_v8 }
0x1959   :  { %765 = vrot.lane.b32.xlu0 %v763_v29, %s1818_s18 }
0x19bb   :  { %v1264_v32 = vpop.permute.xlu0 %1263 }
0x19bc   :  { %1266 = vst.msk [vmem:[#allocation4 + $0x8] sm:$0xff] %vm39_vm0, %v1264_v32 }
0x19c3   :  { %v1259_v33 = vpop.permute.xlu0 %1258  ;;  %v1268_v34 = vld [vmem:[#allocation4 + $0x8] sm:$0xff] }
0x19c4   :  { %1261 = vst.msk [vmem:[#allocation5 + $0x8] sm:$0xff] %vm39_vm0, %v1259_v33  ;;  %v1269_v35 = vpack.c.bf16 %v1268_v34, %v1268_v34 }
0x19c6   :  { %1643 = vmatmul.msk.bf16.vlgmr.msra.gmra.mxu0 %vm39_vm0, %v1269_v35 }
0x19cb   :  { %v766_v27 = vpop.permute.xlu0 %765  ;;  %v1307_v53 = vld [vmem:[#allocation5 + $0x8] sm:$0xff] }
0x19cc   :  { %v2151_v40 = vadd.f32 %v766_v27, %v758_v39 }
0x19ce   :  { %1785 = vtanh.f32 %v2151_v40 }
0x19d4   :  { %v1786_v41 = vpop.eup %1785 }
0x19d5   :  { %771 = vrot.lane.b32.xlu0 %v1786_v41, %s1817_s17 }
0x1a43   :  { %v1282_v45 = vpop.f32.mrf.mxu0 }
0x1a44   :  { %v1286_v46 = vadd.f32 %v1282_v45, %v874_v44 }
0x1a46   :  { %1787 = vtanh.f32 %v1286_v46  ;;  %v1644_v54 = vmul.f32 -1.442695, %v1286_v46 }
0x1a47   :  { %v772_v48 = vpop.permute.xlu0 %771 }
0x1a48   :  { %v2156_v49 = vmul.f32 %v772_v48, %v750_v8  ;;  %1789 = vpow2.f32 %v1644_v54 }
0x1a4a   :  { %v785_v50 = vpack.c.bf16 %v2156_v49, %v2156_v49 }
0x1a4b   :  { %v1284_v52 = vpop.f32.mrf.mxu0 }
0x1a4c   :  { %v1788_v43 = vpop.eup %1787  ;;  %787 = vrot.lane.b32.xlu0 %v785_v50, %s1818_s18 }
0x1a4d   :  { %1314 = vrot.lane.b32.xlu1 %v1788_v43, %s1817_s17 }
0x1a4e   :  { %v1790_v55 = vpop.eup %1789 }
0x1a4f   :  { %v1290_v56 = vadd.f32 1.0, %v1790_v55 }
0x1a51   :  { %1791 = vrcp.f32 %v1290_v56  ;;  %v1302_v61 = vand.u32 2147483648, %v1290_v56  ;;  %vm1296_vm13 = vweird.f32 %v1290_v56  ;;  %v1300_v31 = vand.u32 2147483647, %v1290_v56 }
0x1a53   :  { %v1303_v63 = vor.u32 1.1754944e-38, %v1302_v61  ;;  %vm1301_vm15 = vcmp.eq.f32.partialorder %v1300_v31, 8.507059e+37 }
0x1a55   :  { %1309 = vrot.lane.b32.xlu1 %v1307_v53, %s1818_s18 }
0x1a57   :  { %v1792_v57 = vpop.eup %1791 }
0x1a58   :  { %v1292_v58 = vmul.f32 %v1792_v57, %v1290_v56  ;;  %vm1297_vm1 = vweird.f32 %v1792_v57 }
0x1a59   :  { %vm1298_vm14 = vmor %vm1296_vm13, %vm1297_vm1 }
0x1a5a   :  { %v1293_v59 = vsub.f32 1.0, %v1292_v58 }
0x1a5c   :  { %v1294_v60 = vmul.f32 %v1792_v57, %v1293_v59 }
0x1a5e   :  { %v1295_v30 = vadd.f32 %v1792_v57, %v1294_v60 }
0x1a60   :  { %v1299_v62 = vsel %vm1298_vm14, %v1792_v57, %v1295_v30 }
0x1a61   :  { %v1304_v1 = vsel %vm1301_vm15, %v1303_v63, %v1299_v62 }
0x1abe   :  { %v788_v0 = vpop.permute.xlu0 %787 }
0x1abf   :  { %791 = vst.msk [vmem:[#allocation3 + $0x1c] sm:$0xf] %vm230_vm12, %v788_v0  ;;  %v1315_v3 = vpop.permute.xlu1 %1314 }
0x1ac0   :  { %v1317_v4 = vmul.f32 %v1315_v3, %v1304_v1 }
0x1ac2   :  { %1319 = vrot.lane.b32.xlu2 %v1317_v4, %s1818_s18 }
0x1ac7   :  { %v1310_v6 = vpop.permute.xlu1 %1309 }
0x1ac8   :  { %v1312_v9 = vmul.f32 %v1310_v6, %v1304_v1 }
0x1aca   :  { %707 = vrot.lane.b32.xlu2 %v705_v5, %s1818_s18 }
0x1b1c   :  { %v1320_v10 = vpop.permute.xlu2 %1319 }
0x1b1d   :  { %v1322_v51 = vadd.f32 %v1320_v10, %v1312_v9 }
0x1b1f   :  { %1793 = vtanh.f32 %v1322_v51  ;;  %1330 = vrot.lane.b32.xlu2 %v1322_v51, %s1819_s19 }
0x1b24   :  { %v708_v11 = vpop.permute.xlu2 %707 }
0x1b25   :  { %v1794_v12 = vpop.eup %1793  ;;  %711 = vst.msk [vmem:[#allocation3 + $0x18] sm:$0xf] %vm230_vm12, %v708_v11 }
0x1b26   :  { %1325 = vrot.lane.b32.xlu1 %v1794_v12, %s1817_s17 }
0x1b2c   :  { %v1669_v28 = vld [vmem:[#allocation3 + $0x18] sm:$0xff] }
0x1b2d   :  { %1624 = vmatmul.msk.bf16.gmra.mxu3 %vm39_vm0, %v1669_v28 }
0x1b79   :  { %v1331_v13 = vpop.permute.xlu2 %1330 }
0x1b7a   :  { %1333 = vst.msk [vmem:[#allocation5 + $0x8] sm:$0xff] %vm39_vm0, %v1331_v13 }
0x1b81   :  { %v1379_v16 = vld [vmem:[#allocation5 + $0x8] sm:$0xff] }
0x1b98   :  { %v1326_v38 = vpop.permute.xlu1 %1325 }
0x1b99   :  { %v1328_v14 = vmul.f32 %v1326_v38, %v1304_v1 }
0x1b9b   :  { %1335 = vrot.lane.b32.xlu1 %v1328_v14, %s1818_s18 }
0x1ba3   :  { %1381 = vrot.lane.b32.xlu1 %v1379_v16, %s1818_s18 }
0x1bb0   :  { %v876_v18 = vpop.f32.mrf.mxu3 }
0x1bb1   :  { %v877_v19 = vadd.f32 %v2051_v47, %v876_v18 }
0x1bb8   :  { %v878_v58 = vpop.f32.mrf.mxu3 }
0x1bb9   :  { %v879_v59 = vadd.f32 %v2051_v47, %v878_v58 }
0x1c0d   :  { %v1336_v17 = vpop.permute.xlu1 %1335 }
0x1c0e   :  { %1338 = vst.msk [vmem:[#allocation4 + $0x8] sm:$0xff] %vm39_vm0, %v1336_v17 }
0x1c15   :  { %v1340_v26 = vld [vmem:[#allocation4 + $0x8] sm:$0xff]  ;;  %v1382_v44 = vpop.permute.xlu1 %1381 }
0x1c16   :  { %v1341_v7 = vpack.c.bf16 %v1340_v26, %v1340_v26 }
0x1c18   :  { %1645 = vmatmul.msk.bf16.vlgmr.msrb.gmra.mxu1 %vm39_vm0, %v1341_v7  ;;  %v1675_v7 = vld [vmem:[%s2227_s7 + $0x8] sm:$0xff] }
0x1c19   :  { %1517 = vmatpush.bf16.msrb.mxu0 %v1675_v7 }
0x1c95   :  { %v1354_v20 = vpop.f32.mrf.mxu1 }
0x1c96   :  { %v1358_v21 = vadd.f32 %v1354_v20, %v877_v19  ;;  %v1674_v20 = vld [vmem:[%s2227_s7] sm:$0xff] }
0x1c97   :  { %1518 = vmatpush.bf16.msrb.mxu0 %v1674_v20 }
0x1c98   :  { %1795 = vtanh.f32 %v1358_v21  ;;  %v1646_v23 = vmul.f32 -1.442695, %v1358_v21 }
0x1c9a   :  { %1797 = vpow2.f32 %v1646_v23 }
0x1c9d   :  { %v1356_v15 = vpop.f32.mrf.mxu1 }
0x1c9e   :  { %v1796_v22 = vpop.eup %1795 }
0x1c9f   :  { %1386 = vrot.lane.b32.xlu0 %v1796_v22, %s1817_s17 }
0x1ca0   :  { %v1798_v24 = vpop.eup %1797 }
0x1ca1   :  { %v1362_v36 = vadd.f32 1.0, %v1798_v24 }
0x1ca3   :  { %1799 = vrcp.f32 %v1362_v36  ;;  %v1374_v34 = vand.u32 2147483648, %v1362_v36  ;;  %vm1368_vm2 = vweird.f32 %v1362_v36  ;;  %v1372_v35 = vand.u32 2147483647, %v1362_v36 }
0x1ca5   :  { %v1375_v39 = vor.u32 1.1754944e-38, %v1374_v34  ;;  %vm1373_vm4 = vcmp.eq.f32.partialorder %v1372_v35, 8.507059e+37 }
0x1ca9   :  { %v1800_v25 = vpop.eup %1799 }
0x1caa   :  { %v1364_v8 = vmul.f32 %v1800_v25, %v1362_v36  ;;  %vm1369_vm12 = vweird.f32 %v1800_v25 }
0x1cab   :  { %vm1370_vm3 = vmor %vm1368_vm2, %vm1369_vm12 }
0x1cac   :  { %v1365_v29 = vsub.f32 1.0, %v1364_v8 }
0x1cae   :  { %v1366_v32 = vmul.f32 %v1800_v25, %v1365_v29 }
0x1cb0   :  { %v1367_v33 = vadd.f32 %v1800_v25, %v1366_v32 }
0x1cb2   :  { %v1371_v37 = vsel %vm1370_vm3, %v1800_v25, %v1367_v33 }
0x1cb3   :  { %v1376_v41 = vsel %vm1373_vm4, %v1375_v39, %v1371_v37 }
0x1cb4   :  { %v1384_v45 = vmul.f32 %v1382_v44, %v1376_v41 }
0x1d11   :  { %v1387_v27 = vpop.permute.xlu0 %1386 }
0x1d12   :  { %v1389_v42 = vmul.f32 %v1387_v27, %v1376_v41 }
0x1d14   :  { %1391 = vrot.lane.b32.xlu2 %v1389_v42, %s1818_s18 }
0x1d6e   :  { %v1392_v46 = vpop.permute.xlu2 %1391 }
0x1d6f   :  { %v1394_v48 = vadd.f32 %v1392_v46, %v1384_v45 }
0x1d71   :  { %1801 = vtanh.f32 %v1394_v48  ;;  %1402 = vrot.lane.b32.xlu2 %v1394_v48, %s1819_s19 }
0x1d77   :  { %v1802_v50 = vpop.eup %1801 }
0x1d78   :  { %1397 = vrot.lane.b32.xlu0 %v1802_v50, %s1817_s17 }
0x1dcb   :  { %v1403_v52 = vpop.permute.xlu2 %1402 }
0x1dcc   :  { %1405 = vst.msk [vmem:[#allocation5 + $0x8] sm:$0xff] %vm39_vm0, %v1403_v52 }
0x1dd3   :  { %v1451_v54 = vld [vmem:[#allocation5 + $0x8] sm:$0xff] }
0x1dea   :  { %v1398_v43 = vpop.permute.xlu0 %1397 }
0x1deb   :  { %v1400_v53 = vmul.f32 %v1398_v43, %v1376_v41 }
0x1ded   :  { %1407 = vrot.lane.b32.xlu1 %v1400_v53, %s1818_s18 }
0x1df5   :  { %1453 = vrot.lane.b32.xlu1 %v1451_v54, %s1818_s18 }
0x1e5f   :  { %v1408_v55 = vpop.permute.xlu1 %1407 }
0x1e60   :  { %1410 = vst.msk [vmem:[#allocation4 + $0x8] sm:$0xff] %vm39_vm0, %v1408_v55 }
0x1e67   :  { %v1412_v56 = vld [vmem:[#allocation4 + $0x8] sm:$0xff]  ;;  %v1454_v13 = vpop.permute.xlu1 %1453 }
0x1e68   :  { %v1413_v57 = vpack.c.bf16 %v1412_v56, %v1412_v56 }
0x1e6a   :  { %1647 = vmatmul.msk.bf16.vlgmr.msrb.gmra.mxu2 %vm39_vm0, %v1413_v57 }
0x1eed   :  { %v1426_v60 = vpop.f32.mrf.mxu2 }
0x1eee   :  { %v1430_v30 = vadd.f32 %v1426_v60, %v879_v59 }
0x1ef0   :  { %1803 = vtanh.f32 %v1430_v30  ;;  %v1648_v62 = vmul.f32 -1.442695, %v1430_v30 }
0x1ef2   :  { %1805 = vpow2.f32 %v1648_v62 }
0x1ef5   :  { %v1428_v61 = vpop.f32.mrf.mxu2 }
0x1ef6   :  { %v1804_v31 = vpop.eup %1803 }
0x1ef7   :  { %1458 = vrot.lane.b32.xlu0 %v1804_v31, %s1817_s17 }
0x1ef8   :  { %v1806_v63 = vpop.eup %1805 }
0x1ef9   :  { %v1434_v0 = vadd.f32 1.0, %v1806_v63 }
0x1efb   :  { %1807 = vrcp.f32 %v1434_v0  ;;  %v1446_v9 = vand.u32 2147483648, %v1434_v0  ;;  %vm1440_vm6 = vweird.f32 %v1434_v0  ;;  %v1444_v47 = vand.u32 2147483647, %v1434_v0 }
0x1efd   :  { %v1447_v51 = vor.u32 1.1754944e-38, %v1446_v9  ;;  %vm1445_vm8 = vcmp.eq.f32.partialorder %v1444_v47, 8.507059e+37 }
0x1f01   :  { %v1808_v1 = vpop.eup %1807 }
0x1f02   :  { %v1436_v3 = vmul.f32 %v1808_v1, %v1434_v0  ;;  %vm1441_vm5 = vweird.f32 %v1808_v1 }
0x1f03   :  { %vm1442_vm7 = vmor %vm1440_vm6, %vm1441_vm5 }
0x1f04   :  { %v1437_v4 = vsub.f32 1.0, %v1436_v3 }
0x1f06   :  { %v1438_v5 = vmul.f32 %v1808_v1, %v1437_v4 }
0x1f08   :  { %v1439_v6 = vadd.f32 %v1808_v1, %v1438_v5 }
0x1f0a   :  { %v1443_v10 = vsel %vm1442_vm7, %v1808_v1, %v1439_v6 }
0x1f0b   :  { %v1448_v12 = vsel %vm1445_vm8, %v1447_v51, %v1443_v10 }
0x1f0c   :  { %v1456_v38 = vmul.f32 %v1454_v13, %v1448_v12 }
0x1f69   :  { %v1459_v11 = vpop.permute.xlu0 %1458 }
0x1f6a   :  { %v1461_v28 = vmul.f32 %v1459_v11, %v1448_v12 }
0x1f6c   :  { %1463 = vrot.lane.b32.xlu2 %v1461_v28, %s1818_s18 }
0x1f74   :  { %776 = vrot.lane.b32.xlu2 %v2151_v40, %s1819_s19 }
0x1fc6   :  { %v1464_v14 = vpop.permute.xlu2 %1463 }
0x1fc7   :  { %v1466_v16 = vadd.f32 %v1464_v14, %v1456_v38 }
0x1fc9   :  { %1809 = vtanh.f32 %v1466_v16 }
0x1fce   :  { %v777_v17 = vpop.permute.xlu2 %776 }
0x1fcf   :  { %v1810_v26 = vpop.eup %1809  ;;  %779 = vst.msk [vmem:[#allocation5] sm:$0xff] %vm39_vm0, %v777_v17 }
0x1fd0   :  { %1469 = vrot.lane.b32.xlu0 %v1810_v26, %s1817_s17 }
0x1fd8   :  { %781 = vrot.lane.b32.xlu0 %v2156_v49, %s1818_s18  ;;  %v14_v49 = vstv %s2228_s8 }
0x1fd9   :  { %15 = vst [vmem:[#allocation6] sm:$0x1] %v14_v49 }
0x1fe0   :  { %v1682_v24 = vld [vmem:[#allocation6] ss:$0 sm:$0xff] }
0x2042   :  { %v1470_v40 = vpop.permute.xlu0 %1469 }
0x2043   :  { %v1472_v18 = vmul.f32 %v1470_v40, %v1448_v12 }
0x2045   :  { %1479 = vrot.lane.b32.xlu1 %v1472_v18, %s1818_s18 }
0x204a   :  { %v782_v19 = vpop.permute.xlu0 %781 }
0x204b   :  { %784 = vst.msk [vmem:[#allocation4] sm:$0xff] %vm39_vm0, %v782_v19 }
0x204d   :  { %1474 = vrot.lane.b32.xlu1 %v1466_v16, %s1819_s19 }
0x20b7   :  { %v1480_v21 = vpop.permute.xlu1 %1479 }
0x20b8   :  { %1482 = vst.msk [vmem:[#allocation4 + $0x8] sm:$0xff] %vm39_vm0, %v1480_v21 }
0x20bf   :  { %v1475_v15 = vpop.permute.xlu1 %1474  ;;  %v1486_v22 = vld [vmem:[#allocation4 + $0x8] sm:$0xff] }
0x20c0   :  { %1477 = vst.msk [vmem:[#allocation5 + $0x8] sm:$0xff] %vm39_vm0, %v1475_v15  ;;  %v1487_v23 = vpack.c.bf16 %v1486_v22, %v1486_v22 }
0x20c2   :  { %1657 = vmatmul.msk.bf16.vlgmr.msrb.gmra.mxu0 %vm39_vm0, %v1487_v23 }
0x213f   :  { %v1520_v36 = vpop.f32.mrf.mxu0 }
0x2140   :  { %v1521_v25 = vadd.f32 %v1682_v24, %v1520_v36 }
0x2142   :  { %v1658_v8 = vmul.f32 -1.442695, %v1521_v25 }
0x2144   :  { %1811 = vpow2.f32 %v1658_v8 }
0x2147   :  { %v1522_v29 = vpop.f32.mrf.mxu0 }
0x214a   :  { %v1812_v32 = vpop.eup %1811 }
0x214b   :  { %v1527_v33 = vadd.f32 1.0, %v1812_v32 }
0x214d   :  { %1813 = vrcp.f32 %v1527_v33  ;;  %v1539_v37 = vand.u32 2147483648, %v1527_v33  ;;  %v1537_v27 = vand.u32 2147483647, %v1527_v33  ;;  %vm1533_vm11 = vweird.f32 %v1527_v33 }
0x214f   :  { %v1540_v42 = vor.u32 1.1754944e-38, %v1539_v37  ;;  %vm1538_vm0 = vcmp.eq.f32.partialorder %v1537_v27, 8.507059e+37 }
0x2153   :  { %v1814_v2 = vpop.eup %1813 }
0x2154   :  { %v1529_v34 = vmul.f32 %v1814_v2, %v1527_v33  ;;  %vm1534_vm10 = vweird.f32 %v1814_v2 }
0x2155   :  { %vm1535_vm1 = vmor %vm1533_vm11, %vm1534_vm10 }
0x2156   :  { %v1530_v35 = vsub.f32 1.0, %v1529_v34 }
0x2158   :  { %v1531_v39 = vmul.f32 %v1814_v2, %v1530_v35 }
0x215a   :  { %v1532_v41 = vadd.f32 %v1814_v2, %v1531_v39 }
0x215c   :  { %v1536_v44 = vsel %vm1535_vm1, %v1814_v2, %v1532_v41 }
0x215d   :  { %v1541_v45 = vsel %vm1538_vm0, %v1540_v42, %v1536_v44 }
0x215e   :  { %1544 = vst.msk [vmem:[%s2229_s9] sm:$0xff] %vm44_vm9, %v1541_v45 }

</bundles_post_ra>
